<compile_context>
chip_gen: v7x
topology: tpu7x:2x2x1
jax: 0.10.0
libtpu: 0.0.40
codegen_flags: <defaults>
</compile_context>

<pallas_src>
import functools
import math

import jax
import jax.numpy as jnp
from jax.experimental import pallas as pl
from jax.experimental.pallas import tpu as pltpu


# --------------------------------------------------------------------------- #
# Pallas kernel: one batch-tile per grid step, feature-major dataflow.
# --------------------------------------------------------------------------- #
def _cnp_kernel(ne_layers, nd_layers, with_logp, compute_dtype, *refs):
    out_ref = refs[-1]
    if with_logp:
        cxy_ref, tx_ref, ty_ref = refs[0], refs[1], refs[2]
        prefs = refs[3:-1]
    else:
        cxy_ref, tx_ref = refs[0], refs[1]
        ty_ref = None
        prefs = refs[2:-1]

    f32 = jnp.float32
    it = iter(prefs)
    nxt = lambda: next(it)

    def mm(wt, a):
        # W^T @ a on the MXU. Weights are pre-cast to compute_dtype in the
        # wrapper; only the activation is cast here. f32 accumulate.
        return jnp.dot(wt, a.astype(compute_dtype), preferred_element_type=f32)

    def fma_in(wt, base, x):
        # Tiny contraction dim (x / y feature columns): lane-dense outer-product
        # FMAs on the VPU instead of a degenerate K<=2 MXU matmul.
        acc = base + wt[:, 0:1] * x[0:1, :]
        for k in range(1, x.shape[0]):
            acc = acc + wt[:, k:k + 1] * x[k:k + 1, :]
        return acc

    S = nxt()[...]                        # (bt*Nc, bt*Nt) block-diag ones/Nc
    cxy = cxy_ref[...]                    # (x+y, bt*Nc)  f32
    tx = tx_ref[...]                      # (x,   bt*Nt)  f32

    # ---------------- encoder MLP over bt*Nc context columns --------------- #
    W = nxt()[...]                        # (Ue, x+y)  f32 (FMA weight)
    b = nxt()[...]                        # (Ue, 1)    f32
    if cxy.shape[0] <= 8:
        h = fma_in(W, b, cxy)
    else:
        h = mm(W.astype(compute_dtype), cxy) + b
    h = jnp.maximum(h, 0.0)               # (Ue, bt*Nc)

    if ne_layers > 1:
        Ws = nxt()                        # (Le-1, Ue, Ue) compute_dtype
        bs = nxt()                        # (Le-1, Ue, 1)  f32
        for l in range(ne_layers - 1):
            h = jnp.maximum(mm(Ws[l], h) + bs[l], 0.0)

    Wo = nxt()[...]                       # (r_dim, Ue) compute_dtype
    bo = nxt()[...]                       # (r_dim, 1)  f32
    r = mm(Wo, h) + bo                    # (r_dim, bt*Nc)

    # mean over context points + broadcast over target points, fused into ONE
    # lane-dense MXU matmul against the constant block-diagonal ones/Nc matrix.
    rep_rows = jnp.dot(r.astype(compute_dtype), S,
                       preferred_element_type=f32)            # (r_dim, bt*Nt)

    # ---------------- decoder MLP over bt*Nt target columns ---------------- #
    Wr = nxt()[...]                       # (Ud, r_dim) compute_dtype
    Wx = nxt()[...]                       # (Ud, x)     f32 (FMA weight)
    bd = nxt()[...]                       # (Ud, 1)     f32
    h = mm(Wr, rep_rows)                  # (Ud, bt*Nt)
    if tx.shape[0] <= 8:
        h = fma_in(Wx, h, tx)
    else:
        h = h + mm(Wx.astype(compute_dtype), tx)
    h = jnp.maximum(h + bd, 0.0)

    if nd_layers > 1:
        Ws = nxt()                        # (Ld-1, Ud, Ud) compute_dtype
        bs = nxt()                        # (Ld-1, Ud, 1)  f32
        for l in range(nd_layers - 1):
            h = jnp.maximum(mm(Ws[l], h) + bs[l], 0.0)

    # fused mu / log_sigma heads: one (2*y, Ud) matmul, split after the dot
    Wh = nxt()[...]                       # (2y, Ud) compute_dtype
    bh = nxt()[...]                       # (2y, 1)  f32
    o = mm(Wh, h) + bh                    # (2y, bt*Nt)
    y_size = o.shape[0] // 2
    mu = o[:y_size, :]
    # sigma = 0.1 + 0.9 * softplus(log_sigma)
    sigma = 0.1 + 0.9 * jnp.logaddexp(o[y_size:, :], 0.0)

    if with_logp:
        ty = ty_ref[...]                  # (y, bt*Nt)
        z = (ty - mu) / sigma
        logp = -0.5 * jnp.sum(z * z + 2.0 * jnp.log(sigma)
                              + math.log(2.0 * math.pi),
                              axis=0, keepdims=True)          # (1, bt*Nt)
        out_ref[...] = jnp.concatenate([mu, sigma, logp], axis=0)
    else:
        out_ref[...] = jnp.concatenate([mu, sigma], axis=0)


# --------------------------------------------------------------------------- #
# Parameter construction (PyTorch-Linear uniform init), packed TRANSPOSED.
# --------------------------------------------------------------------------- #
def _init_linear_t(key, fan_in, fan_out):
    """nn.Linear-style init, returned transposed: W^T (out, in), b (out, 1)."""
    kw, kb = jax.random.split(key)
    bound = 1.0 / math.sqrt(fan_in)
    Wt = jax.random.uniform(kw, (fan_out, fan_in), jnp.float32, -bound, bound)
    b = jax.random.uniform(kb, (fan_out, 1), jnp.float32, -bound, bound)
    return Wt, b


def init_cnp_params(key, *, encoder_num_layers, encoder_num_units,
                    decoder_num_layers, decoder_num_units,
                    r_dim, x_size, y_size):
    """Returns packed params (kernel consumption order) + config dict."""
    keys = jax.random.split(key, 4 + encoder_num_layers + decoder_num_layers)
    ki = iter(keys)
    params, is_mxu = [], []

    def add(p, mxu):
        params.append(p)
        is_mxu.append(mxu)

    # encoder first layer Linear(x+y, Ue): consumed as VPU FMAs
    Wt, b = _init_linear_t(next(ki), x_size + y_size, encoder_num_units)
    add(Wt, False); add(b, False)
    if encoder_num_layers > 1:
        Ws, bs = [], []
        for _ in range(encoder_num_layers - 1):
            Wt, b = _init_linear_t(next(ki), encoder_num_units, encoder_num_units)
            Ws.append(Wt); bs.append(b)
        add(jnp.stack(Ws), True); add(jnp.stack(bs), False)
    # encoder output Linear(Ue, r_dim)
    Wt, b = _init_linear_t(next(ki), encoder_num_units, r_dim)
    add(Wt, True); add(b, False)

    # decoder first layer Linear(r+x, Ud): r-part (MXU) / x-part (VPU FMA)
    Wt, b = _init_linear_t(next(ki), r_dim + x_size, decoder_num_units)
    add(Wt[:, :r_dim], True); add(Wt[:, r_dim:], False); add(b, False)
    if decoder_num_layers > 1:
        Ws, bs = [], []
        for _ in range(decoder_num_layers - 1):
            Wt, b = _init_linear_t(next(ki), decoder_num_units, decoder_num_units)
            Ws.append(Wt); bs.append(b)
        add(jnp.stack(Ws), True); add(jnp.stack(bs), False)
    # decoder output Linear(Ud, 2*y): mu / log_sigma heads kept FUSED
    Wt, b = _init_linear_t(next(ki), decoder_num_units, 2 * y_size)
    add(Wt, True); add(b, False)

    cfg = dict(encoder_num_layers=encoder_num_layers,
               decoder_num_layers=decoder_num_layers,
               encoder_num_units=encoder_num_units,
               decoder_num_units=decoder_num_units,
               x_size=x_size, y_size=y_size, r_dim=r_dim,
               mxu_weight=tuple(is_mxu))
    return params, cfg


# --------------------------------------------------------------------------- #
# Generation-aware helpers.
# --------------------------------------------------------------------------- #
def _device_kind():
    try:
        return jax.devices()[0].device_kind.lower()
    except Exception:
        return ""


def _num_tensorcores():
    return 2 if "v7" in _device_kind() else 1


def _default_compute_dtype():
    kind = _device_kind()
    return jnp.bfloat16 if ("v6" in kind or "v7" in kind) else jnp.float32


def _pick_batch_tile(B, Nc, Nt, num_tc):
    # Single grid step on 1-TC chips (v5e/v6e): the grid is a serial loop, so
    # extra steps are pure overhead + smaller lane-dense N.  On v7x split into
    # a multiple of 2 lane-aligned (x128) tiles so both TensorCores get work.
    if num_tc <= 1 or B <= 1:
        return B
    for n_tiles in range(num_tc, B + 1):
        if B % n_tiles:
            continue
        bt = B // n_tiles
        if (n_tiles % num_tc == 0 and (bt * Nc) % 128 == 0
                and (bt * Nt) % 128 == 0):
            return bt
    return B


# --------------------------------------------------------------------------- #
# Wrapper: layout plumbing + pallas_call.
# --------------------------------------------------------------------------- #
def cnp_forward(params, cfg, query, target_y=None, *,
                batch_tile=None, compute_dtype=None):
    (context_X, context_y), target_X = query
    B, Nc, x_size = context_X.shape
    y_size = context_y.shape[-1]
    Nt = target_X.shape[1]
    with_logp = target_y is not None
    if compute_dtype is None:
        compute_dtype = _default_compute_dtype()

    if batch_tile is None:
        batch_tile = _pick_batch_tile(B, Nc, Nt, _num_tensorcores())
    else:
        ok = (B % batch_tile == 0) and (
            batch_tile == B
            or ((batch_tile * Nc) % 128 == 0 and (batch_tile * Nt) % 128 == 0))
        if not ok:
            raise ValueError(
                f"batch_tile={batch_tile} must divide B={B} and give 128-lane"
                f"-aligned row counts for Nc={Nc}, Nt={Nt} (or equal B).")
    n_tiles = B // batch_tile
    rc, rt = batch_tile * Nc, batch_tile * Nt

    # Layout plumbing: feature-major (features, batch*points) lane-dense slabs.
    cxyT = jnp.concatenate([context_X, context_y],
                           axis=-1).reshape(B * Nc, x_size + y_size).T
    txT = target_X.reshape(B * Nt, x_size).T
    data = [cxyT, txT]
    data_specs = [
        pl.BlockSpec((x_size + y_size, rc), lambda i: (0, i)),
        pl.BlockSpec((x_size, rt), lambda i: (0, i)),
    ]
    if with_logp:
        data.append(target_y.reshape(B * Nt, y_size).T)
        data_specs.append(pl.BlockSpec((y_size, rt), lambda i: (0, i)))

    # Constant block-diagonal ones/Nc matrix: fuses the per-batch mean over
    # context points AND the broadcast over target points into one MXU matmul.
    row_b = jnp.arange(rc, dtype=jnp.int32)[:, None] // Nc
    col_b = jnp.arange(rt, dtype=jnp.int32)[None, :] // Nt
    S = jnp.where(row_b == col_b, 1.0 / Nc, 0.0).astype(compute_dtype)

    # Pre-cast the MXU weight slabs ONCE (halves their HBM/VMEM traffic on the
    # bf16 path); biases & tiny-K FMA weights stay f32.
    kparams = [S] + [p.astype(compute_dtype) if m else p
                     for p, m in zip(params, cfg["mxu_weight"])]

    # Single packed [mu | sigma | log_p] slab, rows on the lane axis.
    out_w = 2 * y_size + (1 if with_logp else 0)
    out_shape = jax.ShapeDtypeStruct((out_w, B * Nt), jnp.float32)
    out_spec = pl.BlockSpec((out_w, rt), lambda i: (0, i))

    # Explicit VMEM budget: covers v5e's 16 MiB scoped default and keeps the
    # tile math honest under v7x's 64 MiB physical VMEM.
    def _nb(a):
        return a.size * a.dtype.itemsize
    umax = max(cfg["encoder_num_units"], cfg["decoder_num_units"], cfg["r_dim"])
    est = (2 * sum(_nb(a) // n_tiles for a in data)      # double-buffered data
           + 2 * out_w * rt * 4                          # double-buffered out
           + sum(_nb(p) for p in kparams)                # resident params
           + 6 * umax * max(rc, rt) * 4)                 # live activation temps
    vmem_limit = int(min(32 * 1024 * 1024, max(16 * 1024 * 1024, 4 * est)))

    kernel = functools.partial(
        _cnp_kernel, cfg["encoder_num_layers"], cfg["decoder_num_layers"],
        with_logp, compute_dtype)

    def _const_map(ndim):
        return lambda i: (0,) * ndim

    def _build(single_buffer_params):
        if single_buffer_params:
            pspecs = [pl.BlockSpec(p.shape, _const_map(p.ndim),
                                   pipeline_mode=pl.Buffered(1))
                      for p in kparams]
        else:
            pspecs = [pl.BlockSpec(p.shape, _const_map(p.ndim))
                      for p in kparams]
        return pl.pallas_call(
            kernel,
            out_shape=out_shape,
            grid=(n_tiles,),
            in_specs=data_specs + pspecs,
            out_specs=out_spec,
            compiler_params=pltpu.CompilerParams(
                dimension_semantics=("parallel",),
                vmem_limit_bytes=vmem_limit),
        )

    try:
        # Single-buffer the resident parameter slabs (constant index maps).
        packed = _build(True)(*data, *kparams)
    except Exception:
        # Fallback: default double-buffered params (tiny at these sizes).
        packed = _build(False)(*data, *kparams)

    mu = packed[:y_size].T.reshape(B, Nt, y_size)
    sigma = packed[y_size:2 * y_size].T.reshape(B, Nt, y_size)
    log_p = packed[2 * y_size].reshape(B, Nt) if with_logp else None
    return log_p, mu, sigma


# --------------------------------------------------------------------------- #
# Pure-JAX reference (correctness check), consuming the same packed params.
# --------------------------------------------------------------------------- #
def cnp_reference(params, cfg, query, target_y=None):
    (cX, cy), tX = query
    Le, Ld = cfg["encoder_num_layers"], cfg["decoder_num_layers"]
    it = iter(params)
    nxt = lambda: next(it)

    We_in, be_in = nxt(), nxt()
    We_hid, be_hid = (nxt(), nxt()) if Le > 1 else (None, None)
    We_out, be_out = nxt(), nxt()
    Wd_in_r, Wd_in_x, bd_in = nxt(), nxt(), nxt()
    Wd_hid, bd_hid = (nxt(), nxt()) if Ld > 1 else (None, None)
    Wd_out, bd_out = nxt(), nxt()

    xy = jnp.concatenate([cX, cy], axis=-1)
    h = jax.nn.relu(xy @ We_in.T + be_in[:, 0])
    for l in range(Le - 1):
        h = jax.nn.relu(h @ We_hid[l].T + be_hid[l][:, 0])
    r = h @ We_out.T + be_out[:, 0]
    rep = jnp.mean(r, axis=1, keepdims=True)                  # (B, 1, r_dim)

    h = jax.nn.relu(rep @ Wd_in_r.T + tX @ Wd_in_x.T + bd_in[:, 0])
    for l in range(Ld - 1):
        h = jax.nn.relu(h @ Wd_hid[l].T + bd_hid[l][:, 0])
    o = h @ Wd_out.T + bd_out[:, 0]
    y = o.shape[-1] // 2
    mu = o[..., :y]
    sigma = 0.1 + 0.9 * jax.nn.softplus(o[..., y:])
    if target_y is None:
        return None, mu, sigma
    z = (target_y - mu) / sigma
    log_p = -0.5 * jnp.sum(z * z + 2.0 * jnp.log(sigma)
                           + math.log(2.0 * math.pi), axis=-1)
    return log_p, mu, sigma


# --------------------------------------------------------------------------- #
if __name__ == "__main__":
    # small config consistent with a 1-D regression CNP
    encoder_num_layers, encoder_num_units = 3, 32
    decoder_num_layers, decoder_num_units = 3, 32
    r_dim, x_size, y_size = 32, 1, 1
    B, num_contexts, num_targets = 8, 32, 32

    key = jax.random.PRNGKey(0)
    kp, kcx, kcy, ktx, kty = jax.random.split(key, 5)

    params, cfg = init_cnp_params(
        kp,
        encoder_num_layers=encoder_num_layers,
        encoder_num_units=encoder_num_units,
        decoder_num_layers=decoder_num_layers,
        decoder_num_units=decoder_num_units,
        r_dim=r_dim, x_size=x_size, y_size=y_size)

    context_X = jax.random.normal(kcx, (B, num_contexts, x_size), jnp.float32)
    context_y = jax.random.normal(kcy, (B, num_contexts, y_size), jnp.float32)
    target_X = jax.random.normal(ktx, (B, num_targets, x_size), jnp.float32)
    target_y = jax.random.normal(kty, (B, num_targets, y_size), jnp.float32)
    query = ((context_X, context_y), target_X)

    ref_lp, ref_mu, ref_sig = cnp_reference(params, cfg, query, target_y)

    # --- f32 run: strict correctness ---
    log_p, mu, sigma = cnp_forward(params, cfg, query, target_y=target_y,
                                   compute_dtype=jnp.float32)
    jax.block_until_ready((log_p, mu, sigma))
    assert log_p.shape == (B, num_targets)
    assert mu.shape == (B, num_targets, y_size)
    assert sigma.shape == (B, num_targets, y_size)
    assert jnp.allclose(mu, ref_mu, atol=1e-3, rtol=1e-3)
    assert jnp.allclose(sigma, ref_sig, atol=1e-3, rtol=1e-3)
    assert jnp.allclose(log_p, ref_lp, atol=1e-3, rtol=1e-3)

    # --- bf16-input MXU run (v6e/v7x fast path): looser tolerances ---
    lp16, mu16, sg16 = cnp_forward(params, cfg, query, target_y=target_y,
                                   compute_dtype=jnp.bfloat16)
    jax.block_until_ready((lp16, mu16, sg16))
    assert jnp.allclose(mu16, ref_mu, atol=7e-2, rtol=7e-2)
    assert jnp.allclose(sg16, ref_sig, atol=7e-2, rtol=7e-2)
    assert jnp.allclose(lp16, ref_lp, atol=3e-1, rtol=2e-1)

    # --- inference path without targets: log-prob work skipped in-kernel ---
    lp_none, mu_n, sg_n = cnp_forward(params, cfg, query, target_y=None,
                                      compute_dtype=jnp.float32)
    jax.block_until_ready((mu_n, sg_n))
    assert lp_none is None
    assert jnp.allclose(mu_n, ref_mu, atol=1e-3, rtol=1e-3)
    assert jnp.allclose(sg_n, ref_sig, atol=1e-3, rtol=1e-3)

    print("KERNEL_OK")
</pallas_src>

<mosaic_0001>
module attributes {stable_mosaic.version = 11 : i64} {
  func.func @_cnp_kernel(%arg0: i32, %arg1: memref<2x256xf32, #tpu.memory_space<vmem>>, %arg2: memref<1x256xf32, #tpu.memory_space<vmem>>, %arg3: memref<1x256xf32, #tpu.memory_space<vmem>>, %arg4: memref<256x256xf32, #tpu.memory_space<vmem>>, %arg5: memref<32x2xf32, #tpu.memory_space<vmem>>, %arg6: memref<32x1xf32, #tpu.memory_space<vmem>>, %arg7: memref<2x32x32xf32, #tpu.memory_space<vmem>>, %arg8: memref<2x32x1xf32, #tpu.memory_space<vmem>>, %arg9: memref<32x32xf32, #tpu.memory_space<vmem>>, %arg10: memref<32x1xf32, #tpu.memory_space<vmem>>, %arg11: memref<32x32xf32, #tpu.memory_space<vmem>>, %arg12: memref<32x1xf32, #tpu.memory_space<vmem>>, %arg13: memref<32x1xf32, #tpu.memory_space<vmem>>, %arg14: memref<2x32x32xf32, #tpu.memory_space<vmem>>, %arg15: memref<2x32x1xf32, #tpu.memory_space<vmem>>, %arg16: memref<2x32xf32, #tpu.memory_space<vmem>>, %arg17: memref<2x1xf32, #tpu.memory_space<vmem>>, %arg18: memref<3x256xf32, #tpu.memory_space<vmem>>) attributes {dimension_semantics = [#tpu.dimension_semantics<parallel>], iteration_bounds = array<i64: 1>, scalar_prefetch = 0 : i64, scratch_operands = 0 : i64, tpu.core_type = #tpu.core_type<tc>, window_params = [{transform_indices = @transform_0, window_bounds = array<i64: 2, 256>}, {transform_indices = @transform_1, window_bounds = array<i64: 1, 256>}, {transform_indices = @transform_2, window_bounds = array<i64: 1, 256>}, {pipeline_mode = #tpu.pipeline_mode<synchronous>, transform_indices = @transform_3, window_bounds = array<i64: 256, 256>}, {pipeline_mode = #tpu.pipeline_mode<synchronous>, transform_indices = @transform_4, window_bounds = array<i64: 32, 2>}, {pipeline_mode = #tpu.pipeline_mode<synchronous>, transform_indices = @transform_5, window_bounds = array<i64: 32, 1>}, {pipeline_mode = #tpu.pipeline_mode<synchronous>, transform_indices = @transform_6, window_bounds = array<i64: 2, 32, 32>}, {pipeline_mode = #tpu.pipeline_mode<synchronous>, transform_indices = @transform_7, window_bounds = array<i64: 2, 32, 1>}, {pipeline_mode = #tpu.pipeline_mode<synchronous>, transform_indices = @transform_8, window_bounds = array<i64: 32, 32>}, {pipeline_mode = #tpu.pipeline_mode<synchronous>, transform_indices = @transform_9, window_bounds = array<i64: 32, 1>}, {pipeline_mode = #tpu.pipeline_mode<synchronous>, transform_indices = @transform_10, window_bounds = array<i64: 32, 32>}, {pipeline_mode = #tpu.pipeline_mode<synchronous>, transform_indices = @transform_11, window_bounds = array<i64: 32, 1>}, {pipeline_mode = #tpu.pipeline_mode<synchronous>, transform_indices = @transform_12, window_bounds = array<i64: 32, 1>}, {pipeline_mode = #tpu.pipeline_mode<synchronous>, transform_indices = @transform_13, window_bounds = array<i64: 2, 32, 32>}, {pipeline_mode = #tpu.pipeline_mode<synchronous>, transform_indices = @transform_14, window_bounds = array<i64: 2, 32, 1>}, {pipeline_mode = #tpu.pipeline_mode<synchronous>, transform_indices = @transform_15, window_bounds = array<i64: 2, 32>}, {pipeline_mode = #tpu.pipeline_mode<synchronous>, transform_indices = @transform_16, window_bounds = array<i64: 2, 1>}, {transform_indices = @transform_17, window_bounds = array<i64: 3, 256>}]} {
    %c0 = arith.constant 0 : index
    %c0_0 = arith.constant 0 : index
    %0 = vector.load %arg4[%c0, %c0_0] : memref<256x256xf32, #tpu.memory_space<vmem>>, vector<256x256xf32>
    %c0_1 = arith.constant 0 : index
    %c0_2 = arith.constant 0 : index
    %1 = vector.load %arg1[%c0_1, %c0_2] : memref<2x256xf32, #tpu.memory_space<vmem>>, vector<2x256xf32>
    %c0_3 = arith.constant 0 : index
    %c0_4 = arith.constant 0 : index
    %2 = vector.load %arg2[%c0_3, %c0_4] : memref<1x256xf32, #tpu.memory_space<vmem>>, vector<1x256xf32>
    %c0_5 = arith.constant 0 : index
    %c0_6 = arith.constant 0 : index
    %3 = vector.load %arg5[%c0_5, %c0_6] : memref<32x2xf32, #tpu.memory_space<vmem>>, vector<32x2xf32>
    %c0_7 = arith.constant 0 : index
    %c0_8 = arith.constant 0 : index
    %4 = vector.load %arg6[%c0_7, %c0_8] : memref<32x1xf32, #tpu.memory_space<vmem>>, vector<32x1xf32>
    %5 = vector.extract_strided_slice %3 {offsets = [0, 0], sizes = [32, 1], strides = [1, 1]} : vector<32x2xf32> to vector<32x1xf32>
    %6 = vector.extract_strided_slice %1 {offsets = [0, 0], sizes = [1, 256], strides = [1, 1]} : vector<2x256xf32> to vector<1x256xf32>
    %7 = vector.broadcast %5 : vector<32x1xf32> to vector<32x256xf32>
    %8 = vector.broadcast %6 : vector<1x256xf32> to vector<32x256xf32>
    %9 = arith.mulf %7, %8 : vector<32x256xf32>
    %10 = vector.broadcast %4 : vector<32x1xf32> to vector<32x256xf32>
    %11 = arith.addf %10, %9 : vector<32x256xf32>
    %12 = vector.extract_strided_slice %3 {offsets = [0, 1], sizes = [32, 1], strides = [1, 1]} : vector<32x2xf32> to vector<32x1xf32>
    %13 = vector.extract_strided_slice %1 {offsets = [1, 0], sizes = [1, 256], strides = [1, 1]} : vector<2x256xf32> to vector<1x256xf32>
    %14 = vector.broadcast %12 : vector<32x1xf32> to vector<32x256xf32>
    %15 = vector.broadcast %13 : vector<1x256xf32> to vector<32x256xf32>
    %16 = arith.mulf %14, %15 : vector<32x256xf32>
    %17 = arith.addf %11, %16 : vector<32x256xf32>
    %cst = arith.constant 0.000000e+00 : f32
    %18 = vector.broadcast %cst : f32 to vector<32x256xf32>
    %19 = arith.maximumf %17, %18 : vector<32x256xf32>
    %c0_9 = arith.constant 0 : index
    %c0_10 = arith.constant 0 : index
    %c0_11 = arith.constant 0 : index
    %20 = vector.load %arg7[%c0_9, %c0_10, %c0_11] : memref<2x32x32xf32, #tpu.memory_space<vmem>>, vector<1x32x32xf32>
    %21 = vector.shape_cast %20 : vector<1x32x32xf32> to vector<32x32xf32>
    %cst_12 = arith.constant dense<0.000000e+00> : vector<32x256xf32>
    %22 = tpu.matmul %21, %19, %cst_12 {dimension_numbers = #tpu.dot_dimension_numbers<[1], [0], [0], [1], [0, 0, 1, 1], [], []>} : vector<32x32xf32>, vector<32x256xf32>, vector<32x256xf32> -> vector<32x256xf32>
    %c0_13 = arith.constant 0 : index
    %c0_14 = arith.constant 0 : index
    %c0_15 = arith.constant 0 : index
    %23 = vector.load %arg8[%c0_13, %c0_14, %c0_15] : memref<2x32x1xf32, #tpu.memory_space<vmem>>, vector<1x32x1xf32>
    %24 = vector.shape_cast %23 : vector<1x32x1xf32> to vector<32x1xf32>
    %25 = vector.broadcast %24 : vector<32x1xf32> to vector<32x256xf32>
    %26 = arith.addf %22, %25 : vector<32x256xf32>
    %cst_16 = arith.constant 0.000000e+00 : f32
    %27 = vector.broadcast %cst_16 : f32 to vector<32x256xf32>
    %28 = arith.maximumf %26, %27 : vector<32x256xf32>
    %c1 = arith.constant 1 : index
    %c0_17 = arith.constant 0 : index
    %c0_18 = arith.constant 0 : index
    %29 = vector.load %arg7[%c1, %c0_17, %c0_18] : memref<2x32x32xf32, #tpu.memory_space<vmem>>, vector<1x32x32xf32>
    %30 = vector.shape_cast %29 : vector<1x32x32xf32> to vector<32x32xf32>
    %cst_19 = arith.constant dense<0.000000e+00> : vector<32x256xf32>
    %31 = tpu.matmul %30, %28, %cst_19 {dimension_numbers = #tpu.dot_dimension_numbers<[1], [0], [0], [1], [0, 0, 1, 1], [], []>} : vector<32x32xf32>, vector<32x256xf32>, vector<32x256xf32> -> vector<32x256xf32>
    %c1_20 = arith.constant 1 : index
    %c0_21 = arith.constant 0 : index
    %c0_22 = arith.constant 0 : index
    %32 = vector.load %arg8[%c1_20, %c0_21, %c0_22] : memref<2x32x1xf32, #tpu.memory_space<vmem>>, vector<1x32x1xf32>
    %33 = vector.shape_cast %32 : vector<1x32x1xf32> to vector<32x1xf32>
    %34 = vector.broadcast %33 : vector<32x1xf32> to vector<32x256xf32>
    %35 = arith.addf %31, %34 : vector<32x256xf32>
    %cst_23 = arith.constant 0.000000e+00 : f32
    %36 = vector.broadcast %cst_23 : f32 to vector<32x256xf32>
    %37 = arith.maximumf %35, %36 : vector<32x256xf32>
    %c0_24 = arith.constant 0 : index
    %c0_25 = arith.constant 0 : index
    %38 = vector.load %arg9[%c0_24, %c0_25] : memref<32x32xf32, #tpu.memory_space<vmem>>, vector<32x32xf32>
    %c0_26 = arith.constant 0 : index
    %c0_27 = arith.constant 0 : index
    %39 = vector.load %arg10[%c0_26, %c0_27] : memref<32x1xf32, #tpu.memory_space<vmem>>, vector<32x1xf32>
    %cst_28 = arith.constant dense<0.000000e+00> : vector<32x256xf32>
    %40 = tpu.matmul %38, %37, %cst_28 {dimension_numbers = #tpu.dot_dimension_numbers<[1], [0], [0], [1], [0, 0, 1, 1], [], []>} : vector<32x32xf32>, vector<32x256xf32>, vector<32x256xf32> -> vector<32x256xf32>
    %41 = vector.broadcast %39 : vector<32x1xf32> to vector<32x256xf32>
    %42 = arith.addf %40, %41 : vector<32x256xf32>
    %cst_29 = arith.constant dense<0.000000e+00> : vector<32x256xf32>
    %43 = tpu.matmul %42, %0, %cst_29 {dimension_numbers = #tpu.dot_dimension_numbers<[1], [0], [0], [1], [0, 0, 1, 1], [], []>} : vector<32x256xf32>, vector<256x256xf32>, vector<32x256xf32> -> vector<32x256xf32>
    %c0_30 = arith.constant 0 : index
    %c0_31 = arith.constant 0 : index
    %44 = vector.load %arg11[%c0_30, %c0_31] : memref<32x32xf32, #tpu.memory_space<vmem>>, vector<32x32xf32>
    %c0_32 = arith.constant 0 : index
    %c0_33 = arith.constant 0 : index
    %45 = vector.load %arg12[%c0_32, %c0_33] : memref<32x1xf32, #tpu.memory_space<vmem>>, vector<32x1xf32>
    %c0_34 = arith.constant 0 : index
    %c0_35 = arith.constant 0 : index
    %46 = vector.load %arg13[%c0_34, %c0_35] : memref<32x1xf32, #tpu.memory_space<vmem>>, vector<32x1xf32>
    %cst_36 = arith.constant dense<0.000000e+00> : vector<32x256xf32>
    %47 = tpu.matmul %44, %43, %cst_36 {dimension_numbers = #tpu.dot_dimension_numbers<[1], [0], [0], [1], [0, 0, 1, 1], [], []>} : vector<32x32xf32>, vector<32x256xf32>, vector<32x256xf32> -> vector<32x256xf32>
    %48 = vector.broadcast %45 : vector<32x1xf32> to vector<32x256xf32>
    %49 = vector.broadcast %2 : vector<1x256xf32> to vector<32x256xf32>
    %50 = arith.mulf %48, %49 : vector<32x256xf32>
    %51 = arith.addf %47, %50 : vector<32x256xf32>
    %52 = vector.broadcast %46 : vector<32x1xf32> to vector<32x256xf32>
    %53 = arith.addf %51, %52 : vector<32x256xf32>
    %cst_37 = arith.constant 0.000000e+00 : f32
    %54 = vector.broadcast %cst_37 : f32 to vector<32x256xf32>
    %55 = arith.maximumf %53, %54 : vector<32x256xf32>
    %c0_38 = arith.constant 0 : index
    %c0_39 = arith.constant 0 : index
    %c0_40 = arith.constant 0 : index
    %56 = vector.load %arg14[%c0_38, %c0_39, %c0_40] : memref<2x32x32xf32, #tpu.memory_space<vmem>>, vector<1x32x32xf32>
    %57 = vector.shape_cast %56 : vector<1x32x32xf32> to vector<32x32xf32>
    %cst_41 = arith.constant dense<0.000000e+00> : vector<32x256xf32>
    %58 = tpu.matmul %57, %55, %cst_41 {dimension_numbers = #tpu.dot_dimension_numbers<[1], [0], [0], [1], [0, 0, 1, 1], [], []>} : vector<32x32xf32>, vector<32x256xf32>, vector<32x256xf32> -> vector<32x256xf32>
    %c0_42 = arith.constant 0 : index
    %c0_43 = arith.constant 0 : index
    %c0_44 = arith.constant 0 : index
    %59 = vector.load %arg15[%c0_42, %c0_43, %c0_44] : memref<2x32x1xf32, #tpu.memory_space<vmem>>, vector<1x32x1xf32>
    %60 = vector.shape_cast %59 : vector<1x32x1xf32> to vector<32x1xf32>
    %61 = vector.broadcast %60 : vector<32x1xf32> to vector<32x256xf32>
    %62 = arith.addf %58, %61 : vector<32x256xf32>
    %cst_45 = arith.constant 0.000000e+00 : f32
    %63 = vector.broadcast %cst_45 : f32 to vector<32x256xf32>
    %64 = arith.maximumf %62, %63 : vector<32x256xf32>
    %c1_46 = arith.constant 1 : index
    %c0_47 = arith.constant 0 : index
    %c0_48 = arith.constant 0 : index
    %65 = vector.load %arg14[%c1_46, %c0_47, %c0_48] : memref<2x32x32xf32, #tpu.memory_space<vmem>>, vector<1x32x32xf32>
    %66 = vector.shape_cast %65 : vector<1x32x32xf32> to vector<32x32xf32>
    %cst_49 = arith.constant dense<0.000000e+00> : vector<32x256xf32>
    %67 = tpu.matmul %66, %64, %cst_49 {dimension_numbers = #tpu.dot_dimension_numbers<[1], [0], [0], [1], [0, 0, 1, 1], [], []>} : vector<32x32xf32>, vector<32x256xf32>, vector<32x256xf32> -> vector<32x256xf32>
    %c1_50 = arith.constant 1 : index
    %c0_51 = arith.constant 0 : index
    %c0_52 = arith.constant 0 : index
    %68 = vector.load %arg15[%c1_50, %c0_51, %c0_52] : memref<2x32x1xf32, #tpu.memory_space<vmem>>, vector<1x32x1xf32>
    %69 = vector.shape_cast %68 : vector<1x32x1xf32> to vector<32x1xf32>
    %70 = vector.broadcast %69 : vector<32x1xf32> to vector<32x256xf32>
    %71 = arith.addf %67, %70 : vector<32x256xf32>
    %cst_53 = arith.constant 0.000000e+00 : f32
    %72 = vector.broadcast %cst_53 : f32 to vector<32x256xf32>
    %73 = arith.maximumf %71, %72 : vector<32x256xf32>
    %c0_54 = arith.constant 0 : index
    %c0_55 = arith.constant 0 : index
    %74 = vector.load %arg16[%c0_54, %c0_55] : memref<2x32xf32, #tpu.memory_space<vmem>>, vector<2x32xf32>
    %c0_56 = arith.constant 0 : index
    %c0_57 = arith.constant 0 : index
    %75 = vector.load %arg17[%c0_56, %c0_57] : memref<2x1xf32, #tpu.memory_space<vmem>>, vector<2x1xf32>
    %cst_58 = arith.constant dense<0.000000e+00> : vector<2x256xf32>
    %76 = tpu.matmul %74, %73, %cst_58 {dimension_numbers = #tpu.dot_dimension_numbers<[1], [0], [0], [1], [0, 0, 1, 1], [], []>} : vector<2x32xf32>, vector<32x256xf32>, vector<2x256xf32> -> vector<2x256xf32>
    %77 = vector.broadcast %75 : vector<2x1xf32> to vector<2x256xf32>
    %78 = arith.addf %76, %77 : vector<2x256xf32>
    %79 = vector.extract_strided_slice %78 {offsets = [0, 0], sizes = [1, 256], strides = [1, 1]} : vector<2x256xf32> to vector<1x256xf32>
    %80 = vector.extract_strided_slice %78 {offsets = [1, 0], sizes = [1, 256], strides = [1, 1]} : vector<2x256xf32> to vector<1x256xf32>
    %cst_59 = arith.constant 0.000000e+00 : f32
    %81 = vector.broadcast %cst_59 : f32 to vector<1x256xf32>
    %82 = arith.maximumf %80, %81 : vector<1x256xf32>
    %83 = vector.broadcast %cst_59 : f32 to vector<1x256xf32>
    %84 = arith.subf %80, %83 : vector<1x256xf32>
    %85 = arith.cmpf one, %84, %84 : vector<1x256xf32>
    %86 = vector.broadcast %cst_59 : f32 to vector<1x256xf32>
    %87 = arith.addf %80, %86 : vector<1x256xf32>
    %88 = math.absf %84 : vector<1x256xf32>
    %cst_60 = arith.constant 0.000000e+00 : f32
    %89 = vector.broadcast %cst_60 : f32 to vector<1x256xf32>
    %90 = arith.subf %89, %88 : vector<1x256xf32>
    %91 = math.exp %90 : vector<1x256xf32>
    %92 = math.log1p %91 : vector<1x256xf32>
    %93 = arith.addf %82, %92 : vector<1x256xf32>
    %94 = arith.select %85, %87, %93 : vector<1x256xi1>, vector<1x256xf32>
    %cst_61 = arith.constant 0.899999976 : f32
    %95 = vector.broadcast %cst_61 : f32 to vector<1x256xf32>
    %96 = arith.mulf %95, %94 : vector<1x256xf32>
    %cst_62 = arith.constant 1.000000e-01 : f32
    %97 = vector.broadcast %cst_62 : f32 to vector<1x256xf32>
    %98 = arith.addf %97, %96 : vector<1x256xf32>
    %c0_63 = arith.constant 0 : index
    %c0_64 = arith.constant 0 : index
    %99 = vector.load %arg3[%c0_63, %c0_64] : memref<1x256xf32, #tpu.memory_space<vmem>>, vector<1x256xf32>
    %100 = arith.subf %99, %79 : vector<1x256xf32>
    %101 = arith.divf %100, %98 : vector<1x256xf32>
    %102 = arith.mulf %101, %101 : vector<1x256xf32>
    %103 = math.log %98 : vector<1x256xf32>
    %cst_65 = arith.constant 2.000000e+00 : f32
    %104 = vector.broadcast %cst_65 : f32 to vector<1x256xf32>
    %105 = arith.mulf %104, %103 : vector<1x256xf32>
    %106 = arith.addf %102, %105 : vector<1x256xf32>
    %cst_66 = arith.constant 1.83787704 : f32
    %107 = vector.broadcast %cst_66 : f32 to vector<1x256xf32>
    %108 = arith.addf %106, %107 : vector<1x256xf32>
    %cst_67 = arith.constant dense<0.000000e+00> : vector<256xf32>
    %109 = vector.multi_reduction <add>, %108, %cst_67 [0] : vector<1x256xf32> to vector<256xf32>
    %110 = vector.shape_cast %109 : vector<256xf32> to vector<1x256xf32>
    %cst_68 = arith.constant -5.000000e-01 : f32
    %111 = vector.broadcast %cst_68 : f32 to vector<1x256xf32>
    %112 = arith.mulf %111, %110 : vector<1x256xf32>
    %113 = tpu.concatenate %79, %98, %112 in 0 : vector<1x256xf32>, vector<1x256xf32>, vector<1x256xf32> -> vector<3x256xf32>
    %c0_69 = arith.constant 0 : index
    %c0_70 = arith.constant 0 : index
    %114 = vector.load %arg18[%c0_69, %c0_70] : memref<3x256xf32, #tpu.memory_space<vmem>>, vector<3x256xf32>
    tpu.vector_store %arg18[%c0_69, %c0_70], %113 {strides = array<i32>} : memref<3x256xf32, #tpu.memory_space<vmem>>, vector<3x256xf32>,
    return
  }
  func.func @transform_0(%arg0: i32) -> (i32, i32) {
    %c0_i32 = arith.constant 0 : i32
    %c0_i32_0 = arith.constant 0 : i32
    return %c0_i32, %arg0 : i32, i32
  }
  func.func @transform_1(%arg0: i32) -> (i32, i32) {
    %c0_i32 = arith.constant 0 : i32
    %c0_i32_0 = arith.constant 0 : i32
    return %c0_i32, %arg0 : i32, i32
  }
  func.func @transform_2(%arg0: i32) -> (i32, i32) {
    %c0_i32 = arith.constant 0 : i32
    %c0_i32_0 = arith.constant 0 : i32
    return %c0_i32, %arg0 : i32, i32
  }
  func.func @transform_3(%arg0: i32) -> (i32, i32) {
    %c0_i32 = arith.constant 0 : i32
    %c0_i32_0 = arith.constant 0 : i32
    %c0_i32_1 = arith.constant 0 : i32
    return %c0_i32, %c0_i32_0 : i32, i32
  }
  func.func @transform_4(%arg0: i32) -> (i32, i32) {
    %c0_i32 = arith.constant 0 : i32
    %c0_i32_0 = arith.constant 0 : i32
    %c0_i32_1 = arith.constant 0 : i32
    return %c0_i32, %c0_i32_0 : i32, i32
  }
  func.func @transform_5(%arg0: i32) -> (i32, i32) {
    %c0_i32 = arith.constant 0 : i32
    %c0_i32_0 = arith.constant 0 : i32
    %c0_i32_1 = arith.constant 0 : i32
    return %c0_i32, %c0_i32_0 : i32, i32
  }
  func.func @transform_6(%arg0: i32) -> (i32, i32, i32) {
    %c0_i32 = arith.constant 0 : i32
    %c0_i32_0 = arith.constant 0 : i32
    %c0_i32_1 = arith.constant 0 : i32
    %c0_i32_2 = arith.constant 0 : i32
    return %c0_i32, %c0_i32_0, %c0_i32_1 : i32, i32, i32
  }
  func.func @transform_7(%arg0: i32) -> (i32, i32, i32) {
    %c0_i32 = arith.constant 0 : i32
    %c0_i32_0 = arith.constant 0 : i32
    %c0_i32_1 = arith.constant 0 : i32
    %c0_i32_2 = arith.constant 0 : i32
    return %c0_i32, %c0_i32_0, %c0_i32_1 : i32, i32, i32
  }
  func.func @transform_8(%arg0: i32) -> (i32, i32) {
    %c0_i32 = arith.constant 0 : i32
    %c0_i32_0 = arith.constant 0 : i32
    %c0_i32_1 = arith.constant 0 : i32
    return %c0_i32, %c0_i32_0 : i32, i32
  }
  func.func @transform_9(%arg0: i32) -> (i32, i32) {
    %c0_i32 = arith.constant 0 : i32
    %c0_i32_0 = arith.constant 0 : i32
    %c0_i32_1 = arith.constant 0 : i32
    return %c0_i32, %c0_i32_0 : i32, i32
  }
  func.func @transform_10(%arg0: i32) -> (i32, i32) {
    %c0_i32 = arith.constant 0 : i32
    %c0_i32_0 = arith.constant 0 : i32
    %c0_i32_1 = arith.constant 0 : i32
    return %c0_i32, %c0_i32_0 : i32, i32
  }
  func.func @transform_11(%arg0: i32) -> (i32, i32) {
    %c0_i32 = arith.constant 0 : i32
    %c0_i32_0 = arith.constant 0 : i32
    %c0_i32_1 = arith.constant 0 : i32
    return %c0_i32, %c0_i32_0 : i32, i32
  }
  func.func @transform_12(%arg0: i32) -> (i32, i32) {
    %c0_i32 = arith.constant 0 : i32
    %c0_i32_0 = arith.constant 0 : i32
    %c0_i32_1 = arith.constant 0 : i32
    return %c0_i32, %c0_i32_0 : i32, i32
  }
  func.func @transform_13(%arg0: i32) -> (i32, i32, i32) {
    %c0_i32 = arith.constant 0 : i32
    %c0_i32_0 = arith.constant 0 : i32
    %c0_i32_1 = arith.constant 0 : i32
    %c0_i32_2 = arith.constant 0 : i32
    return %c0_i32, %c0_i32_0, %c0_i32_1 : i32, i32, i32
  }
  func.func @transform_14(%arg0: i32) -> (i32, i32, i32) {
    %c0_i32 = arith.constant 0 : i32
    %c0_i32_0 = arith.constant 0 : i32
    %c0_i32_1 = arith.constant 0 : i32
    %c0_i32_2 = arith.constant 0 : i32
    return %c0_i32, %c0_i32_0, %c0_i32_1 : i32, i32, i32
  }
  func.func @transform_15(%arg0: i32) -> (i32, i32) {
    %c0_i32 = arith.constant 0 : i32
    %c0_i32_0 = arith.constant 0 : i32
    %c0_i32_1 = arith.constant 0 : i32
    return %c0_i32, %c0_i32_0 : i32, i32
  }
  func.func @transform_16(%arg0: i32) -> (i32, i32) {
    %c0_i32 = arith.constant 0 : i32
    %c0_i32_0 = arith.constant 0 : i32
    %c0_i32_1 = arith.constant 0 : i32
    return %c0_i32, %c0_i32_0 : i32, i32
  }
  func.func @transform_17(%arg0: i32) -> (i32, i32) {
    %c0_i32 = arith.constant 0 : i32
    %c0_i32_0 = arith.constant 0 : i32
    return %c0_i32, %arg0 : i32, i32
  }
}

module attributes {stable_mosaic.version = 11 : i64} {
  func.func @_cnp_kernel(%arg0: i32, %arg1: memref<2x256xf32, #tpu.memory_space<vmem>>, %arg2: memref<1x256xf32, #tpu.memory_space<vmem>>, %arg3: memref<1x256xf32, #tpu.memory_space<vmem>>, %arg4: memref<256x256xf32, #tpu.memory_space<vmem>>, %arg5: memref<32x2xf32, #tpu.memory_space<vmem>>, %arg6: memref<32x1xf32, #tpu.memory_space<vmem>>, %arg7: memref<2x32x32xf32, #tpu.memory_space<vmem>>, %arg8: memref<2x32x1xf32, #tpu.memory_space<vmem>>, %arg9: memref<32x32xf32, #tpu.memory_space<vmem>>, %arg10: memref<32x1xf32, #tpu.memory_space<vmem>>, %arg11: memref<32x32xf32, #tpu.memory_space<vmem>>, %arg12: memref<32x1xf32, #tpu.memory_space<vmem>>, %arg13: memref<32x1xf32, #tpu.memory_space<vmem>>, %arg14: memref<2x32x32xf32, #tpu.memory_space<vmem>>, %arg15: memref<2x32x1xf32, #tpu.memory_space<vmem>>, %arg16: memref<2x32xf32, #tpu.memory_space<vmem>>, %arg17: memref<2x1xf32, #tpu.memory_space<vmem>>, %arg18: memref<3x256xf32, #tpu.memory_space<vmem>>) attributes {dimension_semantics = [#tpu.dimension_semantics<parallel>], iteration_bounds = array<i64: 1>, scalar_prefetch = 0 : i64, scratch_operands = 0 : i64, tpu.core_type = #tpu.core_type<tc>, window_params = [{transform_indices = @transform_0, window_bounds = array<i64: 2, 256>}, {transform_indices = @transform_1, window_bounds = array<i64: 1, 256>}, {transform_indices = @transform_2, window_bounds = array<i64: 1, 256>}, {pipeline_mode = #tpu.pipeline_mode<synchronous>, transform_indices = @transform_3, window_bounds = array<i64: 256, 256>}, {pipeline_mode = #tpu.pipeline_mode<synchronous>, transform_indices = @transform_4, window_bounds = array<i64: 32, 2>}, {pipeline_mode = #tpu.pipeline_mode<synchronous>, transform_indices = @transform_5, window_bounds = array<i64: 32, 1>}, {pipeline_mode = #tpu.pipeline_mode<synchronous>, transform_indices = @transform_6, window_bounds = array<i64: 2, 32, 32>}, {pipeline_mode = #tpu.pipeline_mode<synchronous>, transform_indices = @transform_7, window_bounds = array<i64: 2, 32, 1>}, {pipeline_mode = #tpu.pipeline_mode<synchronous>, transform_indices = @transform_8, window_bounds = array<i64: 32, 32>}, {pipeline_mode = #tpu.pipeline_mode<synchronous>, transform_indices = @transform_9, window_bounds = array<i64: 32, 1>}, {pipeline_mode = #tpu.pipeline_mode<synchronous>, transform_indices = @transform_10, window_bounds = array<i64: 32, 32>}, {pipeline_mode = #tpu.pipeline_mode<synchronous>, transform_indices = @transform_11, window_bounds = array<i64: 32, 1>}, {pipeline_mode = #tpu.pipeline_mode<synchronous>, transform_indices = @transform_12, window_bounds = array<i64: 32, 1>}, {pipeline_mode = #tpu.pipeline_mode<synchronous>, transform_indices = @transform_13, window_bounds = array<i64: 2, 32, 32>}, {pipeline_mode = #tpu.pipeline_mode<synchronous>, transform_indices = @transform_14, window_bounds = array<i64: 2, 32, 1>}, {pipeline_mode = #tpu.pipeline_mode<synchronous>, transform_indices = @transform_15, window_bounds = array<i64: 2, 32>}, {pipeline_mode = #tpu.pipeline_mode<synchronous>, transform_indices = @transform_16, window_bounds = array<i64: 2, 1>}, {transform_indices = @transform_17, window_bounds = array<i64: 3, 256>}]} {
    %c0 = arith.constant 0 : index
    %c0_0 = arith.constant 0 : index
    %0 = vector.load %arg4[%c0, %c0_0] : memref<256x256xf32, #tpu.memory_space<vmem>>, vector<256x256xf32>
    %c0_1 = arith.constant 0 : index
    %c0_2 = arith.constant 0 : index
    %1 = vector.load %arg1[%c0_1, %c0_2] : memref<2x256xf32, #tpu.memory_space<vmem>>, vector<2x256xf32>
    %c0_3 = arith.constant 0 : index
    %c0_4 = arith.constant 0 : index
    %2 = vector.load %arg2[%c0_3, %c0_4] : memref<1x256xf32, #tpu.memory_space<vmem>>, vector<1x256xf32>
    %c0_5 = arith.constant 0 : index
    %c0_6 = arith.constant 0 : index
    %3 = vector.load %arg5[%c0_5, %c0_6] : memref<32x2xf32, #tpu.memory_space<vmem>>, vector<32x2xf32>
    %c0_7 = arith.constant 0 : index
    %c0_8 = arith.constant 0 : index
    %4 = vector.load %arg6[%c0_7, %c0_8] : memref<32x1xf32, #tpu.memory_space<vmem>>, vector<32x1xf32>
    %5 = vector.extract_strided_slice %3 {offsets = [0, 0], sizes = [32, 1], strides = [1, 1]} : vector<32x2xf32> to vector<32x1xf32>
    %6 = vector.extract_strided_slice %1 {offsets = [0, 0], sizes = [1, 256], strides = [1, 1]} : vector<2x256xf32> to vector<1x256xf32>
    %7 = vector.broadcast %5 : vector<32x1xf32> to vector<32x256xf32>
    %8 = vector.broadcast %6 : vector<1x256xf32> to vector<32x256xf32>
    %9 = arith.mulf %7, %8 : vector<32x256xf32>
    %10 = vector.broadcast %4 : vector<32x1xf32> to vector<32x256xf32>
    %11 = arith.addf %10, %9 : vector<32x256xf32>
    %12 = vector.extract_strided_slice %3 {offsets = [0, 1], sizes = [32, 1], strides = [1, 1]} : vector<32x2xf32> to vector<32x1xf32>
    %13 = vector.extract_strided_slice %1 {offsets = [1, 0], sizes = [1, 256], strides = [1, 1]} : vector<2x256xf32> to vector<1x256xf32>
    %14 = vector.broadcast %12 : vector<32x1xf32> to vector<32x256xf32>
    %15 = vector.broadcast %13 : vector<1x256xf32> to vector<32x256xf32>
    %16 = arith.mulf %14, %15 : vector<32x256xf32>
    %17 = arith.addf %11, %16 : vector<32x256xf32>
    %cst = arith.constant 0.000000e+00 : f32
    %18 = vector.broadcast %cst : f32 to vector<32x256xf32>
    %19 = arith.maximumf %17, %18 : vector<32x256xf32>
    %c0_9 = arith.constant 0 : index
    %c0_10 = arith.constant 0 : index
    %c0_11 = arith.constant 0 : index
    %20 = vector.load %arg7[%c0_9, %c0_10, %c0_11] : memref<2x32x32xf32, #tpu.memory_space<vmem>>, vector<1x32x32xf32>
    %21 = vector.shape_cast %20 : vector<1x32x32xf32> to vector<32x32xf32>
    %cst_12 = arith.constant dense<0.000000e+00> : vector<32x256xf32>
    %22 = tpu.matmul %21, %19, %cst_12 {dimension_numbers = #tpu.dot_dimension_numbers<[1], [0], [0], [1], [0, 0, 1, 1], [], []>} : vector<32x32xf32>, vector<32x256xf32>, vector<32x256xf32> -> vector<32x256xf32>
    %c0_13 = arith.constant 0 : index
    %c0_14 = arith.constant 0 : index
    %c0_15 = arith.constant 0 : index
    %23 = vector.load %arg8[%c0_13, %c0_14, %c0_15] : memref<2x32x1xf32, #tpu.memory_space<vmem>>, vector<1x32x1xf32>
    %24 = vector.shape_cast %23 : vector<1x32x1xf32> to vector<32x1xf32>
    %25 = vector.broadcast %24 : vector<32x1xf32> to vector<32x256xf32>
    %26 = arith.addf %22, %25 : vector<32x256xf32>
    %cst_16 = arith.constant 0.000000e+00 : f32
    %27 = vector.broadcast %cst_16 : f32 to vector<32x256xf32>
    %28 = arith.maximumf %26, %27 : vector<32x256xf32>
    %c1 = arith.constant 1 : index
    %c0_17 = arith.constant 0 : index
    %c0_18 = arith.constant 0 : index
    %29 = vector.load %arg7[%c1, %c0_17, %c0_18] : memref<2x32x32xf32, #tpu.memory_space<vmem>>, vector<1x32x32xf32>
    %30 = vector.shape_cast %29 : vector<1x32x32xf32> to vector<32x32xf32>
    %cst_19 = arith.constant dense<0.000000e+00> : vector<32x256xf32>
    %31 = tpu.matmul %30, %28, %cst_19 {dimension_numbers = #tpu.dot_dimension_numbers<[1], [0], [0], [1], [0, 0, 1, 1], [], []>} : vector<32x32xf32>, vector<32x256xf32>, vector<32x256xf32> -> vector<32x256xf32>
    %c1_20 = arith.constant 1 : index
    %c0_21 = arith.constant 0 : index
    %c0_22 = arith.constant 0 : index
    %32 = vector.load %arg8[%c1_20, %c0_21, %c0_22] : memref<2x32x1xf32, #tpu.memory_space<vmem>>, vector<1x32x1xf32>
    %33 = vector.shape_cast %32 : vector<1x32x1xf32> to vector<32x1xf32>
    %34 = vector.broadcast %33 : vector<32x1xf32> to vector<32x256xf32>
    %35 = arith.addf %31, %34 : vector<32x256xf32>
    %cst_23 = arith.constant 0.000000e+00 : f32
    %36 = vector.broadcast %cst_23 : f32 to vector<32x256xf32>
    %37 = arith.maximumf %35, %36 : vector<32x256xf32>
    %c0_24 = arith.constant 0 : index
    %c0_25 = arith.constant 0 : index
    %38 = vector.load %arg9[%c0_24, %c0_25] : memref<32x32xf32, #tpu.memory_space<vmem>>, vector<32x32xf32>
    %c0_26 = arith.constant 0 : index
    %c0_27 = arith.constant 0 : index
    %39 = vector.load %arg10[%c0_26, %c0_27] : memref<32x1xf32, #tpu.memory_space<vmem>>, vector<32x1xf32>
    %cst_28 = arith.constant dense<0.000000e+00> : vector<32x256xf32>
    %40 = tpu.matmul %38, %37, %cst_28 {dimension_numbers = #tpu.dot_dimension_numbers<[1], [0], [0], [1], [0, 0, 1, 1], [], []>} : vector<32x32xf32>, vector<32x256xf32>, vector<32x256xf32> -> vector<32x256xf32>
    %41 = vector.broadcast %39 : vector<32x1xf32> to vector<32x256xf32>
    %42 = arith.addf %40, %41 : vector<32x256xf32>
    %cst_29 = arith.constant dense<0.000000e+00> : vector<32x256xf32>
    %43 = tpu.matmul %42, %0, %cst_29 {dimension_numbers = #tpu.dot_dimension_numbers<[1], [0], [0], [1], [0, 0, 1, 1], [], []>} : vector<32x256xf32>, vector<256x256xf32>, vector<32x256xf32> -> vector<32x256xf32>
    %c0_30 = arith.constant 0 : index
    %c0_31 = arith.constant 0 : index
    %44 = vector.load %arg11[%c0_30, %c0_31] : memref<32x32xf32, #tpu.memory_space<vmem>>, vector<32x32xf32>
    %c0_32 = arith.constant 0 : index
    %c0_33 = arith.constant 0 : index
    %45 = vector.load %arg12[%c0_32, %c0_33] : memref<32x1xf32, #tpu.memory_space<vmem>>, vector<32x1xf32>
    %c0_34 = arith.constant 0 : index
    %c0_35 = arith.constant 0 : index
    %46 = vector.load %arg13[%c0_34, %c0_35] : memref<32x1xf32, #tpu.memory_space<vmem>>, vector<32x1xf32>
    %cst_36 = arith.constant dense<0.000000e+00> : vector<32x256xf32>
    %47 = tpu.matmul %44, %43, %cst_36 {dimension_numbers = #tpu.dot_dimension_numbers<[1], [0], [0], [1], [0, 0, 1, 1], [], []>} : vector<32x32xf32>, vector<32x256xf32>, vector<32x256xf32> -> vector<32x256xf32>
    %48 = vector.broadcast %45 : vector<32x1xf32> to vector<32x256xf32>
    %49 = vector.broadcast %2 : vector<1x256xf32> to vector<32x256xf32>
    %50 = arith.mulf %48, %49 : vector<32x256xf32>
    %51 = arith.addf %47, %50 : vector<32x256xf32>
    %52 = vector.broadcast %46 : vector<32x1xf32> to vector<32x256xf32>
    %53 = arith.addf %51, %52 : vector<32x256xf32>
    %cst_37 = arith.constant 0.000000e+00 : f32
    %54 = vector.broadcast %cst_37 : f32 to vector<32x256xf32>
    %55 = arith.maximumf %53, %54 : vector<32x256xf32>
    %c0_38 = arith.constant 0 : index
    %c0_39 = arith.constant 0 : index
    %c0_40 = arith.constant 0 : index
    %56 = vector.load %arg14[%c0_38, %c0_39, %c0_40] : memref<2x32x32xf32, #tpu.memory_space<vmem>>, vector<1x32x32xf32>
    %57 = vector.shape_cast %56 : vector<1x32x32xf32> to vector<32x32xf32>
    %cst_41 = arith.constant dense<0.000000e+00> : vector<32x256xf32>
    %58 = tpu.matmul %57, %55, %cst_41 {dimension_numbers = #tpu.dot_dimension_numbers<[1], [0], [0], [1], [0, 0, 1, 1], [], []>} : vector<32x32xf32>, vector<32x256xf32>, vector<32x256xf32> -> vector<32x256xf32>
    %c0_42 = arith.constant 0 : index
    %c0_43 = arith.constant 0 : index
    %c0_44 = arith.constant 0 : index
    %59 = vector.load %arg15[%c0_42, %c0_43, %c0_44] : memref<2x32x1xf32, #tpu.memory_space<vmem>>, vector<1x32x1xf32>
    %60 = vector.shape_cast %59 : vector<1x32x1xf32> to vector<32x1xf32>
    %61 = vector.broadcast %60 : vector<32x1xf32> to vector<32x256xf32>
    %62 = arith.addf %58, %61 : vector<32x256xf32>
    %cst_45 = arith.constant 0.000000e+00 : f32
    %63 = vector.broadcast %cst_45 : f32 to vector<32x256xf32>
    %64 = arith.maximumf %62, %63 : vector<32x256xf32>
    %c1_46 = arith.constant 1 : index
    %c0_47 = arith.constant 0 : index
    %c0_48 = arith.constant 0 : index
    %65 = vector.load %arg14[%c1_46, %c0_47, %c0_48] : memref<2x32x32xf32, #tpu.memory_space<vmem>>, vector<1x32x32xf32>
    %66 = vector.shape_cast %65 : vector<1x32x32xf32> to vector<32x32xf32>
    %cst_49 = arith.constant dense<0.000000e+00> : vector<32x256xf32>
    %67 = tpu.matmul %66, %64, %cst_49 {dimension_numbers = #tpu.dot_dimension_numbers<[1], [0], [0], [1], [0, 0, 1, 1], [], []>} : vector<32x32xf32>, vector<32x256xf32>, vector<32x256xf32> -> vector<32x256xf32>
    %c1_50 = arith.constant 1 : index
    %c0_51 = arith.constant 0 : index
    %c0_52 = arith.constant 0 : index
    %68 = vector.load %arg15[%c1_50, %c0_51, %c0_52] : memref<2x32x1xf32, #tpu.memory_space<vmem>>, vector<1x32x1xf32>
    %69 = vector.shape_cast %68 : vector<1x32x1xf32> to vector<32x1xf32>
    %70 = vector.broadcast %69 : vector<32x1xf32> to vector<32x256xf32>
    %71 = arith.addf %67, %70 : vector<32x256xf32>
    %cst_53 = arith.constant 0.000000e+00 : f32
    %72 = vector.broadcast %cst_53 : f32 to vector<32x256xf32>
    %73 = arith.maximumf %71, %72 : vector<32x256xf32>
    %c0_54 = arith.constant 0 : index
    %c0_55 = arith.constant 0 : index
    %74 = vector.load %arg16[%c0_54, %c0_55] : memref<2x32xf32, #tpu.memory_space<vmem>>, vector<2x32xf32>
    %c0_56 = arith.constant 0 : index
    %c0_57 = arith.constant 0 : index
    %75 = vector.load %arg17[%c0_56, %c0_57] : memref<2x1xf32, #tpu.memory_space<vmem>>, vector<2x1xf32>
    %cst_58 = arith.constant dense<0.000000e+00> : vector<2x256xf32>
    %76 = tpu.matmul %74, %73, %cst_58 {dimension_numbers = #tpu.dot_dimension_numbers<[1], [0], [0], [1], [0, 0, 1, 1], [], []>} : vector<2x32xf32>, vector<32x256xf32>, vector<2x256xf32> -> vector<2x256xf32>
    %77 = vector.broadcast %75 : vector<2x1xf32> to vector<2x256xf32>
    %78 = arith.addf %76, %77 : vector<2x256xf32>
    %79 = vector.extract_strided_slice %78 {offsets = [0, 0], sizes = [1, 256], strides = [1, 1]} : vector<2x256xf32> to vector<1x256xf32>
    %80 = vector.extract_strided_slice %78 {offsets = [1, 0], sizes = [1, 256], strides = [1, 1]} : vector<2x256xf32> to vector<1x256xf32>
    %cst_59 = arith.constant 0.000000e+00 : f32
    %81 = vector.broadcast %cst_59 : f32 to vector<1x256xf32>
    %82 = arith.maximumf %80, %81 : vector<1x256xf32>
    %83 = vector.broadcast %cst_59 : f32 to vector<1x256xf32>
    %84 = arith.subf %80, %83 : vector<1x256xf32>
    %85 = arith.cmpf one, %84, %84 : vector<1x256xf32>
    %86 = vector.broadcast %cst_59 : f32 to vector<1x256xf32>
    %87 = arith.addf %80, %86 : vector<1x256xf32>
    %88 = math.absf %84 : vector<1x256xf32>
    %cst_60 = arith.constant 0.000000e+00 : f32
    %89 = vector.broadcast %cst_60 : f32 to vector<1x256xf32>
    %90 = arith.subf %89, %88 : vector<1x256xf32>
    %91 = math.exp %90 : vector<1x256xf32>
    %92 = math.log1p %91 : vector<1x256xf32>
    %93 = arith.addf %82, %92 : vector<1x256xf32>
    %94 = arith.select %85, %87, %93 : vector<1x256xi1>, vector<1x256xf32>
    %cst_61 = arith.constant 0.899999976 : f32
    %95 = vector.broadcast %cst_61 : f32 to vector<1x256xf32>
    %96 = arith.mulf %95, %94 : vector<1x256xf32>
    %cst_62 = arith.constant 1.000000e-01 : f32
    %97 = vector.broadcast %cst_62 : f32 to vector<1x256xf32>
    %98 = arith.addf %97, %96 : vector<1x256xf32>
    %c0_63 = arith.constant 0 : index
    %c0_64 = arith.constant 0 : index
    %99 = vector.load %arg3[%c0_63, %c0_64] : memref<1x256xf32, #tpu.memory_space<vmem>>, vector<1x256xf32>
    %100 = arith.subf %99, %79 : vector<1x256xf32>
    %101 = arith.divf %100, %98 : vector<1x256xf32>
    %102 = arith.mulf %101, %101 : vector<1x256xf32>
    %103 = math.log %98 : vector<1x256xf32>
    %cst_65 = arith.constant 2.000000e+00 : f32
    %104 = vector.broadcast %cst_65 : f32 to vector<1x256xf32>
    %105 = arith.mulf %104, %103 : vector<1x256xf32>
    %106 = arith.addf %102, %105 : vector<1x256xf32>
    %cst_66 = arith.constant 1.83787704 : f32
    %107 = vector.broadcast %cst_66 : f32 to vector<1x256xf32>
    %108 = arith.addf %106, %107 : vector<1x256xf32>
    %cst_67 = arith.constant dense<0.000000e+00> : vector<256xf32>
    %109 = vector.multi_reduction <add>, %108, %cst_67 [0] : vector<1x256xf32> to vector<256xf32>
    %110 = vector.shape_cast %109 : vector<256xf32> to vector<1x256xf32>
    %cst_68 = arith.constant -5.000000e-01 : f32
    %111 = vector.broadcast %cst_68 : f32 to vector<1x256xf32>
    %112 = arith.mulf %111, %110 : vector<1x256xf32>
    %113 = tpu.concatenate %79, %98, %112 in 0 : vector<1x256xf32>, vector<1x256xf32>, vector<1x256xf32> -> vector<3x256xf32>
    %c0_69 = arith.constant 0 : index
    %c0_70 = arith.constant 0 : index
    %114 = vector.load %arg18[%c0_69, %c0_70] : memref<3x256xf32, #tpu.memory_space<vmem>>, vector<3x256xf32>
    tpu.vector_store %arg18[%c0_69, %c0_70], %113 {strides = array<i32>} : memref<3x256xf32, #tpu.memory_space<vmem>>, vector<3x256xf32>,
    return
  }
  func.func @transform_0(%arg0: i32) -> (i32, i32) {
    %c0_i32 = arith.constant 0 : i32
    %c0_i32_0 = arith.constant 0 : i32
    return %c0_i32, %arg0 : i32, i32
  }
  func.func @transform_1(%arg0: i32) -> (i32, i32) {
    %c0_i32 = arith.constant 0 : i32
    %c0_i32_0 = arith.constant 0 : i32
    return %c0_i32, %arg0 : i32, i32
  }
  func.func @transform_2(%arg0: i32) -> (i32, i32) {
    %c0_i32 = arith.constant 0 : i32
    %c0_i32_0 = arith.constant 0 : i32
    return %c0_i32, %arg0 : i32, i32
  }
  func.func @transform_3(%arg0: i32) -> (i32, i32) {
    %c0_i32 = arith.constant 0 : i32
    %c0_i32_0 = arith.constant 0 : i32
    %c0_i32_1 = arith.constant 0 : i32
    return %c0_i32, %c0_i32_0 : i32, i32
  }
  func.func @transform_4(%arg0: i32) -> (i32, i32) {
    %c0_i32 = arith.constant 0 : i32
    %c0_i32_0 = arith.constant 0 : i32
    %c0_i32_1 = arith.constant 0 : i32
    return %c0_i32, %c0_i32_0 : i32, i32
  }
  func.func @transform_5(%arg0: i32) -> (i32, i32) {
    %c0_i32 = arith.constant 0 : i32
    %c0_i32_0 = arith.constant 0 : i32
    %c0_i32_1 = arith.constant 0 : i32
    return %c0_i32, %c0_i32_0 : i32, i32
  }
  func.func @transform_6(%arg0: i32) -> (i32, i32, i32) {
    %c0_i32 = arith.constant 0 : i32
    %c0_i32_0 = arith.constant 0 : i32
    %c0_i32_1 = arith.constant 0 : i32
    %c0_i32_2 = arith.constant 0 : i32
    return %c0_i32, %c0_i32_0, %c0_i32_1 : i32, i32, i32
  }
  func.func @transform_7(%arg0: i32) -> (i32, i32, i32) {
    %c0_i32 = arith.constant 0 : i32
    %c0_i32_0 = arith.constant 0 : i32
    %c0_i32_1 = arith.constant 0 : i32
    %c0_i32_2 = arith.constant 0 : i32
    return %c0_i32, %c0_i32_0, %c0_i32_1 : i32, i32, i32
  }
  func.func @transform_8(%arg0: i32) -> (i32, i32) {
    %c0_i32 = arith.constant 0 : i32
    %c0_i32_0 = arith.constant 0 : i32
    %c0_i32_1 = arith.constant 0 : i32
    return %c0_i32, %c0_i32_0 : i32, i32
  }
  func.func @transform_9(%arg0: i32) -> (i32, i32) {
    %c0_i32 = arith.constant 0 : i32
    %c0_i32_0 = arith.constant 0 : i32
    %c0_i32_1 = arith.constant 0 : i32
    return %c0_i32, %c0_i32_0 : i32, i32
  }
  func.func @transform_10(%arg0: i32) -> (i32, i32) {
    %c0_i32 = arith.constant 0 : i32
    %c0_i32_0 = arith.constant 0 : i32
    %c0_i32_1 = arith.constant 0 : i32
    return %c0_i32, %c0_i32_0 : i32, i32
  }
  func.func @transform_11(%arg0: i32) -> (i32, i32) {
    %c0_i32 = arith.constant 0 : i32
    %c0_i32_0 = arith.constant 0 : i32
    %c0_i32_1 = arith.constant 0 : i32
    return %c0_i32, %c0_i32_0 : i32, i32
  }
  func.func @transform_12(%arg0: i32) -> (i32, i32) {
    %c0_i32 = arith.constant 0 : i32
    %c0_i32_0 = arith.constant 0 : i32
    %c0_i32_1 = arith.constant 0 : i32
    return %c0_i32, %c0_i32_0 : i32, i32
  }
  func.func @transform_13(%arg0: i32) -> (i32, i32, i32) {
    %c0_i32 = arith.constant 0 : i32
    %c0_i32_0 = arith.constant 0 : i32
    %c0_i32_1 = arith.constant 0 : i32
    %c0_i32_2 = arith.constant 0 : i32
    return %c0_i32, %c0_i32_0, %c0_i32_1 : i32, i32, i32
  }
  func.func @transform_14(%arg0: i32) -> (i32, i32, i32) {
    %c0_i32 = arith.constant 0 : i32
    %c0_i32_0 = arith.constant 0 : i32
    %c0_i32_1 = arith.constant 0 : i32
    %c0_i32_2 = arith.constant 0 : i32
    return %c0_i32, %c0_i32_0, %c0_i32_1 : i32, i32, i32
  }
  func.func @transform_15(%arg0: i32) -> (i32, i32) {
    %c0_i32 = arith.constant 0 : i32
    %c0_i32_0 = arith.constant 0 : i32
    %c0_i32_1 = arith.constant 0 : i32
    return %c0_i32, %c0_i32_0 : i32, i32
  }
  func.func @transform_16(%arg0: i32) -> (i32, i32) {
    %c0_i32 = arith.constant 0 : i32
    %c0_i32_0 = arith.constant 0 : i32
    %c0_i32_1 = arith.constant 0 : i32
    return %c0_i32, %c0_i32_0 : i32, i32
  }
  func.func @transform_17(%arg0: i32) -> (i32, i32) {
    %c0_i32 = arith.constant 0 : i32
    %c0_i32_0 = arith.constant 0 : i32
    return %c0_i32, %arg0 : i32, i32
  }
}

</mosaic_0001>

<bundles_post_ra>
// kernel: tpu_custom_call.1
= control target key start
LH: loop header
LB: loop body
LE: loop exit
PB: predicated region body
PF: predicated region fallthrough
CT: control target
= control target key end

     0   :  { %s2093_s0 = inlined_call_operand.vmem [shape: f32[2,256], index: 0, kind: input, shape index: {}]   ;;  %s2094_s1 = inlined_call_operand.vmem [shape: f32[1,256], index: 1, kind: input, shape index: {}]   ;;  %s2095_s2 = inlined_call_operand.vmem [shape: f32[1,256], index: 2, kind: input, shape index: {}]   ;;  %s2096_s3 = inlined_call_operand.hbm [shape: f32[256,256], index: 3, kind: input, shape index: {}]   ;;  %s2097_s4 = inlined_call_operand.vmem [shape: f32[32,2], index: 4, kind: input, shape index: {}]   ;;  %s2098_s5 = inlined_call_operand.vmem [shape: f32[32,1], index: 5, kind: input, shape index: {}]   ;;  %s2099_s6 = inlined_call_operand.vmem [shape: f32[2,32,32], index: 6, kind: input, shape index: {}]   ;;  %s2100_s7 = inlined_call_operand.vmem [shape: f32[2,32,1], index: 7, kind: input, shape index: {}]   ;;  %s2101_s8 = inlined_call_operand.vmem [shape: f32[32,32], index: 8, kind: input, shape index: {}]   ;;  %s2102_s9 = inlined_call_operand.vmem [shape: f32[32,1], index: 9, kind: input, shape index: {}]   ;;  %s2103_s10 = inlined_call_operand.vmem [shape: f32[32,32], index: 10, kind: input, shape index: {}]   ;;  %s2104_s11 = inlined_call_operand.vmem [shape: f32[32,1], index: 11, kind: input, shape index: {}]   ;;  %s2105_s12 = inlined_call_operand.vmem [shape: f32[32,1], index: 12, kind: input, shape index: {}]   ;;  %s2106_s13 = inlined_call_operand.vmem [shape: f32[2,32,32], index: 13, kind: input, shape index: {}]   ;;  %s2107_s14 = inlined_call_operand.vmem [shape: f32[2,32,1], index: 14, kind: input, shape index: {}]   ;;  %s2108_s15 = inlined_call_operand.vmem [shape: f32[2,32], index: 15, kind: input, shape index: {}]   ;;  %s2109_s16 = inlined_call_operand.vmem [shape: f32[2,1], index: 16, kind: input, shape index: {}]   ;;  %s2110_s17 = inlined_call_operand.hbm [shape: f32[3,256], index: 17, kind: output, shape index: {}]  }
   0x1   :  { %2111 = sst [smem:[#allocation8_spill]] %s2093_s0 }
   0x2   :  { %2112 = sst [smem:[#allocation9_spill]] %s2094_s1 }
   0x3   :  { %22 = vsyncpa [#allocation3], 0 }
   0x4   :  { %23 = vsyncpa [#allocation4], 0  ;;  %s1705_s24 = smov [#allocation2]   ;;  %s1657_s28 = scalar_lea.hbm %s2096_s3, 8192 }
   0x5   :  { %s35_s25 = sshll.u32 %s1705_s24, 4  ;;  %p1658_p0 = scmp.ne.s32.totalorder %s2096_s3, %s1657_s28  ;;  %s36_s25 = int_to_ptr.vmem [resolvable:$true] %s35_s25 }
   0x6   :  { %p1661_p1 = scmp.lt.u32.totalorder %s1657_s28, %s2096_s3 }
   0x8   :  { %p1663_p2 = pnand %p1661_p1, %p1658_p0 }
   0xa   :  { %1666 = shalt.err (!%p1663_p2)
}
   0xb   :  { %s1667_s19 = scalar_lea.vmem %s36_s25, 8192  ;;  %p1672_p4 = scmp.lt.s32.totalorder %s36_s25, %s36_s25 }
   0xc   :  { %p1668_p3 = scmp.ne.s32.totalorder %s36_s25, %s1667_s19  ;;  %p1673_p5 = scmp.lt.s32.totalorder %s1667_s19, %s1667_s19 }
   0xe   :  { %p1674_p6 = por %p1673_p5, %p1672_p4 }
  0x10   :  { %p1675_p7 = pnand %p1674_p6, %p1668_p3 }
  0x12   :  { %1678 = shalt.err (!%p1675_p7)
}
  0x13   :  { %s1706_s1 = smov 256   ;;  %s1707_s20 = smov 16  }
  0x14   :  { %41 = dma.hbm_to_vmem [thread:$0]  %s2096_s3, 8192, %s36_s25, [#allocation3], %s1706_s1, %s1706_s1, %s1707_s20  }
  0x15   :  { %1701 = dma.done.wait [#allocation3], 8192  }
  0x16   :  { %1702 = vsyncadd [#allocation3], 4294959104  ;;  %v1708_v0 = vmov 0   ;;  %v141_v1 = vld [vmem:[%s2098_s5] sm:$0xff]  ;;  %v142_v3 = vld [vmem:[%s2098_s5 + $0x8] sm:$0xff]  ;;  %v1709_v6 = vmov 1   ;;  %v166_v40 = vlaneseq }
  0x17   :  { %1636 = vset.pattern.permute.xlu1 %v1708_v0  ;;  %1635 = vset.pattern.permute.xlu0 %v1708_v0  ;;  %v137_v2 = vld [vmem:[%s2097_s4] sm:$0xff]  ;;  %v138_v4 = vld [vmem:[%s2097_s4 + $0x8] sm:$0xff]  ;;  %v140_v5 = vld [vmem:[%s2097_s4 + $0x18] sm:$0xff]  ;;  %v1710_v10 = vmov 0.0   ;;  %vm306_vm0 = vcmask 261120   ;;  %s2114_s28 = sld [smem:[#allocation9_spill]] }
  0x18   :  { %194 = vperm.xlu1 %1636, %v141_v1   ;;  %147 = vperm.xlu0 %1635, %v137_v2   ;;  %v139_v7 = vld [vmem:[%s2097_s4 + $0x10] sm:$0xff]  ;;  %v144_v9 = vld [vmem:[%s2098_s5 + $0x18] sm:$0xff]  ;;  %v282_v11 = vld [vmem:[%s2100_s7] sm:$0xff]  ;;  %v1928_v41 = vshrl.u32 %v166_v40, 7  ;;  %s2113_s4 = sld [smem:[#allocation8_spill]]  ;;  %vm1440_vm5 = vcmask 1040384  }
  0x19   :  { %v143_v8 = vld [vmem:[%s2098_s5 + $0x10] sm:$0xff]  ;;  %383 = vmatprep.mubr.f32.mxu0 %v1710_v10  ;;  %522 = vmatprep.mubr.f32.mxu1 %v1710_v10  ;;  %v283_v12 = vld [vmem:[%s2100_s7 + $0x8] sm:$0xff]  ;;  %v1474_v14 = vld [vmem:[%s2100_s7 + $0x20] sm:$0xff]  ;;  %vm1443_vm6 = vcmask 1041408  }
  0x1a   :  { %v284_v13 = vld [vmem:[%s2100_s7 + $0x10] sm:$0xff]  ;;  %v285_v15 = vld [vmem:[%s2100_s7 + $0x18] sm:$0xff]  ;;  %v1475_v17 = vld [vmem:[%s2100_s7 + $0x28] sm:$0xff]  ;;  %v1931_v42 = vsub.s32 0, %v1928_v41  ;;  %v172_v43 = vsub.s32 2, %v1928_v41  ;;  %v1938_v45 = vsub.s32 1, %v1928_v41 }
  0x1b   :  { %v1476_v16 = vld [vmem:[%s2100_s7 + $0x30] sm:$0xff]  ;;  %v559_v18 = vld [vmem:[%s2102_s9] sm:$0xff]  ;;  %v1477_v19 = vld [vmem:[%s2100_s7 + $0x38] sm:$0xff]  ;;  %v242_v46 = vsub.s32 3, %v1928_v41 }
  0x1c   :  { %199 = vperm.xlu1 %1636, %v142_v3   ;;  %152 = vperm.xlu0 %1635, %v138_v4   ;;  %v561_v20 = vld [vmem:[%s2102_s9 + $0x10] sm:$0xff]  ;;  %v560_v21 = vld [vmem:[%s2102_s9 + $0x8] sm:$0xff]  ;;  %v777_v22 = vld [vmem:[%s2104_s11] sm:$0xff] }
  0x1d   :  { %v562_v23 = vld [vmem:[%s2102_s9 + $0x18] sm:$0xff]  ;;  %v779_v24 = vld [vmem:[%s2104_s11 + $0x10] sm:$0xff]  ;;  %v778_v25 = vld [vmem:[%s2104_s11 + $0x8] sm:$0xff] }
  0x1e   :  { %v781_v26 = vld [vmem:[%s2105_s12] sm:$0xff]  ;;  %v780_v27 = vld [vmem:[%s2104_s11 + $0x18] sm:$0xff]  ;;  %v783_v28 = vld [vmem:[%s2105_s12 + $0x10] sm:$0xff] }
  0x1f   :  { %v782_v29 = vld [vmem:[%s2105_s12 + $0x8] sm:$0xff]  ;;  %v965_v30 = vld [vmem:[%s2107_s14] sm:$0xff]  ;;  %v784_v31 = vld [vmem:[%s2105_s12 + $0x18] sm:$0xff] }
  0x20   :  { %1637 = vset.pattern.permute.xlu1 %v1709_v6  ;;  %162 = vperm.xlu0 %1635, %v140_v5   ;;  %v967_v32 = vld [vmem:[%s2107_s14 + $0x10] sm:$0xff]  ;;  %v966_v33 = vld [vmem:[%s2107_s14 + $0x8] sm:$0xff]  ;;  %v1498_v34 = vld [vmem:[%s2107_s14 + $0x20] sm:$0xff] }
  0x21   :  { %225 = vperm.xlu1 %1637, %v138_v4   ;;  %v968_v35 = vld [vmem:[%s2107_s14 + $0x18] sm:$0xff]  ;;  %v1500_v36 = vld [vmem:[%s2107_s14 + $0x30] sm:$0xff]  ;;  %v1499_v37 = vld [vmem:[%s2107_s14 + $0x28] sm:$0xff] }
  0x22   :  { %v1238_v38 = vld [vmem:[%s2109_s16] sm:$0x3]  ;;  %v1501_v39 = vld [vmem:[%s2107_s14 + $0x38] sm:$0xff]  ;;  %s1712_s14 = smov [#allocation5]  }
  0x23   :  { %v135_v44 = vld [vmem:[%s2113_s4] sm:$0xf]  ;;  %s1457_s16 = sshll.u32 %s1712_s14, 4  ;;  %s1458_s16 = int_to_ptr.vmem [resolvable:$true] %s1457_s16 }
  0x24   :  { %1639 = vset.pattern.permute.xlu0 %v1709_v6  ;;  %v169_v49 = vrot.slane %v135_v44, %v1931_v42  ;;  %v173_v50 = vrot.slane %v135_v44, %v172_v43  ;;  %v239_v51 = vrot.slane %v135_v44, %v1938_v45  ;;  %v243_v52 = vrot.slane %v135_v44, %v242_v46  ;;  %p1684_p9 = scmp.lt.s32.totalorder %s1458_s16, %s1458_s16 }
  0x25   :  { %1638 = vset.pattern.permute.xlu1 %v1708_v0  ;;  %221 = vperm.xlu0 %1639, %v137_v2  }
  0x26   :  { %157 = vperm.xlu1 %1638, %v139_v7   ;;  %v179_v55 = vrot.slane %v169_v49, %v1931_v42  ;;  %v183_v56 = vrot.slane %v173_v50, %v1931_v42  ;;  %v249_v57 = vrot.slane %v239_v51, %v1938_v45  ;;  %v253_v58 = vrot.slane %v243_v52, %v1938_v45  ;;  %v278_v51 = vld [vmem:[%s2099_s6] sm:$0xff]  ;;  %v279_v52 = vld [vmem:[%s2099_s6 + $0x8] sm:$0xff] }
  0x29   :  { %229 = vperm.xlu0 %1639, %v139_v7  }
  0x2a   :  { %204 = vperm.xlu1 %1638, %v143_v8  }
  0x2d   :  { %1642 = vset.pattern.permute.xlu0 %v1708_v0 }
  0x2e   :  { %209 = vperm.xlu1 %1638, %v144_v9   ;;  %293 = vperm.xlu0 %1642, %v283_v12  }
  0x32   :  { %1640 = vset.pattern.permute.xlu1 %v1709_v6  ;;  %428 = vperm.xlu0 %1642, %v1474_v14  }
  0x33   :  { %233 = vperm.xlu1 %1640, %v140_v5  }
  0x36   :  { %438 = vperm.xlu0 %1642, %v1476_v16  }
  0x37   :  { %1641 = vset.pattern.permute.xlu1 %v1708_v0 }
  0x38   :  { %288 = vperm.xlu1 %1641, %v282_v11  }
  0x3a   :  { %565 = vperm.xlu0 %1642, %v559_v18  }
  0x3c   :  { %298 = vperm.xlu1 %1641, %v284_v13  }
  0x3e   :  { %575 = vperm.xlu0 %1642, %v561_v20  }
  0x40   :  { %303 = vperm.xlu1 %1641, %v285_v15  }
  0x42   :  { %787 = vperm.xlu0 %1642, %v777_v22  }
  0x44   :  { %433 = vperm.xlu1 %1641, %v1475_v17  }
  0x46   :  { %797 = vperm.xlu0 %1642, %v779_v24  }
  0x48   :  { %443 = vperm.xlu1 %1641, %v1477_v19  }
  0x4a   :  { %927 = vperm.xlu0 %1642, %v781_v26  }
  0x4c   :  { %570 = vperm.xlu1 %1641, %v560_v21  }
  0x4e   :  { %937 = vperm.xlu0 %1642, %v783_v28  }
  0x50   :  { %580 = vperm.xlu1 %1641, %v562_v23  }
  0x52   :  { %971 = vperm.xlu0 %1642, %v965_v30  }
  0x54   :  { %792 = vperm.xlu1 %1641, %v778_v25  }
  0x56   :  { %981 = vperm.xlu0 %1642, %v967_v32  }
  0x58   :  { %802 = vperm.xlu1 %1641, %v780_v27  }
  0x5a   :  { %1110 = vperm.xlu0 %1642, %v1498_v34  }
  0x5c   :  { %932 = vperm.xlu1 %1641, %v782_v29  }
  0x5e   :  { %1120 = vperm.xlu0 %1642, %v1500_v36  }
  0x60   :  { %942 = vperm.xlu1 %1641, %v784_v31  }
  0x62   :  { %1241 = vperm.xlu0 %1642, %v1238_v38  }
  0x64   :  { %976 = vperm.xlu1 %1641, %v966_v33  }
  0x68   :  { %986 = vperm.xlu1 %1641, %v968_v35  }
  0x6c   :  { %1115 = vperm.xlu1 %1641, %v1499_v37  }
  0x70   :  { %1125 = vperm.xlu1 %1641, %v1501_v39  }
  0x97   :  { %v195_v47 = vpop.permute.xlu1 %194  ;;  %v148_v48 = vpop.permute.xlu0 %147 }
  0x98   :  { %v184_v62 = vmul.f32 %v179_v55, %v148_v48  ;;  %v185_v63 = vmul.f32 %v183_v56, %v148_v48 }
  0x9a   :  { %v212_v5 = vadd.f32 %v195_v47, %v184_v62  ;;  %v213_v6 = vadd.f32 %v195_v47, %v185_v63 }
  0x9b   :  { %v200_v53 = vpop.permute.xlu1 %199  ;;  %v153_v54 = vpop.permute.xlu0 %152 }
  0x9c   :  { %v186_v59 = vmul.f32 %v179_v55, %v153_v54  ;;  %v187_v60 = vmul.f32 %v183_v56, %v153_v54  ;;  %v281_v54 = vld [vmem:[%s2099_s6 + $0x18] sm:$0xff] }
  0x9e   :  { %v214_v3 = vadd.f32 %v200_v53, %v186_v59  ;;  %v215_v4 = vadd.f32 %v200_v53, %v187_v60  ;;  %v280_v53 = vld [vmem:[%s2099_s6 + $0x10] sm:$0xff] }
  0x9f   :  { %v163_v61 = vpop.permute.xlu0 %162 }
  0xa0   :  { %v226_v0 = vpop.permute.xlu1 %225  ;;  %v190_v31 = vmul.f32 %v179_v55, %v163_v61  ;;  %v191_v32 = vmul.f32 %v183_v56, %v163_v61 }
  0xa1   :  { %v256_v1 = vmul.f32 %v249_v57, %v226_v0  ;;  %v257_v2 = vmul.f32 %v253_v58, %v226_v0 }
  0xa3   :  { %v264_v8 = vadd.f32 %v256_v1, %v214_v3  ;;  %v265_v13 = vadd.f32 %v257_v2, %v215_v4 }
  0xa4   :  { %v222_v7 = vpop.permute.xlu0 %221 }
  0xa5   :  { %v254_v9 = vmul.f32 %v249_v57, %v222_v7  ;;  %v255_v11 = vmul.f32 %v253_v58, %v222_v7  ;;  %v158_v12 = vpop.permute.xlu1 %157  ;;  %v273_v18 = vmax.f32 %v265_v13, 0.0  ;;  %v272_v20 = vmax.f32 %v264_v8, 0.0 }
  0xa6   :  { %v188_v24 = vmul.f32 %v179_v55, %v158_v12  ;;  %v189_v25 = vmul.f32 %v183_v56, %v158_v12 }
  0xa7   :  { %v262_v14 = vadd.f32 %v254_v9, %v212_v5  ;;  %v263_v15 = vadd.f32 %v255_v11, %v213_v6 }
  0xa8   :  { %v230_v21 = vpop.permute.xlu0 %229 }
  0xa9   :  { %v205_v16 = vpop.permute.xlu1 %204  ;;  %v271_v17 = vmax.f32 %v263_v15, 0.0  ;;  %v270_v19 = vmax.f32 %v262_v14, 0.0  ;;  %v258_v29 = vmul.f32 %v249_v57, %v230_v21  ;;  %v259_v30 = vmul.f32 %v253_v58, %v230_v21 }
  0xaa   :  { %v216_v27 = vadd.f32 %v205_v16, %v188_v24  ;;  %v217_v28 = vadd.f32 %v205_v16, %v189_v25  ;;  %v1470_v24 = vld [vmem:[%s2099_s6 + $0x20] sm:$0xff]  ;;  %v1471_v25 = vld [vmem:[%s2099_s6 + $0x28] sm:$0xff] }
  0xab   :  { %v1507_v22 = vpack.c.bf16 %v273_v18, %v271_v17  ;;  %v1509_v23 = vpack.c.bf16 %v272_v20, %v270_v19 }
  0xac   :  { %v266_v33 = vadd.f32 %v258_v29, %v216_v27  ;;  %v267_v34 = vadd.f32 %v259_v30, %v217_v28  ;;  %v1473_v27 = vld [vmem:[%s2099_s6 + $0x38] sm:$0xff]  ;;  %v72_v28 = vld [vmem:[#allocation2 + $0x8] sm:$0xff]  ;;  %v71_v30 = vld [vmem:[#allocation2] sm:$0xff] }
  0xad   :  { %v210_v26 = vpop.permute.xlu1 %209  ;;  %1508 = vmatprep.subr.bf16.mxu0 %v1507_v22  ;;  %v294_v59 = vpop.permute.xlu0 %293  ;;  %v74_v29 = vld [vmem:[#allocation2 + $0x18] sm:$0xff] }
  0xae   :  { %1510 = vmatpush1.bf16.msra.mxu0 %v1509_v23  ;;  %v218_v36 = vadd.f32 %v210_v26, %v190_v31  ;;  %v219_v37 = vadd.f32 %v210_v26, %v191_v32  ;;  %v274_v44 = vmax.f32 %v266_v33, 0.0  ;;  %v275_v46 = vmax.f32 %v267_v34, 0.0  ;;  %v1472_v26 = vld [vmem:[%s2099_s6 + $0x30] sm:$0xff]  ;;  %v76_v33 = vld [vmem:[#allocation2 + $0x28] sm:$0xff]  ;;  %v78_v34 = vld [vmem:[#allocation2 + $0x38] sm:$0xff] }
  0xaf   :  { %v1531_v31 = vpack.c.bf16 %v74_v29, %v72_v28  ;;  %v73_v32 = vld [vmem:[#allocation2 + $0x10] sm:$0xff]  ;;  %v114_v28 = vld [vmem:[#allocation2 + $0x158] sm:$0xff] }
  0xb2   :  { %v234_v35 = vpop.permute.xlu1 %233 }
  0xb3   :  { %v260_v38 = vmul.f32 %v249_v57, %v234_v35  ;;  %v261_v39 = vmul.f32 %v253_v58, %v234_v35  ;;  %v1533_v35 = vpack.c.bf16 %v73_v32, %v71_v30  ;;  %v113_v32 = vld [vmem:[#allocation2 + $0x150] sm:$0xff] }
  0xb5   :  { %v268_v40 = vadd.f32 %v260_v38, %v218_v36  ;;  %v269_v43 = vadd.f32 %v261_v39, %v219_v37  ;;  %v1535_v36 = vpack.c.bf16 %v78_v34, %v76_v33  ;;  %v75_v37 = vld [vmem:[#allocation2 + $0x20] sm:$0xff]  ;;  %v77_v38 = vld [vmem:[#allocation2 + $0x30] sm:$0xff]  ;;  %v80_v39 = vld [vmem:[#allocation2 + $0x48] sm:$0xff] }
  0xb6   :  { %v116_v33 = vld [vmem:[#allocation2 + $0x168] sm:$0xff]  ;;  %v118_v34 = vld [vmem:[#allocation2 + $0x178] sm:$0xff] }
  0xb7   :  { %v276_v47 = vmax.f32 %v268_v40, 0.0  ;;  %v277_v48 = vmax.f32 %v269_v43, 0.0  ;;  %v289_v55 = vpop.permute.xlu1 %288  ;;  %v82_v40 = vld [vmem:[#allocation2 + $0x58] sm:$0xff]  ;;  %v1537_v43 = vpack.c.bf16 %v77_v38, %v75_v37  ;;  %v115_v37 = vld [vmem:[#allocation2 + $0x160] sm:$0xff]  ;;  %v117_v38 = vld [vmem:[#allocation2 + $0x170] sm:$0xff] }
  0xb9   :  { %v1511_v49 = vpack.c.bf16 %v277_v48, %v275_v46  ;;  %v1513_v50 = vpack.c.bf16 %v276_v47, %v274_v44  ;;  %v1539_v44 = vpack.c.bf16 %v82_v40, %v80_v39  ;;  %v79_v46 = vld [vmem:[#allocation2 + $0x40] sm:$0xff]  ;;  %v81_v47 = vld [vmem:[#allocation2 + $0x50] sm:$0xff]  ;;  %v84_v48 = vld [vmem:[#allocation2 + $0x68] sm:$0xff] }
  0xba   :  { %v120_v39 = vld [vmem:[#allocation2 + $0x188] sm:$0xff]  ;;  %v122_v40 = vld [vmem:[#allocation2 + $0x198] sm:$0xff] }
  0xbb   :  { %1512 = vmatprep.subr.bf16.mxu0 %v1511_v49  ;;  %v299_v0 = vpop.permute.xlu1 %298  ;;  %v86_v49 = vld [vmem:[#allocation2 + $0x78] sm:$0xff] }
  0xbc   :  { %1514 = vmatpush1.bf16.msra.mxu0 %v1513_v50  ;;  %v1541_v50 = vpack.c.bf16 %v81_v47, %v79_v46  ;;  %v119_v46 = vld [vmem:[#allocation2 + $0x180] sm:$0xff]  ;;  %v121_v47 = vld [vmem:[#allocation2 + $0x190] sm:$0xff] }
  0xbf   :  { %1466 = vmatmul.mubr.msk.f32.vlgmr.msra.gmra.mrb[0].mxu0 %vm306_vm0, %v278_v51  ;;  %v304_v12 = vpop.permute.xlu1 %303  ;;  %v1543_v51 = vpack.c.bf16 %v86_v49, %v84_v48  ;;  %v124_v48 = vld [vmem:[#allocation2 + $0x1a8] sm:$0xff]  ;;  %v126_v49 = vld [vmem:[#allocation2 + $0x1b8] sm:$0xff] }
  0xc0   :  { %389 = vmatprep.mubr.f32.mxu0 %v1710_v10 }
  0xc3   :  { %1467 = vmatmul.mubr.msk.f32.gmra.mrb[2].mxu0 %vm306_vm0, %v279_v52  ;;  %v83_v52 = vld [vmem:[#allocation2 + $0x60] sm:$0xff] }
  0xc4   :  { %395 = vmatprep.mubr.f32.mxu0 %v1710_v10 }
  0xc7   :  { %1468 = vmatmul.mubr.msk.f32.gmra.mrb[4].mxu0 %vm306_vm0, %v280_v53  ;;  %v85_v53 = vld [vmem:[#allocation2 + $0x70] sm:$0xff] }
  0xc8   :  { %401 = vmatprep.mubr.f32.mxu0 %v1710_v10 }
  0xcb   :  { %1469 = vmatmul.mubr.msk.f32.gmra.mrb[6].mxu0 %vm306_vm0, %v281_v54  ;;  %v88_v54 = vld [vmem:[#allocation2 + $0x88] sm:$0xff] }
  0xcc   :  { %659 = vmatprep.mubr.f32.mxu0 %v1710_v10 }
 0x192   :  { %v385_v56 = vpop.f32.mrb[0].mxu0 }
 0x193   :  { %v387_v57 = vpop.f32.mrb[1].mxu0  ;;  %v386_v58 = vadd.f32 %v385_v56, %v289_v55  ;;  %v1545_v56 = vpack.c.bf16 %v85_v53, %v83_v52  ;;  %v123_v52 = vld [vmem:[#allocation2 + $0x1a0] sm:$0xff]  ;;  %v125_v53 = vld [vmem:[#allocation2 + $0x1b0] sm:$0xff] }
 0x194   :  { %v388_v60 = vadd.f32 %v387_v57, %v289_v55  ;;  %v90_v55 = vld [vmem:[#allocation2 + $0x98] sm:$0xff] }
 0x195   :  { %v408_v2 = vmax.f32 %v386_v58, 0.0  ;;  %v1547_v57 = vpack.c.bf16 %v90_v55, %v88_v54  ;;  %v87_v58 = vld [vmem:[#allocation2 + $0x80] sm:$0xff]  ;;  %v128_v54 = vld [vmem:[#allocation2 + $0x1c8] sm:$0xff]  ;;  %v130_v55 = vld [vmem:[#allocation2 + $0x1d8] sm:$0xff] }
 0x196   :  { %v391_v61 = vpop.f32.mrb[2].mxu0  ;;  %v409_v4 = vmax.f32 %v388_v60, 0.0  ;;  %v92_v60 = vld [vmem:[#allocation2 + $0xa8] sm:$0xff] }
 0x197   :  { %v392_v62 = vadd.f32 %v391_v61, %v294_v59  ;;  %v393_v63 = vpop.f32.mrb[3].mxu0  ;;  %v94_v61 = vld [vmem:[#allocation2 + $0xb8] sm:$0xff] }
 0x198   :  { %v394_v1 = vadd.f32 %v393_v63, %v294_v59  ;;  %v89_v59 = vld [vmem:[#allocation2 + $0x90] sm:$0xff]  ;;  %v1551_v63 = vpack.c.bf16 %v94_v61, %v92_v60 }
 0x199   :  { %v410_v3 = vmax.f32 %v392_v62, 0.0  ;;  %v1549_v62 = vpack.c.bf16 %v89_v59, %v87_v58  ;;  %v127_v58 = vld [vmem:[#allocation2 + $0x1c0] sm:$0xff]  ;;  %v129_v59 = vld [vmem:[#allocation2 + $0x1d0] sm:$0xff] }
 0x19a   :  { %v411_v5 = vmax.f32 %v394_v1, 0.0  ;;  %v397_v6 = vpop.f32.mrb[4].mxu0  ;;  %v93_v1 = vld [vmem:[#allocation2 + $0xb0] sm:$0xff]  ;;  %v1589_v60 = vpack.c.bf16 %v129_v59, %v127_v58 }
 0x19b   :  { %v399_v7 = vpop.f32.mrb[5].mxu0  ;;  %v1517_v8 = vpack.c.bf16 %v410_v3, %v408_v2  ;;  %v398_v11 = vadd.f32 %v397_v6, %v299_v0  ;;  %v96_v2 = vld [vmem:[#allocation2 + $0xc8] sm:$0xff]  ;;  %v98_v3 = vld [vmem:[#allocation2 + $0xd8] sm:$0xff]  ;;  %v95_v6 = vld [vmem:[#allocation2 + $0xc0] sm:$0xff] }
 0x19c   :  { %v1515_v9 = vpack.c.bf16 %v411_v5, %v409_v4  ;;  %v400_v13 = vadd.f32 %v399_v7, %v299_v0  ;;  %v91_v0 = vld [vmem:[#allocation2 + $0xa0] sm:$0xff]  ;;  %v1555_v5 = vpack.c.bf16 %v98_v3, %v96_v2  ;;  %v97_v7 = vld [vmem:[#allocation2 + $0xd0] sm:$0xff] }
 0x19d   :  { %v412_v18 = vmax.f32 %v398_v11, 0.0  ;;  %v1553_v4 = vpack.c.bf16 %v93_v1, %v91_v0  ;;  %v1557_v11 = vpack.c.bf16 %v97_v7, %v95_v6  ;;  %v434_v1 = vpop.permute.xlu1 %433 }
 0x19e   :  { %v403_v14 = vpop.f32.mrb[6].mxu0  ;;  %1516 = vmatprep.subr.bf16.mxu1 %v1515_v9  ;;  %v413_v20 = vmax.f32 %v400_v13, 0.0  ;;  %v102_v9 = vld [vmem:[#allocation2 + $0xf8] sm:$0xff]  ;;  %v99_v13 = vld [vmem:[#allocation2 + $0xe0] sm:$0xff] }
 0x19f   :  { %v404_v15 = vadd.f32 %v403_v14, %v304_v12  ;;  %v405_v16 = vpop.f32.mrb[7].mxu0  ;;  %1518 = vmatpush1.bf16.msra.mxu1 %v1517_v8  ;;  %v100_v8 = vld [vmem:[#allocation2 + $0xe8] sm:$0xff]  ;;  %v101_v14 = vld [vmem:[#allocation2 + $0xf0] sm:$0xff] }
 0x1a0   :  { %v406_v17 = vadd.f32 %v405_v16, %v304_v12  ;;  %v1559_v12 = vpack.c.bf16 %v102_v9, %v100_v8  ;;  %v106_v16 = vld [vmem:[#allocation2 + $0x118] sm:$0xff] }
 0x1a1   :  { %v414_v19 = vmax.f32 %v404_v15, 0.0  ;;  %v104_v15 = vld [vmem:[#allocation2 + $0x108] sm:$0xff] }
 0x1a2   :  { %v415_v21 = vmax.f32 %v406_v17, 0.0  ;;  %v1561_v17 = vpack.c.bf16 %v101_v14, %v99_v13 }
 0x1a3   :  { %v1521_v22 = vpack.c.bf16 %v414_v19, %v412_v18  ;;  %v1563_v18 = vpack.c.bf16 %v106_v16, %v104_v15  ;;  %v103_v19 = vld [vmem:[#allocation2 + $0x100] sm:$0xff] }
 0x1a4   :  { %v1519_v23 = vpack.c.bf16 %v415_v21, %v413_v20  ;;  %v105_v20 = vld [vmem:[#allocation2 + $0x110] sm:$0xff]  ;;  %v108_v21 = vld [vmem:[#allocation2 + $0x128] sm:$0xff] }
 0x1a6   :  { %1520 = vmatprep.subr.bf16.mxu1 %v1519_v23  ;;  %v1565_v23 = vpack.c.bf16 %v105_v20, %v103_v19 }
 0x1a7   :  { %1522 = vmatpush1.bf16.msra.mxu1 %v1521_v22  ;;  %v110_v22 = vld [vmem:[#allocation2 + $0x138] sm:$0xff] }
 0x1a8   :  { %1532 = vmatprep.subr.bf16.mxu1 %v1531_v31  ;;  %v111_v31 = vld [vmem:[#allocation2 + $0x140] sm:$0xff] }
 0x1aa   :  { %1478 = vmatmul.mubr.msk.f32.vlgmr.msra.gmra.mrb[0].mxu1 %vm306_vm0, %v1470_v24  ;;  %v1567_v24 = vpack.c.bf16 %v110_v22, %v108_v21 }
 0x1ab   :  { %528 = vmatprep.mubr.f32.mxu1 %v1710_v10  ;;  %1534 = vmatpush1.bf16.msra.mxu1 %v1533_v35  ;;  %v1573_v35 = vpack.c.bf16 %v113_v32, %v111_v31  ;;  %v556_v31 = vld [vmem:[%s2101_s8 + $0x8] sm:$0xff]  ;;  %v557_v32 = vld [vmem:[%s2101_s8 + $0x10] sm:$0xff] }
 0x1ac   :  { %1536 = vmatprep.subr.bf16.mxu1 %v1535_v36  ;;  %v1575_v36 = vpack.c.bf16 %v118_v34, %v116_v33  ;;  %v558_v33 = vld [vmem:[%s2101_s8 + $0x18] sm:$0xff]  ;;  %v132_v34 = vld [vmem:[#allocation2 + $0x1e8] sm:$0xff] }
 0x1ae   :  { %1479 = vmatmul.mubr.msk.f32.gmra.mrb[2].mxu1 %vm306_vm0, %v1471_v25  ;;  %v107_v25 = vld [vmem:[#allocation2 + $0x120] sm:$0xff] }
 0x1af   :  { %534 = vmatprep.mubr.f32.mxu1 %v1710_v10  ;;  %1538 = vmatpush1.bf16.msra.mxu1 %v1537_v43  ;;  %v1577_v43 = vpack.c.bf16 %v117_v38, %v115_v37  ;;  %v131_v37 = vld [vmem:[#allocation2 + $0x1e0] sm:$0xff]  ;;  %v133_v38 = vld [vmem:[#allocation2 + $0x1f0] sm:$0xff] }
 0x1b0   :  { %1540 = vmatprep.subr.bf16.mxu1 %v1539_v44  ;;  %v1579_v44 = vpack.c.bf16 %v122_v40, %v120_v39  ;;  %v1593_v39 = vpack.c.bf16 %v133_v38, %v131_v37 }
 0x1b2   :  { %1480 = vmatmul.mubr.msk.f32.gmra.mrb[4].mxu1 %vm306_vm0, %v1472_v26  ;;  %v109_v26 = vld [vmem:[#allocation2 + $0x130] sm:$0xff] }
 0x1b3   :  { %540 = vmatprep.mubr.f32.mxu1 %v1710_v10  ;;  %1542 = vmatpush1.bf16.msra.mxu1 %v1541_v50  ;;  %v1569_v29 = vpack.c.bf16 %v109_v26, %v107_v25  ;;  %v1581_v50 = vpack.c.bf16 %v121_v47, %v119_v46 }
 0x1b4   :  { %1544 = vmatprep.subr.bf16.mxu1 %v1543_v51  ;;  %v1583_v51 = vpack.c.bf16 %v126_v49, %v124_v48 }
 0x1b6   :  { %1481 = vmatmul.mubr.msk.f32.gmra.mrb[6].mxu1 %vm306_vm0, %v1473_v27  ;;  %v112_v27 = vld [vmem:[#allocation2 + $0x148] sm:$0xff] }
 0x1b7   :  { %1546 = vmatpush1.bf16.msra.mxu1 %v1545_v56  ;;  %v1571_v30 = vpack.c.bf16 %v114_v28, %v112_v27  ;;  %v1585_v56 = vpack.c.bf16 %v125_v53, %v123_v52 }
 0x1b8   :  { %1548 = vmatprep.subr.bf16.mxu1 %v1547_v57  ;;  %v1587_v57 = vpack.c.bf16 %v130_v55, %v128_v54 }
 0x1bb   :  { %1550 = vmatpush1.bf16.msra.mxu1 %v1549_v62 }
 0x1bc   :  { %1552 = vmatprep.subr.bf16.mxu1 %v1551_v63  ;;  %v429_v63 = vpop.permute.xlu0 %428 }
 0x1bf   :  { %1554 = vmatpush1.bf16.msra.mxu1 %v1553_v4 }
 0x1c0   :  { %1556 = vmatprep.subr.bf16.mxu1 %v1555_v5  ;;  %v439_v15 = vpop.permute.xlu0 %438 }
 0x1c3   :  { %1558 = vmatpush1.bf16.msra.mxu1 %v1557_v11 }
 0x1c4   :  { %1560 = vmatprep.subr.bf16.mxu1 %v1559_v12 }
 0x1c7   :  { %1562 = vmatpush1.bf16.msra.mxu1 %v1561_v17 }
 0x1c8   :  { %1564 = vmatprep.subr.bf16.mxu1 %v1563_v18  ;;  %v444_v18 = vpop.permute.xlu1 %443 }
 0x1cb   :  { %1566 = vmatpush1.bf16.msra.mxu1 %v1565_v23 }
 0x1cc   :  { %1568 = vmatprep.subr.bf16.mxu1 %v1567_v24  ;;  %v571_v49 = vpop.permute.xlu1 %570 }
 0x1cf   :  { %1570 = vmatpush1.bf16.msra.mxu1 %v1569_v29 }
 0x1d0   :  { %1572 = vmatprep.subr.bf16.mxu1 %v1571_v30  ;;  %v555_v30 = vld [vmem:[%s2101_s8] sm:$0xff]  ;;  %v581_v59 = vpop.permute.xlu1 %580 }
 0x1d3   :  { %1574 = vmatpush1.bf16.msra.mxu1 %v1573_v35  ;;  %v134_v35 = vld [vmem:[#allocation2 + $0x1f8] sm:$0xff] }
 0x1d4   :  { %1576 = vmatprep.subr.bf16.mxu1 %v1575_v36  ;;  %v1591_v36 = vpack.c.bf16 %v134_v35, %v132_v34 }
 0x1d7   :  { %1578 = vmatpush1.bf16.msra.mxu1 %v1577_v43  ;;  %v566_v43 = vpop.permute.xlu0 %565 }
 0x1d8   :  { %1580 = vmatprep.subr.bf16.mxu1 %v1579_v44 }
 0x1db   :  { %1582 = vmatpush1.bf16.msra.mxu1 %v1581_v50  ;;  %v576_v54 = vpop.permute.xlu0 %575 }
 0x1dc   :  { %1584 = vmatprep.subr.bf16.mxu1 %v1583_v51 }
 0x1df   :  { %1586 = vmatpush1.bf16.msra.mxu1 %v1585_v56 }
 0x1e0   :  { %1588 = vmatprep.subr.bf16.mxu1 %v1587_v57 }
 0x1e3   :  { %1590 = vmatpush1.bf16.msra.mxu1 %v1589_v60 }
 0x1e4   :  { %1592 = vmatprep.subr.bf16.mxu1 %v1591_v36 }
 0x1e7   :  { %1594 = vmatpush1.bf16.msra.mxu1 %v1593_v39 }
 0x27d   :  { %v524_v61 = vpop.f32.mrb[0].mxu1 }
 0x27e   :  { %v526_v62 = vpop.f32.mrb[1].mxu1  ;;  %v525_v0 = vadd.f32 %v524_v61, %v429_v63 }
 0x27f   :  { %v527_v2 = vadd.f32 %v526_v62, %v429_v63 }
 0x280   :  { %v547_v7 = vmax.f32 %v525_v0, 0.0 }
 0x281   :  { %v530_v3 = vpop.f32.mrb[2].mxu1  ;;  %v548_v9 = vmax.f32 %v527_v2, 0.0 }
 0x282   :  { %v531_v4 = vadd.f32 %v530_v3, %v434_v1  ;;  %v532_v5 = vpop.f32.mrb[3].mxu1 }
 0x283   :  { %v533_v6 = vadd.f32 %v532_v5, %v434_v1 }
 0x284   :  { %v549_v8 = vmax.f32 %v531_v4, 0.0 }
 0x285   :  { %v550_v11 = vmax.f32 %v533_v6, 0.0  ;;  %v536_v12 = vpop.f32.mrb[4].mxu1 }
 0x286   :  { %v1525_v13 = vpack.c.bf16 %v549_v8, %v547_v7  ;;  %v538_v14 = vpop.f32.mrb[5].mxu1  ;;  %v537_v17 = vadd.f32 %v536_v12, %v439_v15  ;;  %v773_v12 = vld [vmem:[%s2103_s10] sm:$0xff] }
 0x287   :  { %v1523_v16 = vpack.c.bf16 %v550_v11, %v548_v9  ;;  %v539_v19 = vadd.f32 %v538_v14, %v439_v15  ;;  %v775_v14 = vld [vmem:[%s2103_s10 + $0x10] sm:$0xff]  ;;  %v776_v15 = vld [vmem:[%s2103_s10 + $0x18] sm:$0xff] }
 0x288   :  { %v551_v24 = vmax.f32 %v537_v17, 0.0  ;;  %v793_v17 = vpop.permute.xlu1 %792 }
 0x289   :  { %v542_v20 = vpop.f32.mrb[6].mxu1  ;;  %1524 = vmatprep.subr.bf16.mxu0 %v1523_v16  ;;  %v552_v26 = vmax.f32 %v539_v19, 0.0  ;;  %v788_v16 = vpop.permute.xlu0 %787 }
 0x28a   :  { %v543_v21 = vadd.f32 %v542_v20, %v444_v18  ;;  %v544_v22 = vpop.f32.mrb[7].mxu1  ;;  %1526 = vmatpush1.bf16.msra.mxu0 %v1525_v13  ;;  %v774_v13 = vld [vmem:[%s2103_s10 + $0x8] sm:$0xff] }
 0x28b   :  { %v545_v23 = vadd.f32 %v544_v22, %v444_v18  ;;  %v136_v18 = vld [vmem:[%s2114_s28] sm:$0x3] }
 0x28c   :  { %v553_v25 = vmax.f32 %v543_v21, 0.0  ;;  %v809_v19 = vrot.slane %v136_v18, %v1931_v42  ;;  %v813_v20 = vrot.slane %v136_v18, %v1938_v45 }
 0x28d   :  { %v554_v27 = vmax.f32 %v545_v23, 0.0  ;;  %v798_v21 = vpop.permute.xlu0 %797 }
 0x28e   :  { %v1529_v28 = vpack.c.bf16 %v553_v25, %v551_v24  ;;  %v816_v22 = vmul.f32 %v809_v19, %v788_v16  ;;  %v817_v23 = vmul.f32 %v813_v20, %v788_v16  ;;  %v803_v24 = vpop.permute.xlu1 %802  ;;  %v820_v39 = vmul.f32 %v809_v19, %v798_v21 }
 0x28f   :  { %v1527_v29 = vpack.c.bf16 %v554_v27, %v552_v26 }
 0x291   :  { %1528 = vmatprep.subr.bf16.mxu0 %v1527_v29  ;;  %v818_v29 = vmul.f32 %v809_v19, %v793_v17 }
 0x292   :  { %1530 = vmatpush1.bf16.msra.mxu0 %v1529_v28  ;;  %v933_v36 = vpop.permute.xlu1 %932 }
 0x295   :  { %1482 = vmatmul.mubr.msk.f32.vlgmr.msra.gmra.mrb[8].mxu0 %vm306_vm0, %v555_v30  ;;  %v819_v30 = vmul.f32 %v813_v20, %v793_v17 }
 0x296   :  { %665 = vmatprep.mubr.f32.mxu0 %v1710_v10 }
 0x299   :  { %1483 = vmatmul.mubr.msk.f32.gmra.mrb[10].mxu0 %vm306_vm0, %v556_v31  ;;  %v928_v31 = vpop.permute.xlu0 %927 }
 0x29a   :  { %671 = vmatprep.mubr.f32.mxu0 %v1710_v10 }
 0x29d   :  { %1484 = vmatmul.mubr.msk.f32.gmra.mrb[12].mxu0 %vm306_vm0, %v557_v32 }
 0x29e   :  { %677 = vmatprep.mubr.f32.mxu0 %v1710_v10 }
 0x2a1   :  { %1485 = vmatmul.mubr.msk.f32.gmra.mrb[14].mxu0 %vm306_vm0, %v558_v33 }
 0x2a2   :  { %900 = vmatprep.mubr.f32.mxu0 %v1710_v10 }
 0x368   :  { %v661_v40 = vpop.f32.mrb[8].mxu0 }
 0x369   :  { %v663_v44 = vpop.f32.mrb[9].mxu0  ;;  %v662_v47 = vadd.f32 %v661_v40, %v566_v43 }
 0x36a   :  { %v664_v46 = vadd.f32 %v663_v44, %v566_v43  ;;  %v821_v43 = vmul.f32 %v813_v20, %v798_v21 }
 0x36c   :  { %v667_v48 = vpop.f32.mrb[10].mxu0  ;;  %748 = vmatprep.mubr.f32.mxu1 %v664_v46 }
 0x36d   :  { %v669_v50 = vpop.f32.mrb[11].mxu0  ;;  %749 = vmatmul.mubr.f32.vlgmr.msra.gmra.mrb[8].mxu1 %v662_v47  ;;  %v668_v52 = vadd.f32 %v667_v48, %v571_v49 }
 0x36e   :  { %v670_v51 = vadd.f32 %v669_v50, %v571_v49 }
 0x370   :  { %v673_v53 = vpop.f32.mrb[12].mxu0  ;;  %754 = vmatprep.mubr.f32.mxu1 %v670_v51 }
 0x371   :  { %v675_v55 = vpop.f32.mrb[13].mxu0  ;;  %755 = vmatmul.mubr.f32.gmra.mrb[10].mxu1 %v668_v52  ;;  %v674_v57 = vadd.f32 %v673_v53, %v576_v54 }
 0x372   :  { %v676_v56 = vadd.f32 %v675_v55, %v576_v54  ;;  %v822_v54 = vmul.f32 %v809_v19, %v803_v24 }
 0x374   :  { %v679_v58 = vpop.f32.mrb[14].mxu0  ;;  %760 = vmatprep.mubr.f32.mxu1 %v676_v56  ;;  %v823_v56 = vmul.f32 %v813_v20, %v803_v24 }
 0x375   :  { %v681_v60 = vpop.f32.mrb[15].mxu0  ;;  %761 = vmatmul.mubr.f32.gmra.mrb[12].mxu1 %v674_v57  ;;  %v680_v62 = vadd.f32 %v679_v58, %v581_v59  ;;  %v938_v57 = vpop.permute.xlu0 %937 }
 0x376   :  { %v682_v61 = vadd.f32 %v681_v60, %v581_v59 }
 0x378   :  { %766 = vmatprep.mubr.f32.mxu1 %v682_v61 }
 0x379   :  { %767 = vmatmul.mubr.f32.gmra.mrb[14].mxu1 %v680_v62  ;;  %v972_v17 = vpop.permute.xlu0 %971 }
 0x440   :  { %v750_v63 = vpop.f32.mrb[8].mxu1 }
 0x441   :  { %v752_v0 = vpop.f32.mrb[9].mxu1 }
 0x444   :  { %v756_v1 = vpop.f32.mrb[10].mxu1 }
 0x445   :  { %v1597_v2 = vpack.c.bf16 %v756_v1, %v750_v63  ;;  %v758_v3 = vpop.f32.mrb[11].mxu1  ;;  %v943_v63 = vpop.permute.xlu1 %942 }
 0x446   :  { %v1595_v4 = vpack.c.bf16 %v758_v3, %v752_v0 }
 0x448   :  { %v762_v5 = vpop.f32.mrb[12].mxu1  ;;  %1596 = vmatprep.subr.bf16.mxu0 %v1595_v4 }
 0x449   :  { %v764_v6 = vpop.f32.mrb[13].mxu1  ;;  %1598 = vmatpush1.bf16.msra.mxu0 %v1597_v2  ;;  %v977_v19 = vpop.permute.xlu1 %976 }
 0x44c   :  { %v768_v7 = vpop.f32.mrb[14].mxu1 }
 0x44d   :  { %v1601_v8 = vpack.c.bf16 %v768_v7, %v762_v5  ;;  %v770_v9 = vpop.f32.mrb[15].mxu1 }
 0x44e   :  { %v1599_v11 = vpack.c.bf16 %v770_v9, %v764_v6 }
 0x450   :  { %1600 = vmatprep.subr.bf16.mxu0 %v1599_v11  ;;  %v961_v11 = vld [vmem:[%s2106_s13] sm:$0xff] }
 0x451   :  { %1602 = vmatpush1.bf16.msra.mxu0 %v1601_v8 }
 0x454   :  { %1486 = vmatmul.mubr.msk.f32.vlgmr.msra.gmra.mrb[16].mxu0 %vm306_vm0, %v773_v12  ;;  %v962_v12 = vld [vmem:[%s2106_s13 + $0x8] sm:$0xff] }
 0x455   :  { %906 = vmatprep.mubr.f32.mxu0 %v1710_v10 }
 0x458   :  { %1487 = vmatmul.mubr.msk.f32.gmra.mrb[18].mxu0 %vm306_vm0, %v774_v13  ;;  %v963_v13 = vld [vmem:[%s2106_s13 + $0x10] sm:$0xff] }
 0x459   :  { %912 = vmatprep.mubr.f32.mxu0 %v1710_v10 }
 0x45c   :  { %1488 = vmatmul.mubr.msk.f32.gmra.mrb[20].mxu0 %vm306_vm0, %v775_v14  ;;  %v964_v14 = vld [vmem:[%s2106_s13 + $0x18] sm:$0xff] }
 0x45d   :  { %918 = vmatprep.mubr.f32.mxu0 %v1710_v10 }
 0x460   :  { %1489 = vmatmul.mubr.msk.f32.gmra.mrb[22].mxu0 %vm306_vm0, %v776_v15 }
 0x461   :  { %1065 = vmatprep.mubr.f32.mxu0 %v1710_v10 }
 0x527   :  { %v902_v25 = vpop.f32.mrb[16].mxu0 }
 0x528   :  { %v903_v26 = vadd.f32 %v902_v25, %v816_v22  ;;  %v904_v27 = vpop.f32.mrb[17].mxu0 }
 0x529   :  { %v905_v28 = vadd.f32 %v904_v27, %v817_v23 }
 0x52a   :  { %v945_v33 = vadd.f32 %v928_v31, %v903_v26 }
 0x52b   :  { %v908_v32 = vpop.f32.mrb[18].mxu0  ;;  %v946_v37 = vadd.f32 %v928_v31, %v905_v28 }
 0x52c   :  { %v909_v34 = vadd.f32 %v908_v32, %v818_v29  ;;  %v910_v35 = vpop.f32.mrb[19].mxu0  ;;  %v953_v47 = vmax.f32 %v945_v33, 0.0  ;;  %v982_v32 = vpop.permute.xlu0 %981 }
 0x52d   :  { %v911_v38 = vadd.f32 %v910_v35, %v819_v30  ;;  %v954_v51 = vmax.f32 %v946_v37, 0.0  ;;  %v987_v35 = vpop.permute.xlu1 %986 }
 0x52e   :  { %v947_v40 = vadd.f32 %v933_v36, %v909_v34 }
 0x52f   :  { %v948_v44 = vadd.f32 %v933_v36, %v911_v38  ;;  %v914_v46 = vpop.f32.mrb[20].mxu0 }
 0x530   :  { %v955_v48 = vmax.f32 %v947_v40, 0.0  ;;  %v915_v49 = vadd.f32 %v914_v46, %v820_v39  ;;  %v916_v50 = vpop.f32.mrb[21].mxu0 }
 0x531   :  { %v956_v52 = vmax.f32 %v948_v44, 0.0  ;;  %v917_v53 = vadd.f32 %v916_v50, %v821_v43  ;;  %v1494_v50 = vld [vmem:[%s2106_s13 + $0x20] sm:$0xff] }
 0x532   :  { %v1605_v55 = vpack.c.bf16 %v955_v48, %v953_v47  ;;  %v949_v60 = vadd.f32 %v938_v57, %v915_v49 }
 0x533   :  { %v920_v58 = vpop.f32.mrb[22].mxu0  ;;  %v1603_v59 = vpack.c.bf16 %v956_v52, %v954_v51  ;;  %v950_v0 = vadd.f32 %v938_v57, %v917_v53  ;;  %v1495_v51 = vld [vmem:[%s2106_s13 + $0x28] sm:$0xff]  ;;  %v1496_v52 = vld [vmem:[%s2106_s13 + $0x30] sm:$0xff]  ;;  %v1497_v53 = vld [vmem:[%s2106_s13 + $0x38] sm:$0xff] }
 0x534   :  { %v921_v61 = vadd.f32 %v920_v58, %v822_v54  ;;  %v922_v62 = vpop.f32.mrb[23].mxu0  ;;  %v957_v4 = vmax.f32 %v949_v60, 0.0  ;;  %v1116_v58 = vpop.permute.xlu1 %1115 }
 0x535   :  { %v923_v1 = vadd.f32 %v922_v62, %v823_v56  ;;  %1604 = vmatprep.subr.bf16.mxu0 %v1603_v59  ;;  %v958_v6 = vmax.f32 %v950_v0, 0.0  ;;  %v1111_v56 = vpop.permute.xlu0 %1110 }
 0x536   :  { %v951_v2 = vadd.f32 %v943_v63, %v921_v61  ;;  %1606 = vmatpush1.bf16.msra.mxu0 %v1605_v55 }
 0x537   :  { %v952_v3 = vadd.f32 %v943_v63, %v923_v1 }
 0x538   :  { %v959_v5 = vmax.f32 %v951_v2, 0.0 }
 0x539   :  { %v960_v7 = vmax.f32 %v952_v3, 0.0 }
 0x53a   :  { %v1609_v8 = vpack.c.bf16 %v959_v5, %v957_v4 }
 0x53b   :  { %v1607_v9 = vpack.c.bf16 %v960_v7, %v958_v6  ;;  %v1121_v7 = vpop.permute.xlu0 %1120 }
 0x53d   :  { %1608 = vmatprep.subr.bf16.mxu0 %v1607_v9  ;;  %v1126_v9 = vpop.permute.xlu1 %1125 }
 0x53e   :  { %1610 = vmatpush1.bf16.msra.mxu0 %v1609_v8 }
 0x541   :  { %1490 = vmatmul.mubr.msk.f32.vlgmr.msra.gmra.mrb[24].mxu0 %vm306_vm0, %v961_v11 }
 0x542   :  { %1071 = vmatprep.mubr.f32.mxu0 %v1710_v10 }
 0x545   :  { %1491 = vmatmul.mubr.msk.f32.gmra.mrb[26].mxu0 %vm306_vm0, %v962_v12 }
 0x546   :  { %1077 = vmatprep.mubr.f32.mxu0 %v1710_v10 }
 0x549   :  { %1492 = vmatmul.mubr.msk.f32.gmra.mrb[28].mxu0 %vm306_vm0, %v963_v13 }
 0x54a   :  { %1083 = vmatprep.mubr.f32.mxu0 %v1710_v10 }
 0x54d   :  { %1493 = vmatmul.mubr.msk.f32.gmra.mrb[30].mxu0 %vm306_vm0, %v964_v14 }
 0x54e   :  { %1204 = vmatprep.mubr.f32.mxu0 %v1710_v10 }
 0x614   :  { %v1067_v15 = vpop.f32.mrb[24].mxu0 }
 0x615   :  { %v1069_v16 = vpop.f32.mrb[25].mxu0  ;;  %v1068_v18 = vadd.f32 %v1067_v15, %v972_v17 }
 0x616   :  { %v1070_v20 = vadd.f32 %v1069_v16, %v972_v17 }
 0x617   :  { %v1090_v25 = vmax.f32 %v1068_v18, 0.0 }
 0x618   :  { %v1073_v21 = vpop.f32.mrb[26].mxu0  ;;  %v1091_v27 = vmax.f32 %v1070_v20, 0.0 }
 0x619   :  { %v1074_v22 = vadd.f32 %v1073_v21, %v977_v19  ;;  %v1075_v23 = vpop.f32.mrb[27].mxu0 }
 0x61a   :  { %v1076_v24 = vadd.f32 %v1075_v23, %v977_v19  ;;  %v1242_v23 = vpop.permute.xlu0 %1241 }
 0x61b   :  { %v1092_v26 = vmax.f32 %v1074_v22, 0.0  ;;  %v1237_v22 = vld [vmem:[%s2108_s15] sm:$0x3] }
 0x61c   :  { %v1093_v28 = vmax.f32 %v1076_v24, 0.0  ;;  %v1079_v29 = vpop.f32.mrb[28].mxu0 }
 0x61d   :  { %v1613_v30 = vpack.c.bf16 %v1092_v26, %v1090_v25  ;;  %v1081_v31 = vpop.f32.mrb[29].mxu0  ;;  %v1080_v34 = vadd.f32 %v1079_v29, %v982_v32 }
 0x61e   :  { %v1611_v33 = vpack.c.bf16 %v1093_v28, %v1091_v27  ;;  %v1082_v36 = vadd.f32 %v1081_v31, %v982_v32 }
 0x61f   :  { %v1094_v43 = vmax.f32 %v1080_v34, 0.0 }
 0x620   :  { %v1085_v37 = vpop.f32.mrb[30].mxu0  ;;  %1612 = vmatprep.subr.bf16.mxu0 %v1611_v33  ;;  %v1095_v46 = vmax.f32 %v1082_v36, 0.0 }
 0x621   :  { %v1086_v38 = vadd.f32 %v1085_v37, %v987_v35  ;;  %v1087_v39 = vpop.f32.mrb[31].mxu0  ;;  %1614 = vmatpush1.bf16.msra.mxu0 %v1613_v30 }
 0x622   :  { %v1088_v40 = vadd.f32 %v1087_v39, %v987_v35 }
 0x623   :  { %v1096_v44 = vmax.f32 %v1086_v38, 0.0 }
 0x624   :  { %v1097_v47 = vmax.f32 %v1088_v40, 0.0 }
 0x625   :  { %v1617_v48 = vpack.c.bf16 %v1096_v44, %v1094_v43 }
 0x626   :  { %v1615_v49 = vpack.c.bf16 %v1097_v47, %v1095_v46 }
 0x628   :  { %1616 = vmatprep.subr.bf16.mxu0 %v1615_v49 }
 0x629   :  { %1618 = vmatpush1.bf16.msra.mxu0 %v1617_v48 }
 0x62c   :  { %1502 = vmatmul.mubr.msk.f32.vlgmr.msra.gmra.mrb[32].mxu0 %vm306_vm0, %v1494_v50 }
 0x62d   :  { %1210 = vmatprep.mubr.f32.mxu0 %v1710_v10 }
 0x630   :  { %1503 = vmatmul.mubr.msk.f32.gmra.mrb[34].mxu0 %vm306_vm0, %v1495_v51 }
 0x631   :  { %1216 = vmatprep.mubr.f32.mxu0 %v1710_v10 }
 0x634   :  { %1504 = vmatmul.mubr.msk.f32.gmra.mrb[36].mxu0 %vm306_vm0, %v1496_v52 }
 0x635   :  { %1222 = vmatprep.mubr.f32.mxu0 %v1710_v10 }
 0x638   :  { %1505 = vmatmul.mubr.msk.f32.gmra.mrb[38].mxu0 %vm306_vm0, %v1497_v53 }
 0x639   :  { %1311 = vmatprep.mubr.f32.mxu0 %v1710_v10 }
 0x6ff   :  { %v1206_v54 = vpop.f32.mrb[32].mxu0 }
 0x700   :  { %v1208_v55 = vpop.f32.mrb[33].mxu0  ;;  %v1207_v57 = vadd.f32 %v1206_v54, %v1111_v56 }
 0x701   :  { %v1209_v59 = vadd.f32 %v1208_v55, %v1111_v56 }
 0x702   :  { %v1229_v0 = vmax.f32 %v1207_v57, 0.0  ;;  %v1711_v57 = vmov 1966171168  }
 0x703   :  { %v1212_v60 = vpop.f32.mrb[34].mxu0  ;;  %v1230_v2 = vmax.f32 %v1209_v59, 0.0 }
 0x704   :  { %v1213_v61 = vadd.f32 %v1212_v60, %v1116_v58  ;;  %v1214_v62 = vpop.f32.mrb[35].mxu0 }
 0x705   :  { %v1215_v63 = vadd.f32 %v1214_v62, %v1116_v58  ;;  %v1363_v58 = vunpack.c.l.s4 %v1711_v57 }
 0x706   :  { %v1231_v1 = vmax.f32 %v1213_v61, 0.0 }
 0x707   :  { %v1232_v3 = vmax.f32 %v1215_v63, 0.0  ;;  %v1218_v4 = vpop.f32.mrb[36].mxu0 }
 0x708   :  { %v1621_v5 = vpack.c.bf16 %v1231_v1, %v1229_v0  ;;  %v1220_v6 = vpop.f32.mrb[37].mxu0  ;;  %v1219_v10 = vadd.f32 %v1218_v4, %v1121_v7  ;;  %v1364_v1 = vunpack.c.0.s8 %v1363_v58 }
 0x709   :  { %v1619_v8 = vpack.c.bf16 %v1232_v3, %v1230_v2  ;;  %v1221_v11 = vadd.f32 %v1220_v6, %v1121_v7 }
 0x70a   :  { %v1233_v16 = vmax.f32 %v1219_v10, 0.0  ;;  %v1367_v6 = vsub.s32 %v1364_v1, %v1928_v41 }
 0x70b   :  { %v1224_v12 = vpop.f32.mrb[38].mxu0  ;;  %1620 = vmatprep.subr.bf16.mxu0 %v1619_v8  ;;  %v1234_v18 = vmax.f32 %v1221_v11, 0.0 }
 0x70c   :  { %v1225_v13 = vadd.f32 %v1224_v12, %v1126_v9  ;;  %v1226_v14 = vpop.f32.mrb[39].mxu0  ;;  %1622 = vmatpush1.bf16.msra.mxu0 %v1621_v5 }
 0x70d   :  { %v1227_v15 = vadd.f32 %v1226_v14, %v1126_v9 }
 0x70e   :  { %v1235_v17 = vmax.f32 %v1225_v13, 0.0 }
 0x70f   :  { %v1236_v19 = vmax.f32 %v1227_v15, 0.0 }
 0x710   :  { %v1625_v20 = vpack.c.bf16 %v1235_v17, %v1233_v16 }
 0x711   :  { %v1623_v21 = vpack.c.bf16 %v1236_v19, %v1234_v18 }
 0x713   :  { %1624 = vmatprep.subr.bf16.mxu0 %v1623_v21 }
 0x714   :  { %1626 = vmatpush1.bf16.msra.mxu0 %v1625_v20  ;;  %v1358_v20 = vld [vmem:[%s2095_s2] sm:$0x3]  ;;  %s1679_s2 = scalar_lea.vmem %s1458_s16, 128 }
 0x715   :  { %p1680_p8 = scmp.ne.s32.totalorder %s1458_s16, %s1679_s2  ;;  %p1685_p10 = scmp.lt.s32.totalorder %s1679_s2, %s1679_s2 }
 0x717   :  { %1506 = vmatmul.mubr.msk.f32.vlgmr.msra.gmra.mrb[40].mxu0 %vm306_vm0, %v1237_v22  ;;  %p1686_p11 = por %p1685_p10, %p1684_p9 }
 0x719   :  { %p1687_p12 = pnand %p1686_p11, %p1680_p8 }
 0x7ea   :  { %v1313_v24 = vpop.f32.mrb[40].mxu0 }
 0x7eb   :  { %v1314_v25 = vadd.f32 %v1313_v24, %v1242_v23  ;;  %v1315_v26 = vpop.f32.mrb[41].mxu0 }
 0x7ec   :  { %v1316_v27 = vadd.f32 %v1315_v26, %v1242_v23 }
 0x7ed   :  { %v1324_v28 = vand.u32 2147483647, %v1314_v25  ;;  %v1318_v52 = vmax.f32 %v1314_v25, 0.0  ;;  %vm1320_vm3 = vcmp.ne.f32.partialorder %v1314_v25, %v1314_v25 }
 0x7ee   :  { %v1325_v29 = vand.u32 2147483647, %v1316_v27  ;;  %v1361_v30 = vcombine.low %v1314_v25, %v1316_v27  ;;  %v1319_v55 = vmax.f32 %v1316_v27, 0.0  ;;  %vm1321_vm4 = vcmp.ne.f32.partialorder %v1316_v27, %v1316_v27 }
 0x7ef   :  { %v1326_v31 = vsub.f32 0.0, %v1324_v28 }
 0x7f0   :  { %v1327_v32 = vsub.f32 0.0, %v1325_v29  ;;  %v1368_v13 = vrot.slane %v1361_v30, %v1367_v6 }
 0x7f1   :  { %v1328_v33 = vmul.f32 1.442695, %v1326_v31 }
 0x7f2   :  { %v1330_v34 = vmul.f32 1.442695, %v1327_v32  ;;  %v1375_v18 = vrot.slane %v1368_v13, %v1367_v6 }
 0x7f3   :  { %1643 = vpow2.f32 %v1328_v33 }
 0x7f4   :  { %1645 = vpow2.f32 %v1330_v34  ;;  %v1377_v21 = vsub.f32 %v1358_v20, %v1375_v18 }
 0x7fd   :  { %v1644_v35 = vpop.eup %1643 }
 0x7fe   :  { %v1646_v36 = vpop.eup %1645  ;;  %v1332_v37 = vadd.f32 1.0, %v1644_v35  ;;  %v1335_v39 = vmul.f32 -0.5, %v1644_v35  ;;  %v1338_v44 = vand.u32 2147483647, %v1644_v35 }
 0x7ff   :  { %v1341_v38 = vadd.f32 1.0, %v1646_v36  ;;  %v1344_v40 = vmul.f32 -0.5, %v1646_v36  ;;  %v1347_v47 = vand.u32 2147483647, %v1646_v36 }
 0x800   :  { %1647 = vlog2.f32 %v1332_v37  ;;  %v1336_v43 = vadd.f32 1.0, %v1335_v39  ;;  %vm1339_vm1 = vcmp.lt.f32.partialorder %v1338_v44, 0.0004427343 }
 0x801   :  { %1649 = vlog2.f32 %v1341_v38  ;;  %v1345_v46 = vadd.f32 1.0, %v1344_v40  ;;  %vm1348_vm2 = vcmp.lt.f32.partialorder %v1347_v47, 0.0004427343 }
 0x802   :  { %v1337_v51 = vmul.f32 %v1644_v35, %v1336_v43 }
 0x803   :  { %v1346_v54 = vmul.f32 %v1646_v36, %v1345_v46 }
 0x80a   :  { %v1648_v48 = vpop.eup %1647 }
 0x80b   :  { %v1650_v49 = vpop.eup %1649  ;;  %v1334_v50 = vmul.f32 0.6931472, %v1648_v48 }
 0x80c   :  { %v1343_v53 = vmul.f32 0.6931472, %v1650_v49 }
 0x80d   :  { %v1340_v56 = vsel %vm1339_vm1, %v1337_v51, %v1334_v50 }
 0x80e   :  { %v1349_v59 = vsel %vm1348_vm2, %v1346_v54, %v1343_v53  ;;  %v1350_v60 = vadd.f32 %v1340_v56, %v1318_v52 }
 0x80f   :  { %v1351_v61 = vadd.f32 %v1349_v59, %v1319_v55 }
 0x810   :  { %v1352_v62 = vsel %vm1320_vm3, %v1314_v25, %v1350_v60 }
 0x811   :  { %v1353_v63 = vsel %vm1321_vm4, %v1316_v27, %v1351_v61  ;;  %v1354_v0 = vmul.f32 0.9, %v1352_v62 }
 0x812   :  { %v1355_v2 = vmul.f32 0.9, %v1353_v63 }
 0x813   :  { %v1356_v3 = vadd.f32 0.1, %v1354_v0 }
 0x814   :  { %v1357_v4 = vadd.f32 0.1, %v1355_v2 }
 0x815   :  { %1651 = vlog2.f32 %v1356_v3  ;;  %v1441_v5 = vsel %vm1440_vm5, %v1314_v25, %v1356_v3 }
 0x816   :  { %v1380_v7 = vcombine.low %v1356_v3, %v1357_v4  ;;  %1653 = vlog2.f32 %v1357_v4  ;;  %v1442_v8 = vsel %vm1440_vm5, %v1316_v27, %v1357_v4 }
 0x818   :  { %v1387_v10 = vrot.slane %v1380_v7, %v1367_v6 }
 0x81a   :  { %v1388_v9 = vcombine.high %v1387_v10, %v1387_v10 }
 0x81c   :  { %v1395_v11 = vrot.slane %v1388_v9, %v1367_v6 }
 0x81e   :  { %1655 = vrcp.f32 %v1395_v11 }
 0x81f   :  { %v1652_v12 = vpop.eup %1651 }
 0x820   :  { %v1654_v14 = vpop.eup %1653  ;;  %v1401_v15 = vmul.f32 0.6931472, %v1652_v12 }
 0x821   :  { %v1403_v16 = vmul.f32 0.6931472, %v1654_v14 }
 0x822   :  { %v1404_v17 = vmul.f32 2.0, %v1401_v15 }
 0x823   :  { %v1405_v19 = vmul.f32 2.0, %v1403_v16 }
 0x825   :  { %v1408_v41 = vcombine.low %v1404_v17, %v1405_v19 }
 0x827   :  { %v1415_v22 = vrot.slane %v1408_v41, %v1367_v6 }
 0x828   :  { %v1656_v23 = vpop.eup %1655 }
 0x829   :  { %v1398_v24 = vmul.f32 %v1656_v23, %v1377_v21  ;;  %v1416_v25 = vcombine.high %v1415_v22, %v1415_v22 }
 0x82b   :  { %v1399_v26 = vmul.f32 %v1398_v24, %v1398_v24  ;;  %v1423_v27 = vrot.slane %v1416_v25, %v1367_v6 }
 0x82d   :  { %v1425_v28 = vadd.f32 %v1423_v27, %v1399_v26 }
 0x82f   :  { %v1426_v29 = vadd.f32 1.837877, %v1425_v28 }
 0x831   :  { %v1428_v30 = vmul.f32 -0.5, %v1426_v29 }
 0x833   :  { %v1433_v31 = vrot.slane %v1428_v30, %v1931_v42  ;;  %v1437_v32 = vrot.slane %v1428_v30, %v1938_v45 }
 0x835   :  { %v1444_v33 = vsel %vm1443_vm6, %v1441_v5, %v1433_v31  ;;  %v1445_v34 = vsel %vm1443_vm6, %v1442_v8, %v1437_v32 }
 0x836   :  { %v1448_v35 = vcombine.low %v1444_v33, %v1445_v34 }
 0x838   :  { %1450 = vst [vmem:[#allocation5] sm:$0x77] %v1448_v35 }
 0x839   :  { %1690 = shalt.err (!%p1687_p12)
}
 0x83a   :  { %s1691_s26 = scalar_lea.hbm %s2110_s17, 128 }
 0x83b   :  { %p1692_p13 = scmp.ne.s32.totalorder %s2110_s17, %s1691_s26  ;;  %p1695_p0 = scmp.lt.u32.totalorder %s1691_s26, %s2110_s17 }
 0x83d   :  { %p1697_p1 = pnand %p1695_p0, %p1692_p13 }
 0x83f   :  { %1700 = shalt.err (!%p1697_p1)
}
 0x840   :  { %1460 = dma.vmem_to_hbm [thread:$0]  %s1458_s16, 128, %s2110_s17, [#allocation4]  }
 0x841   :  { %1703 = dma.done.wait [#allocation4], 128  }
 0x842   :  { %1704 = vsyncadd [#allocation4], 4294967168 }
 0x843   :  { %1464 = vsyncpa [#allocation3], 1 }
 0x844   :  { %1465 = vsyncpa [#allocation4], 1 }

// kernel: tpu_custom_call.1
= control target key start
LH: loop header
LB: loop body
LE: loop exit
PB: predicated region body
PF: predicated region fallthrough
CT: control target
= control target key end

     0   :  { %s2093_s0 = inlined_call_operand.vmem [shape: f32[2,256], index: 0, kind: input, shape index: {}]   ;;  %s2094_s1 = inlined_call_operand.vmem [shape: f32[1,256], index: 1, kind: input, shape index: {}]   ;;  %s2095_s2 = inlined_call_operand.vmem [shape: f32[1,256], index: 2, kind: input, shape index: {}]   ;;  %s2096_s3 = inlined_call_operand.hbm [shape: f32[256,256], index: 3, kind: input, shape index: {}]   ;;  %s2097_s4 = inlined_call_operand.vmem [shape: f32[32,2], index: 4, kind: input, shape index: {}]   ;;  %s2098_s5 = inlined_call_operand.vmem [shape: f32[32,1], index: 5, kind: input, shape index: {}]   ;;  %s2099_s6 = inlined_call_operand.vmem [shape: f32[2,32,32], index: 6, kind: input, shape index: {}]   ;;  %s2100_s7 = inlined_call_operand.vmem [shape: f32[2,32,1], index: 7, kind: input, shape index: {}]   ;;  %s2101_s8 = inlined_call_operand.vmem [shape: f32[32,32], index: 8, kind: input, shape index: {}]   ;;  %s2102_s9 = inlined_call_operand.vmem [shape: f32[32,1], index: 9, kind: input, shape index: {}]   ;;  %s2103_s10 = inlined_call_operand.vmem [shape: f32[32,32], index: 10, kind: input, shape index: {}]   ;;  %s2104_s11 = inlined_call_operand.vmem [shape: f32[32,1], index: 11, kind: input, shape index: {}]   ;;  %s2105_s12 = inlined_call_operand.vmem [shape: f32[32,1], index: 12, kind: input, shape index: {}]   ;;  %s2106_s13 = inlined_call_operand.vmem [shape: f32[2,32,32], index: 13, kind: input, shape index: {}]   ;;  %s2107_s14 = inlined_call_operand.vmem [shape: f32[2,32,1], index: 14, kind: input, shape index: {}]   ;;  %s2108_s15 = inlined_call_operand.vmem [shape: f32[2,32], index: 15, kind: input, shape index: {}]   ;;  %s2109_s16 = inlined_call_operand.vmem [shape: f32[2,1], index: 16, kind: input, shape index: {}]   ;;  %s2110_s17 = inlined_call_operand.hbm [shape: f32[3,256], index: 17, kind: output, shape index: {}]  }
   0x1   :  { %2111 = sst [smem:[#allocation8_spill]] %s2093_s0 }
   0x2   :  { %2112 = sst [smem:[#allocation9_spill]] %s2094_s1 }
   0x3   :  { %22 = vsyncpa [#allocation3], 0 }
   0x4   :  { %23 = vsyncpa [#allocation4], 0  ;;  %s1705_s24 = smov [#allocation2]   ;;  %s1657_s28 = scalar_lea.hbm %s2096_s3, 8192 }
   0x5   :  { %s35_s25 = sshll.u32 %s1705_s24, 4  ;;  %p1658_p0 = scmp.ne.s32.totalorder %s2096_s3, %s1657_s28  ;;  %s36_s25 = int_to_ptr.vmem [resolvable:$true] %s35_s25 }
   0x6   :  { %p1661_p1 = scmp.lt.u32.totalorder %s1657_s28, %s2096_s3 }
   0x8   :  { %p1663_p2 = pnand %p1661_p1, %p1658_p0 }
   0xa   :  { %1666 = shalt.err (!%p1663_p2)
}
   0xb   :  { %s1667_s19 = scalar_lea.vmem %s36_s25, 8192  ;;  %p1672_p4 = scmp.lt.s32.totalorder %s36_s25, %s36_s25 }
   0xc   :  { %p1668_p3 = scmp.ne.s32.totalorder %s36_s25, %s1667_s19  ;;  %p1673_p5 = scmp.lt.s32.totalorder %s1667_s19, %s1667_s19 }
   0xe   :  { %p1674_p6 = por %p1673_p5, %p1672_p4 }
  0x10   :  { %p1675_p7 = pnand %p1674_p6, %p1668_p3 }
  0x12   :  { %1678 = shalt.err (!%p1675_p7)
}
  0x13   :  { %s1706_s1 = smov 256   ;;  %s1707_s20 = smov 16  }
  0x14   :  { %41 = dma.hbm_to_vmem [thread:$0]  %s2096_s3, 8192, %s36_s25, [#allocation3], %s1706_s1, %s1706_s1, %s1707_s20  }
  0x15   :  { %1701 = dma.done.wait [#allocation3], 8192  }
  0x16   :  { %1702 = vsyncadd [#allocation3], 4294959104  ;;  %v1708_v0 = vmov 0   ;;  %v141_v1 = vld [vmem:[%s2098_s5] sm:$0xff]  ;;  %v142_v3 = vld [vmem:[%s2098_s5 + $0x8] sm:$0xff]  ;;  %v1709_v6 = vmov 1   ;;  %v166_v40 = vlaneseq }
  0x17   :  { %1636 = vset.pattern.permute.xlu1 %v1708_v0  ;;  %1635 = vset.pattern.permute.xlu0 %v1708_v0  ;;  %v137_v2 = vld [vmem:[%s2097_s4] sm:$0xff]  ;;  %v138_v4 = vld [vmem:[%s2097_s4 + $0x8] sm:$0xff]  ;;  %v140_v5 = vld [vmem:[%s2097_s4 + $0x18] sm:$0xff]  ;;  %v1710_v10 = vmov 0.0   ;;  %vm306_vm0 = vcmask 261120   ;;  %s2114_s28 = sld [smem:[#allocation9_spill]] }
  0x18   :  { %194 = vperm.xlu1 %1636, %v141_v1   ;;  %147 = vperm.xlu0 %1635, %v137_v2   ;;  %v139_v7 = vld [vmem:[%s2097_s4 + $0x10] sm:$0xff]  ;;  %v144_v9 = vld [vmem:[%s2098_s5 + $0x18] sm:$0xff]  ;;  %v282_v11 = vld [vmem:[%s2100_s7] sm:$0xff]  ;;  %v1928_v41 = vshrl.u32 %v166_v40, 7  ;;  %s2113_s4 = sld [smem:[#allocation8_spill]]  ;;  %vm1440_vm5 = vcmask 1040384  }
  0x19   :  { %v143_v8 = vld [vmem:[%s2098_s5 + $0x10] sm:$0xff]  ;;  %383 = vmatprep.mubr.f32.mxu0 %v1710_v10  ;;  %522 = vmatprep.mubr.f32.mxu1 %v1710_v10  ;;  %v283_v12 = vld [vmem:[%s2100_s7 + $0x8] sm:$0xff]  ;;  %v1474_v14 = vld [vmem:[%s2100_s7 + $0x20] sm:$0xff]  ;;  %vm1443_vm6 = vcmask 1041408  }
  0x1a   :  { %v284_v13 = vld [vmem:[%s2100_s7 + $0x10] sm:$0xff]  ;;  %v285_v15 = vld [vmem:[%s2100_s7 + $0x18] sm:$0xff]  ;;  %v1475_v17 = vld [vmem:[%s2100_s7 + $0x28] sm:$0xff]  ;;  %v1931_v42 = vsub.s32 0, %v1928_v41  ;;  %v172_v43 = vsub.s32 2, %v1928_v41  ;;  %v1938_v45 = vsub.s32 1, %v1928_v41 }
  0x1b   :  { %v1476_v16 = vld [vmem:[%s2100_s7 + $0x30] sm:$0xff]  ;;  %v559_v18 = vld [vmem:[%s2102_s9] sm:$0xff]  ;;  %v1477_v19 = vld [vmem:[%s2100_s7 + $0x38] sm:$0xff]  ;;  %v242_v46 = vsub.s32 3, %v1928_v41 }
  0x1c   :  { %199 = vperm.xlu1 %1636, %v142_v3   ;;  %152 = vperm.xlu0 %1635, %v138_v4   ;;  %v561_v20 = vld [vmem:[%s2102_s9 + $0x10] sm:$0xff]  ;;  %v560_v21 = vld [vmem:[%s2102_s9 + $0x8] sm:$0xff]  ;;  %v777_v22 = vld [vmem:[%s2104_s11] sm:$0xff] }
  0x1d   :  { %v562_v23 = vld [vmem:[%s2102_s9 + $0x18] sm:$0xff]  ;;  %v779_v24 = vld [vmem:[%s2104_s11 + $0x10] sm:$0xff]  ;;  %v778_v25 = vld [vmem:[%s2104_s11 + $0x8] sm:$0xff] }
  0x1e   :  { %v781_v26 = vld [vmem:[%s2105_s12] sm:$0xff]  ;;  %v780_v27 = vld [vmem:[%s2104_s11 + $0x18] sm:$0xff]  ;;  %v783_v28 = vld [vmem:[%s2105_s12 + $0x10] sm:$0xff] }
  0x1f   :  { %v782_v29 = vld [vmem:[%s2105_s12 + $0x8] sm:$0xff]  ;;  %v965_v30 = vld [vmem:[%s2107_s14] sm:$0xff]  ;;  %v784_v31 = vld [vmem:[%s2105_s12 + $0x18] sm:$0xff] }
  0x20   :  { %1637 = vset.pattern.permute.xlu1 %v1709_v6  ;;  %162 = vperm.xlu0 %1635, %v140_v5   ;;  %v967_v32 = vld [vmem:[%s2107_s14 + $0x10] sm:$0xff]  ;;  %v966_v33 = vld [vmem:[%s2107_s14 + $0x8] sm:$0xff]  ;;  %v1498_v34 = vld [vmem:[%s2107_s14 + $0x20] sm:$0xff] }
  0x21   :  { %225 = vperm.xlu1 %1637, %v138_v4   ;;  %v968_v35 = vld [vmem:[%s2107_s14 + $0x18] sm:$0xff]  ;;  %v1500_v36 = vld [vmem:[%s2107_s14 + $0x30] sm:$0xff]  ;;  %v1499_v37 = vld [vmem:[%s2107_s14 + $0x28] sm:$0xff] }
  0x22   :  { %v1238_v38 = vld [vmem:[%s2109_s16] sm:$0x3]  ;;  %v1501_v39 = vld [vmem:[%s2107_s14 + $0x38] sm:$0xff]  ;;  %s1712_s14 = smov [#allocation5]  }
  0x23   :  { %v135_v44 = vld [vmem:[%s2113_s4] sm:$0xf]  ;;  %s1457_s16 = sshll.u32 %s1712_s14, 4  ;;  %s1458_s16 = int_to_ptr.vmem [resolvable:$true] %s1457_s16 }
  0x24   :  { %1639 = vset.pattern.permute.xlu0 %v1709_v6  ;;  %v169_v49 = vrot.slane %v135_v44, %v1931_v42  ;;  %v173_v50 = vrot.slane %v135_v44, %v172_v43  ;;  %v239_v51 = vrot.slane %v135_v44, %v1938_v45  ;;  %v243_v52 = vrot.slane %v135_v44, %v242_v46  ;;  %p1684_p9 = scmp.lt.s32.totalorder %s1458_s16, %s1458_s16 }
  0x25   :  { %1638 = vset.pattern.permute.xlu1 %v1708_v0  ;;  %221 = vperm.xlu0 %1639, %v137_v2  }
  0x26   :  { %157 = vperm.xlu1 %1638, %v139_v7   ;;  %v179_v55 = vrot.slane %v169_v49, %v1931_v42  ;;  %v183_v56 = vrot.slane %v173_v50, %v1931_v42  ;;  %v249_v57 = vrot.slane %v239_v51, %v1938_v45  ;;  %v253_v58 = vrot.slane %v243_v52, %v1938_v45  ;;  %v278_v51 = vld [vmem:[%s2099_s6] sm:$0xff]  ;;  %v279_v52 = vld [vmem:[%s2099_s6 + $0x8] sm:$0xff] }
  0x29   :  { %229 = vperm.xlu0 %1639, %v139_v7  }
  0x2a   :  { %204 = vperm.xlu1 %1638, %v143_v8  }
  0x2d   :  { %1642 = vset.pattern.permute.xlu0 %v1708_v0 }
  0x2e   :  { %209 = vperm.xlu1 %1638, %v144_v9   ;;  %293 = vperm.xlu0 %1642, %v283_v12  }
  0x32   :  { %1640 = vset.pattern.permute.xlu1 %v1709_v6  ;;  %428 = vperm.xlu0 %1642, %v1474_v14  }
  0x33   :  { %233 = vperm.xlu1 %1640, %v140_v5  }
  0x36   :  { %438 = vperm.xlu0 %1642, %v1476_v16  }
  0x37   :  { %1641 = vset.pattern.permute.xlu1 %v1708_v0 }
  0x38   :  { %288 = vperm.xlu1 %1641, %v282_v11  }
  0x3a   :  { %565 = vperm.xlu0 %1642, %v559_v18  }
  0x3c   :  { %298 = vperm.xlu1 %1641, %v284_v13  }
  0x3e   :  { %575 = vperm.xlu0 %1642, %v561_v20  }
  0x40   :  { %303 = vperm.xlu1 %1641, %v285_v15  }
  0x42   :  { %787 = vperm.xlu0 %1642, %v777_v22  }
  0x44   :  { %433 = vperm.xlu1 %1641, %v1475_v17  }
  0x46   :  { %797 = vperm.xlu0 %1642, %v779_v24  }
  0x48   :  { %443 = vperm.xlu1 %1641, %v1477_v19  }
  0x4a   :  { %927 = vperm.xlu0 %1642, %v781_v26  }
  0x4c   :  { %570 = vperm.xlu1 %1641, %v560_v21  }
  0x4e   :  { %937 = vperm.xlu0 %1642, %v783_v28  }
  0x50   :  { %580 = vperm.xlu1 %1641, %v562_v23  }
  0x52   :  { %971 = vperm.xlu0 %1642, %v965_v30  }
  0x54   :  { %792 = vperm.xlu1 %1641, %v778_v25  }
  0x56   :  { %981 = vperm.xlu0 %1642, %v967_v32  }
  0x58   :  { %802 = vperm.xlu1 %1641, %v780_v27  }
  0x5a   :  { %1110 = vperm.xlu0 %1642, %v1498_v34  }
  0x5c   :  { %932 = vperm.xlu1 %1641, %v782_v29  }
  0x5e   :  { %1120 = vperm.xlu0 %1642, %v1500_v36  }
  0x60   :  { %942 = vperm.xlu1 %1641, %v784_v31  }
  0x62   :  { %1241 = vperm.xlu0 %1642, %v1238_v38  }
  0x64   :  { %976 = vperm.xlu1 %1641, %v966_v33  }
  0x68   :  { %986 = vperm.xlu1 %1641, %v968_v35  }
  0x6c   :  { %1115 = vperm.xlu1 %1641, %v1499_v37  }
  0x70   :  { %1125 = vperm.xlu1 %1641, %v1501_v39  }
  0x97   :  { %v195_v47 = vpop.permute.xlu1 %194  ;;  %v148_v48 = vpop.permute.xlu0 %147 }
  0x98   :  { %v184_v62 = vmul.f32 %v179_v55, %v148_v48  ;;  %v185_v63 = vmul.f32 %v183_v56, %v148_v48 }
  0x9a   :  { %v212_v5 = vadd.f32 %v195_v47, %v184_v62  ;;  %v213_v6 = vadd.f32 %v195_v47, %v185_v63 }
  0x9b   :  { %v200_v53 = vpop.permute.xlu1 %199  ;;  %v153_v54 = vpop.permute.xlu0 %152 }
  0x9c   :  { %v186_v59 = vmul.f32 %v179_v55, %v153_v54  ;;  %v187_v60 = vmul.f32 %v183_v56, %v153_v54  ;;  %v281_v54 = vld [vmem:[%s2099_s6 + $0x18] sm:$0xff] }
  0x9e   :  { %v214_v3 = vadd.f32 %v200_v53, %v186_v59  ;;  %v215_v4 = vadd.f32 %v200_v53, %v187_v60  ;;  %v280_v53 = vld [vmem:[%s2099_s6 + $0x10] sm:$0xff] }
  0x9f   :  { %v163_v61 = vpop.permute.xlu0 %162 }
  0xa0   :  { %v226_v0 = vpop.permute.xlu1 %225  ;;  %v190_v31 = vmul.f32 %v179_v55, %v163_v61  ;;  %v191_v32 = vmul.f32 %v183_v56, %v163_v61 }
  0xa1   :  { %v256_v1 = vmul.f32 %v249_v57, %v226_v0  ;;  %v257_v2 = vmul.f32 %v253_v58, %v226_v0 }
  0xa3   :  { %v264_v8 = vadd.f32 %v256_v1, %v214_v3  ;;  %v265_v13 = vadd.f32 %v257_v2, %v215_v4 }
  0xa4   :  { %v222_v7 = vpop.permute.xlu0 %221 }
  0xa5   :  { %v254_v9 = vmul.f32 %v249_v57, %v222_v7  ;;  %v255_v11 = vmul.f32 %v253_v58, %v222_v7  ;;  %v158_v12 = vpop.permute.xlu1 %157  ;;  %v273_v18 = vmax.f32 %v265_v13, 0.0  ;;  %v272_v20 = vmax.f32 %v264_v8, 0.0 }
  0xa6   :  { %v188_v24 = vmul.f32 %v179_v55, %v158_v12  ;;  %v189_v25 = vmul.f32 %v183_v56, %v158_v12 }
  0xa7   :  { %v262_v14 = vadd.f32 %v254_v9, %v212_v5  ;;  %v263_v15 = vadd.f32 %v255_v11, %v213_v6 }
  0xa8   :  { %v230_v21 = vpop.permute.xlu0 %229 }
  0xa9   :  { %v205_v16 = vpop.permute.xlu1 %204  ;;  %v271_v17 = vmax.f32 %v263_v15, 0.0  ;;  %v270_v19 = vmax.f32 %v262_v14, 0.0  ;;  %v258_v29 = vmul.f32 %v249_v57, %v230_v21  ;;  %v259_v30 = vmul.f32 %v253_v58, %v230_v21 }
  0xaa   :  { %v216_v27 = vadd.f32 %v205_v16, %v188_v24  ;;  %v217_v28 = vadd.f32 %v205_v16, %v189_v25  ;;  %v1470_v24 = vld [vmem:[%s2099_s6 + $0x20] sm:$0xff]  ;;  %v1471_v25 = vld [vmem:[%s2099_s6 + $0x28] sm:$0xff] }
  0xab   :  { %v1507_v22 = vpack.c.bf16 %v273_v18, %v271_v17  ;;  %v1509_v23 = vpack.c.bf16 %v272_v20, %v270_v19 }
  0xac   :  { %v266_v33 = vadd.f32 %v258_v29, %v216_v27  ;;  %v267_v34 = vadd.f32 %v259_v30, %v217_v28  ;;  %v1473_v27 = vld [vmem:[%s2099_s6 + $0x38] sm:$0xff]  ;;  %v72_v28 = vld [vmem:[#allocation2 + $0x8] sm:$0xff]  ;;  %v71_v30 = vld [vmem:[#allocation2] sm:$0xff] }
  0xad   :  { %v210_v26 = vpop.permute.xlu1 %209  ;;  %1508 = vmatprep.subr.bf16.mxu0 %v1507_v22  ;;  %v294_v59 = vpop.permute.xlu0 %293  ;;  %v74_v29 = vld [vmem:[#allocation2 + $0x18] sm:$0xff] }
  0xae   :  { %1510 = vmatpush1.bf16.msra.mxu0 %v1509_v23  ;;  %v218_v36 = vadd.f32 %v210_v26, %v190_v31  ;;  %v219_v37 = vadd.f32 %v210_v26, %v191_v32  ;;  %v274_v44 = vmax.f32 %v266_v33, 0.0  ;;  %v275_v46 = vmax.f32 %v267_v34, 0.0  ;;  %v1472_v26 = vld [vmem:[%s2099_s6 + $0x30] sm:$0xff]  ;;  %v76_v33 = vld [vmem:[#allocation2 + $0x28] sm:$0xff]  ;;  %v78_v34 = vld [vmem:[#allocation2 + $0x38] sm:$0xff] }
  0xaf   :  { %v1531_v31 = vpack.c.bf16 %v74_v29, %v72_v28  ;;  %v73_v32 = vld [vmem:[#allocation2 + $0x10] sm:$0xff]  ;;  %v114_v28 = vld [vmem:[#allocation2 + $0x158] sm:$0xff] }
  0xb2   :  { %v234_v35 = vpop.permute.xlu1 %233 }
  0xb3   :  { %v260_v38 = vmul.f32 %v249_v57, %v234_v35  ;;  %v261_v39 = vmul.f32 %v253_v58, %v234_v35  ;;  %v1533_v35 = vpack.c.bf16 %v73_v32, %v71_v30  ;;  %v113_v32 = vld [vmem:[#allocation2 + $0x150] sm:$0xff] }
  0xb5   :  { %v268_v40 = vadd.f32 %v260_v38, %v218_v36  ;;  %v269_v43 = vadd.f32 %v261_v39, %v219_v37  ;;  %v1535_v36 = vpack.c.bf16 %v78_v34, %v76_v33  ;;  %v75_v37 = vld [vmem:[#allocation2 + $0x20] sm:$0xff]  ;;  %v77_v38 = vld [vmem:[#allocation2 + $0x30] sm:$0xff]  ;;  %v80_v39 = vld [vmem:[#allocation2 + $0x48] sm:$0xff] }
  0xb6   :  { %v116_v33 = vld [vmem:[#allocation2 + $0x168] sm:$0xff]  ;;  %v118_v34 = vld [vmem:[#allocation2 + $0x178] sm:$0xff] }
  0xb7   :  { %v276_v47 = vmax.f32 %v268_v40, 0.0  ;;  %v277_v48 = vmax.f32 %v269_v43, 0.0  ;;  %v289_v55 = vpop.permute.xlu1 %288  ;;  %v82_v40 = vld [vmem:[#allocation2 + $0x58] sm:$0xff]  ;;  %v1537_v43 = vpack.c.bf16 %v77_v38, %v75_v37  ;;  %v115_v37 = vld [vmem:[#allocation2 + $0x160] sm:$0xff]  ;;  %v117_v38 = vld [vmem:[#allocation2 + $0x170] sm:$0xff] }
  0xb9   :  { %v1511_v49 = vpack.c.bf16 %v277_v48, %v275_v46  ;;  %v1513_v50 = vpack.c.bf16 %v276_v47, %v274_v44  ;;  %v1539_v44 = vpack.c.bf16 %v82_v40, %v80_v39  ;;  %v79_v46 = vld [vmem:[#allocation2 + $0x40] sm:$0xff]  ;;  %v81_v47 = vld [vmem:[#allocation2 + $0x50] sm:$0xff]  ;;  %v84_v48 = vld [vmem:[#allocation2 + $0x68] sm:$0xff] }
  0xba   :  { %v120_v39 = vld [vmem:[#allocation2 + $0x188] sm:$0xff]  ;;  %v122_v40 = vld [vmem:[#allocation2 + $0x198] sm:$0xff] }
  0xbb   :  { %1512 = vmatprep.subr.bf16.mxu0 %v1511_v49  ;;  %v299_v0 = vpop.permute.xlu1 %298  ;;  %v86_v49 = vld [vmem:[#allocation2 + $0x78] sm:$0xff] }
  0xbc   :  { %1514 = vmatpush1.bf16.msra.mxu0 %v1513_v50  ;;  %v1541_v50 = vpack.c.bf16 %v81_v47, %v79_v46  ;;  %v119_v46 = vld [vmem:[#allocation2 + $0x180] sm:$0xff]  ;;  %v121_v47 = vld [vmem:[#allocation2 + $0x190] sm:$0xff] }
  0xbf   :  { %1466 = vmatmul.mubr.msk.f32.vlgmr.msra.gmra.mrb[0].mxu0 %vm306_vm0, %v278_v51  ;;  %v304_v12 = vpop.permute.xlu1 %303  ;;  %v1543_v51 = vpack.c.bf16 %v86_v49, %v84_v48  ;;  %v124_v48 = vld [vmem:[#allocation2 + $0x1a8] sm:$0xff]  ;;  %v126_v49 = vld [vmem:[#allocation2 + $0x1b8] sm:$0xff] }
  0xc0   :  { %389 = vmatprep.mubr.f32.mxu0 %v1710_v10 }
  0xc3   :  { %1467 = vmatmul.mubr.msk.f32.gmra.mrb[2].mxu0 %vm306_vm0, %v279_v52  ;;  %v83_v52 = vld [vmem:[#allocation2 + $0x60] sm:$0xff] }
  0xc4   :  { %395 = vmatprep.mubr.f32.mxu0 %v1710_v10 }
  0xc7   :  { %1468 = vmatmul.mubr.msk.f32.gmra.mrb[4].mxu0 %vm306_vm0, %v280_v53  ;;  %v85_v53 = vld [vmem:[#allocation2 + $0x70] sm:$0xff] }
  0xc8   :  { %401 = vmatprep.mubr.f32.mxu0 %v1710_v10 }
  0xcb   :  { %1469 = vmatmul.mubr.msk.f32.gmra.mrb[6].mxu0 %vm306_vm0, %v281_v54  ;;  %v88_v54 = vld [vmem:[#allocation2 + $0x88] sm:$0xff] }
  0xcc   :  { %659 = vmatprep.mubr.f32.mxu0 %v1710_v10 }
 0x192   :  { %v385_v56 = vpop.f32.mrb[0].mxu0 }
 0x193   :  { %v387_v57 = vpop.f32.mrb[1].mxu0  ;;  %v386_v58 = vadd.f32 %v385_v56, %v289_v55  ;;  %v1545_v56 = vpack.c.bf16 %v85_v53, %v83_v52  ;;  %v123_v52 = vld [vmem:[#allocation2 + $0x1a0] sm:$0xff]  ;;  %v125_v53 = vld [vmem:[#allocation2 + $0x1b0] sm:$0xff] }
 0x194   :  { %v388_v60 = vadd.f32 %v387_v57, %v289_v55  ;;  %v90_v55 = vld [vmem:[#allocation2 + $0x98] sm:$0xff] }
 0x195   :  { %v408_v2 = vmax.f32 %v386_v58, 0.0  ;;  %v1547_v57 = vpack.c.bf16 %v90_v55, %v88_v54  ;;  %v87_v58 = vld [vmem:[#allocation2 + $0x80] sm:$0xff]  ;;  %v128_v54 = vld [vmem:[#allocation2 + $0x1c8] sm:$0xff]  ;;  %v130_v55 = vld [vmem:[#allocation2 + $0x1d8] sm:$0xff] }
 0x196   :  { %v391_v61 = vpop.f32.mrb[2].mxu0  ;;  %v409_v4 = vmax.f32 %v388_v60, 0.0  ;;  %v92_v60 = vld [vmem:[#allocation2 + $0xa8] sm:$0xff] }
 0x197   :  { %v392_v62 = vadd.f32 %v391_v61, %v294_v59  ;;  %v393_v63 = vpop.f32.mrb[3].mxu0  ;;  %v94_v61 = vld [vmem:[#allocation2 + $0xb8] sm:$0xff] }
 0x198   :  { %v394_v1 = vadd.f32 %v393_v63, %v294_v59  ;;  %v89_v59 = vld [vmem:[#allocation2 + $0x90] sm:$0xff]  ;;  %v1551_v63 = vpack.c.bf16 %v94_v61, %v92_v60 }
 0x199   :  { %v410_v3 = vmax.f32 %v392_v62, 0.0  ;;  %v1549_v62 = vpack.c.bf16 %v89_v59, %v87_v58  ;;  %v127_v58 = vld [vmem:[#allocation2 + $0x1c0] sm:$0xff]  ;;  %v129_v59 = vld [vmem:[#allocation2 + $0x1d0] sm:$0xff] }
 0x19a   :  { %v411_v5 = vmax.f32 %v394_v1, 0.0  ;;  %v397_v6 = vpop.f32.mrb[4].mxu0  ;;  %v93_v1 = vld [vmem:[#allocation2 + $0xb0] sm:$0xff]  ;;  %v1589_v60 = vpack.c.bf16 %v129_v59, %v127_v58 }
 0x19b   :  { %v399_v7 = vpop.f32.mrb[5].mxu0  ;;  %v1517_v8 = vpack.c.bf16 %v410_v3, %v408_v2  ;;  %v398_v11 = vadd.f32 %v397_v6, %v299_v0  ;;  %v96_v2 = vld [vmem:[#allocation2 + $0xc8] sm:$0xff]  ;;  %v98_v3 = vld [vmem:[#allocation2 + $0xd8] sm:$0xff]  ;;  %v95_v6 = vld [vmem:[#allocation2 + $0xc0] sm:$0xff] }
 0x19c   :  { %v1515_v9 = vpack.c.bf16 %v411_v5, %v409_v4  ;;  %v400_v13 = vadd.f32 %v399_v7, %v299_v0  ;;  %v91_v0 = vld [vmem:[#allocation2 + $0xa0] sm:$0xff]  ;;  %v1555_v5 = vpack.c.bf16 %v98_v3, %v96_v2  ;;  %v97_v7 = vld [vmem:[#allocation2 + $0xd0] sm:$0xff] }
 0x19d   :  { %v412_v18 = vmax.f32 %v398_v11, 0.0  ;;  %v1553_v4 = vpack.c.bf16 %v93_v1, %v91_v0  ;;  %v1557_v11 = vpack.c.bf16 %v97_v7, %v95_v6  ;;  %v434_v1 = vpop.permute.xlu1 %433 }
 0x19e   :  { %v403_v14 = vpop.f32.mrb[6].mxu0  ;;  %1516 = vmatprep.subr.bf16.mxu1 %v1515_v9  ;;  %v413_v20 = vmax.f32 %v400_v13, 0.0  ;;  %v102_v9 = vld [vmem:[#allocation2 + $0xf8] sm:$0xff]  ;;  %v99_v13 = vld [vmem:[#allocation2 + $0xe0] sm:$0xff] }
 0x19f   :  { %v404_v15 = vadd.f32 %v403_v14, %v304_v12  ;;  %v405_v16 = vpop.f32.mrb[7].mxu0  ;;  %1518 = vmatpush1.bf16.msra.mxu1 %v1517_v8  ;;  %v100_v8 = vld [vmem:[#allocation2 + $0xe8] sm:$0xff]  ;;  %v101_v14 = vld [vmem:[#allocation2 + $0xf0] sm:$0xff] }
 0x1a0   :  { %v406_v17 = vadd.f32 %v405_v16, %v304_v12  ;;  %v1559_v12 = vpack.c.bf16 %v102_v9, %v100_v8  ;;  %v106_v16 = vld [vmem:[#allocation2 + $0x118] sm:$0xff] }
 0x1a1   :  { %v414_v19 = vmax.f32 %v404_v15, 0.0  ;;  %v104_v15 = vld [vmem:[#allocation2 + $0x108] sm:$0xff] }
 0x1a2   :  { %v415_v21 = vmax.f32 %v406_v17, 0.0  ;;  %v1561_v17 = vpack.c.bf16 %v101_v14, %v99_v13 }
 0x1a3   :  { %v1521_v22 = vpack.c.bf16 %v414_v19, %v412_v18  ;;  %v1563_v18 = vpack.c.bf16 %v106_v16, %v104_v15  ;;  %v103_v19 = vld [vmem:[#allocation2 + $0x100] sm:$0xff] }
 0x1a4   :  { %v1519_v23 = vpack.c.bf16 %v415_v21, %v413_v20  ;;  %v105_v20 = vld [vmem:[#allocation2 + $0x110] sm:$0xff]  ;;  %v108_v21 = vld [vmem:[#allocation2 + $0x128] sm:$0xff] }
 0x1a6   :  { %1520 = vmatprep.subr.bf16.mxu1 %v1519_v23  ;;  %v1565_v23 = vpack.c.bf16 %v105_v20, %v103_v19 }
 0x1a7   :  { %1522 = vmatpush1.bf16.msra.mxu1 %v1521_v22  ;;  %v110_v22 = vld [vmem:[#allocation2 + $0x138] sm:$0xff] }
 0x1a8   :  { %1532 = vmatprep.subr.bf16.mxu1 %v1531_v31  ;;  %v111_v31 = vld [vmem:[#allocation2 + $0x140] sm:$0xff] }
 0x1aa   :  { %1478 = vmatmul.mubr.msk.f32.vlgmr.msra.gmra.mrb[0].mxu1 %vm306_vm0, %v1470_v24  ;;  %v1567_v24 = vpack.c.bf16 %v110_v22, %v108_v21 }
 0x1ab   :  { %528 = vmatprep.mubr.f32.mxu1 %v1710_v10  ;;  %1534 = vmatpush1.bf16.msra.mxu1 %v1533_v35  ;;  %v1573_v35 = vpack.c.bf16 %v113_v32, %v111_v31  ;;  %v556_v31 = vld [vmem:[%s2101_s8 + $0x8] sm:$0xff]  ;;  %v557_v32 = vld [vmem:[%s2101_s8 + $0x10] sm:$0xff] }
 0x1ac   :  { %1536 = vmatprep.subr.bf16.mxu1 %v1535_v36  ;;  %v1575_v36 = vpack.c.bf16 %v118_v34, %v116_v33  ;;  %v558_v33 = vld [vmem:[%s2101_s8 + $0x18] sm:$0xff]  ;;  %v132_v34 = vld [vmem:[#allocation2 + $0x1e8] sm:$0xff] }
 0x1ae   :  { %1479 = vmatmul.mubr.msk.f32.gmra.mrb[2].mxu1 %vm306_vm0, %v1471_v25  ;;  %v107_v25 = vld [vmem:[#allocation2 + $0x120] sm:$0xff] }
 0x1af   :  { %534 = vmatprep.mubr.f32.mxu1 %v1710_v10  ;;  %1538 = vmatpush1.bf16.msra.mxu1 %v1537_v43  ;;  %v1577_v43 = vpack.c.bf16 %v117_v38, %v115_v37  ;;  %v131_v37 = vld [vmem:[#allocation2 + $0x1e0] sm:$0xff]  ;;  %v133_v38 = vld [vmem:[#allocation2 + $0x1f0] sm:$0xff] }
 0x1b0   :  { %1540 = vmatprep.subr.bf16.mxu1 %v1539_v44  ;;  %v1579_v44 = vpack.c.bf16 %v122_v40, %v120_v39  ;;  %v1593_v39 = vpack.c.bf16 %v133_v38, %v131_v37 }
 0x1b2   :  { %1480 = vmatmul.mubr.msk.f32.gmra.mrb[4].mxu1 %vm306_vm0, %v1472_v26  ;;  %v109_v26 = vld [vmem:[#allocation2 + $0x130] sm:$0xff] }
 0x1b3   :  { %540 = vmatprep.mubr.f32.mxu1 %v1710_v10  ;;  %1542 = vmatpush1.bf16.msra.mxu1 %v1541_v50  ;;  %v1569_v29 = vpack.c.bf16 %v109_v26, %v107_v25  ;;  %v1581_v50 = vpack.c.bf16 %v121_v47, %v119_v46 }
 0x1b4   :  { %1544 = vmatprep.subr.bf16.mxu1 %v1543_v51  ;;  %v1583_v51 = vpack.c.bf16 %v126_v49, %v124_v48 }
 0x1b6   :  { %1481 = vmatmul.mubr.msk.f32.gmra.mrb[6].mxu1 %vm306_vm0, %v1473_v27  ;;  %v112_v27 = vld [vmem:[#allocation2 + $0x148] sm:$0xff] }
 0x1b7   :  { %1546 = vmatpush1.bf16.msra.mxu1 %v1545_v56  ;;  %v1571_v30 = vpack.c.bf16 %v114_v28, %v112_v27  ;;  %v1585_v56 = vpack.c.bf16 %v125_v53, %v123_v52 }
 0x1b8   :  { %1548 = vmatprep.subr.bf16.mxu1 %v1547_v57  ;;  %v1587_v57 = vpack.c.bf16 %v130_v55, %v128_v54 }
 0x1bb   :  { %1550 = vmatpush1.bf16.msra.mxu1 %v1549_v62 }
 0x1bc   :  { %1552 = vmatprep.subr.bf16.mxu1 %v1551_v63  ;;  %v429_v63 = vpop.permute.xlu0 %428 }
 0x1bf   :  { %1554 = vmatpush1.bf16.msra.mxu1 %v1553_v4 }
 0x1c0   :  { %1556 = vmatprep.subr.bf16.mxu1 %v1555_v5  ;;  %v439_v15 = vpop.permute.xlu0 %438 }
 0x1c3   :  { %1558 = vmatpush1.bf16.msra.mxu1 %v1557_v11 }
 0x1c4   :  { %1560 = vmatprep.subr.bf16.mxu1 %v1559_v12 }
 0x1c7   :  { %1562 = vmatpush1.bf16.msra.mxu1 %v1561_v17 }
 0x1c8   :  { %1564 = vmatprep.subr.bf16.mxu1 %v1563_v18  ;;  %v444_v18 = vpop.permute.xlu1 %443 }
 0x1cb   :  { %1566 = vmatpush1.bf16.msra.mxu1 %v1565_v23 }
 0x1cc   :  { %1568 = vmatprep.subr.bf16.mxu1 %v1567_v24  ;;  %v571_v49 = vpop.permute.xlu1 %570 }
 0x1cf   :  { %1570 = vmatpush1.bf16.msra.mxu1 %v1569_v29 }
 0x1d0   :  { %1572 = vmatprep.subr.bf16.mxu1 %v1571_v30  ;;  %v555_v30 = vld [vmem:[%s2101_s8] sm:$0xff]  ;;  %v581_v59 = vpop.permute.xlu1 %580 }
 0x1d3   :  { %1574 = vmatpush1.bf16.msra.mxu1 %v1573_v35  ;;  %v134_v35 = vld [vmem:[#allocation2 + $0x1f8] sm:$0xff] }
 0x1d4   :  { %1576 = vmatprep.subr.bf16.mxu1 %v1575_v36  ;;  %v1591_v36 = vpack.c.bf16 %v134_v35, %v132_v34 }
 0x1d7   :  { %1578 = vmatpush1.bf16.msra.mxu1 %v1577_v43  ;;  %v566_v43 = vpop.permute.xlu0 %565 }
 0x1d8   :  { %1580 = vmatprep.subr.bf16.mxu1 %v1579_v44 }
 0x1db   :  { %1582 = vmatpush1.bf16.msra.mxu1 %v1581_v50  ;;  %v576_v54 = vpop.permute.xlu0 %575 }
 0x1dc   :  { %1584 = vmatprep.subr.bf16.mxu1 %v1583_v51 }
 0x1df   :  { %1586 = vmatpush1.bf16.msra.mxu1 %v1585_v56 }
 0x1e0   :  { %1588 = vmatprep.subr.bf16.mxu1 %v1587_v57 }
 0x1e3   :  { %1590 = vmatpush1.bf16.msra.mxu1 %v1589_v60 }
 0x1e4   :  { %1592 = vmatprep.subr.bf16.mxu1 %v1591_v36 }
 0x1e7   :  { %1594 = vmatpush1.bf16.msra.mxu1 %v1593_v39 }
 0x27d   :  { %v524_v61 = vpop.f32.mrb[0].mxu1 }
 0x27e   :  { %v526_v62 = vpop.f32.mrb[1].mxu1  ;;  %v525_v0 = vadd.f32 %v524_v61, %v429_v63 }
 0x27f   :  { %v527_v2 = vadd.f32 %v526_v62, %v429_v63 }
 0x280   :  { %v547_v7 = vmax.f32 %v525_v0, 0.0 }
 0x281   :  { %v530_v3 = vpop.f32.mrb[2].mxu1  ;;  %v548_v9 = vmax.f32 %v527_v2, 0.0 }
 0x282   :  { %v531_v4 = vadd.f32 %v530_v3, %v434_v1  ;;  %v532_v5 = vpop.f32.mrb[3].mxu1 }
 0x283   :  { %v533_v6 = vadd.f32 %v532_v5, %v434_v1 }
 0x284   :  { %v549_v8 = vmax.f32 %v531_v4, 0.0 }
 0x285   :  { %v550_v11 = vmax.f32 %v533_v6, 0.0  ;;  %v536_v12 = vpop.f32.mrb[4].mxu1 }
 0x286   :  { %v1525_v13 = vpack.c.bf16 %v549_v8, %v547_v7  ;;  %v538_v14 = vpop.f32.mrb[5].mxu1  ;;  %v537_v17 = vadd.f32 %v536_v12, %v439_v15  ;;  %v773_v12 = vld [vmem:[%s2103_s10] sm:$0xff] }
 0x287   :  { %v1523_v16 = vpack.c.bf16 %v550_v11, %v548_v9  ;;  %v539_v19 = vadd.f32 %v538_v14, %v439_v15  ;;  %v775_v14 = vld [vmem:[%s2103_s10 + $0x10] sm:$0xff]  ;;  %v776_v15 = vld [vmem:[%s2103_s10 + $0x18] sm:$0xff] }
 0x288   :  { %v551_v24 = vmax.f32 %v537_v17, 0.0  ;;  %v793_v17 = vpop.permute.xlu1 %792 }
 0x289   :  { %v542_v20 = vpop.f32.mrb[6].mxu1  ;;  %1524 = vmatprep.subr.bf16.mxu0 %v1523_v16  ;;  %v552_v26 = vmax.f32 %v539_v19, 0.0  ;;  %v788_v16 = vpop.permute.xlu0 %787 }
 0x28a   :  { %v543_v21 = vadd.f32 %v542_v20, %v444_v18  ;;  %v544_v22 = vpop.f32.mrb[7].mxu1  ;;  %1526 = vmatpush1.bf16.msra.mxu0 %v1525_v13  ;;  %v774_v13 = vld [vmem:[%s2103_s10 + $0x8] sm:$0xff] }
 0x28b   :  { %v545_v23 = vadd.f32 %v544_v22, %v444_v18  ;;  %v136_v18 = vld [vmem:[%s2114_s28] sm:$0x3] }
 0x28c   :  { %v553_v25 = vmax.f32 %v543_v21, 0.0  ;;  %v809_v19 = vrot.slane %v136_v18, %v1931_v42  ;;  %v813_v20 = vrot.slane %v136_v18, %v1938_v45 }
 0x28d   :  { %v554_v27 = vmax.f32 %v545_v23, 0.0  ;;  %v798_v21 = vpop.permute.xlu0 %797 }
 0x28e   :  { %v1529_v28 = vpack.c.bf16 %v553_v25, %v551_v24  ;;  %v816_v22 = vmul.f32 %v809_v19, %v788_v16  ;;  %v817_v23 = vmul.f32 %v813_v20, %v788_v16  ;;  %v803_v24 = vpop.permute.xlu1 %802  ;;  %v820_v39 = vmul.f32 %v809_v19, %v798_v21 }
 0x28f   :  { %v1527_v29 = vpack.c.bf16 %v554_v27, %v552_v26 }
 0x291   :  { %1528 = vmatprep.subr.bf16.mxu0 %v1527_v29  ;;  %v818_v29 = vmul.f32 %v809_v19, %v793_v17 }
 0x292   :  { %1530 = vmatpush1.bf16.msra.mxu0 %v1529_v28  ;;  %v933_v36 = vpop.permute.xlu1 %932 }
 0x295   :  { %1482 = vmatmul.mubr.msk.f32.vlgmr.msra.gmra.mrb[8].mxu0 %vm306_vm0, %v555_v30  ;;  %v819_v30 = vmul.f32 %v813_v20, %v793_v17 }
 0x296   :  { %665 = vmatprep.mubr.f32.mxu0 %v1710_v10 }
 0x299   :  { %1483 = vmatmul.mubr.msk.f32.gmra.mrb[10].mxu0 %vm306_vm0, %v556_v31  ;;  %v928_v31 = vpop.permute.xlu0 %927 }
 0x29a   :  { %671 = vmatprep.mubr.f32.mxu0 %v1710_v10 }
 0x29d   :  { %1484 = vmatmul.mubr.msk.f32.gmra.mrb[12].mxu0 %vm306_vm0, %v557_v32 }
 0x29e   :  { %677 = vmatprep.mubr.f32.mxu0 %v1710_v10 }
 0x2a1   :  { %1485 = vmatmul.mubr.msk.f32.gmra.mrb[14].mxu0 %vm306_vm0, %v558_v33 }
 0x2a2   :  { %900 = vmatprep.mubr.f32.mxu0 %v1710_v10 }
 0x368   :  { %v661_v40 = vpop.f32.mrb[8].mxu0 }
 0x369   :  { %v663_v44 = vpop.f32.mrb[9].mxu0  ;;  %v662_v47 = vadd.f32 %v661_v40, %v566_v43 }
 0x36a   :  { %v664_v46 = vadd.f32 %v663_v44, %v566_v43  ;;  %v821_v43 = vmul.f32 %v813_v20, %v798_v21 }
 0x36c   :  { %v667_v48 = vpop.f32.mrb[10].mxu0  ;;  %748 = vmatprep.mubr.f32.mxu1 %v664_v46 }
 0x36d   :  { %v669_v50 = vpop.f32.mrb[11].mxu0  ;;  %749 = vmatmul.mubr.f32.vlgmr.msra.gmra.mrb[8].mxu1 %v662_v47  ;;  %v668_v52 = vadd.f32 %v667_v48, %v571_v49 }
 0x36e   :  { %v670_v51 = vadd.f32 %v669_v50, %v571_v49 }
 0x370   :  { %v673_v53 = vpop.f32.mrb[12].mxu0  ;;  %754 = vmatprep.mubr.f32.mxu1 %v670_v51 }
 0x371   :  { %v675_v55 = vpop.f32.mrb[13].mxu0  ;;  %755 = vmatmul.mubr.f32.gmra.mrb[10].mxu1 %v668_v52  ;;  %v674_v57 = vadd.f32 %v673_v53, %v576_v54 }
 0x372   :  { %v676_v56 = vadd.f32 %v675_v55, %v576_v54  ;;  %v822_v54 = vmul.f32 %v809_v19, %v803_v24 }
 0x374   :  { %v679_v58 = vpop.f32.mrb[14].mxu0  ;;  %760 = vmatprep.mubr.f32.mxu1 %v676_v56  ;;  %v823_v56 = vmul.f32 %v813_v20, %v803_v24 }
 0x375   :  { %v681_v60 = vpop.f32.mrb[15].mxu0  ;;  %761 = vmatmul.mubr.f32.gmra.mrb[12].mxu1 %v674_v57  ;;  %v680_v62 = vadd.f32 %v679_v58, %v581_v59  ;;  %v938_v57 = vpop.permute.xlu0 %937 }
 0x376   :  { %v682_v61 = vadd.f32 %v681_v60, %v581_v59 }
 0x378   :  { %766 = vmatprep.mubr.f32.mxu1 %v682_v61 }
 0x379   :  { %767 = vmatmul.mubr.f32.gmra.mrb[14].mxu1 %v680_v62  ;;  %v972_v17 = vpop.permute.xlu0 %971 }
 0x440   :  { %v750_v63 = vpop.f32.mrb[8].mxu1 }
 0x441   :  { %v752_v0 = vpop.f32.mrb[9].mxu1 }
 0x444   :  { %v756_v1 = vpop.f32.mrb[10].mxu1 }
 0x445   :  { %v1597_v2 = vpack.c.bf16 %v756_v1, %v750_v63  ;;  %v758_v3 = vpop.f32.mrb[11].mxu1  ;;  %v943_v63 = vpop.permute.xlu1 %942 }
 0x446   :  { %v1595_v4 = vpack.c.bf16 %v758_v3, %v752_v0 }
 0x448   :  { %v762_v5 = vpop.f32.mrb[12].mxu1  ;;  %1596 = vmatprep.subr.bf16.mxu0 %v1595_v4 }
 0x449   :  { %v764_v6 = vpop.f32.mrb[13].mxu1  ;;  %1598 = vmatpush1.bf16.msra.mxu0 %v1597_v2  ;;  %v977_v19 = vpop.permute.xlu1 %976 }
 0x44c   :  { %v768_v7 = vpop.f32.mrb[14].mxu1 }
 0x44d   :  { %v1601_v8 = vpack.c.bf16 %v768_v7, %v762_v5  ;;  %v770_v9 = vpop.f32.mrb[15].mxu1 }
 0x44e   :  { %v1599_v11 = vpack.c.bf16 %v770_v9, %v764_v6 }
 0x450   :  { %1600 = vmatprep.subr.bf16.mxu0 %v1599_v11  ;;  %v961_v11 = vld [vmem:[%s2106_s13] sm:$0xff] }
 0x451   :  { %1602 = vmatpush1.bf16.msra.mxu0 %v1601_v8 }
 0x454   :  { %1486 = vmatmul.mubr.msk.f32.vlgmr.msra.gmra.mrb[16].mxu0 %vm306_vm0, %v773_v12  ;;  %v962_v12 = vld [vmem:[%s2106_s13 + $0x8] sm:$0xff] }
 0x455   :  { %906 = vmatprep.mubr.f32.mxu0 %v1710_v10 }
 0x458   :  { %1487 = vmatmul.mubr.msk.f32.gmra.mrb[18].mxu0 %vm306_vm0, %v774_v13  ;;  %v963_v13 = vld [vmem:[%s2106_s13 + $0x10] sm:$0xff] }
 0x459   :  { %912 = vmatprep.mubr.f32.mxu0 %v1710_v10 }
 0x45c   :  { %1488 = vmatmul.mubr.msk.f32.gmra.mrb[20].mxu0 %vm306_vm0, %v775_v14  ;;  %v964_v14 = vld [vmem:[%s2106_s13 + $0x18] sm:$0xff] }
 0x45d   :  { %918 = vmatprep.mubr.f32.mxu0 %v1710_v10 }
 0x460   :  { %1489 = vmatmul.mubr.msk.f32.gmra.mrb[22].mxu0 %vm306_vm0, %v776_v15 }
 0x461   :  { %1065 = vmatprep.mubr.f32.mxu0 %v1710_v10 }
 0x527   :  { %v902_v25 = vpop.f32.mrb[16].mxu0 }
 0x528   :  { %v903_v26 = vadd.f32 %v902_v25, %v816_v22  ;;  %v904_v27 = vpop.f32.mrb[17].mxu0 }
 0x529   :  { %v905_v28 = vadd.f32 %v904_v27, %v817_v23 }
 0x52a   :  { %v945_v33 = vadd.f32 %v928_v31, %v903_v26 }
 0x52b   :  { %v908_v32 = vpop.f32.mrb[18].mxu0  ;;  %v946_v37 = vadd.f32 %v928_v31, %v905_v28 }
 0x52c   :  { %v909_v34 = vadd.f32 %v908_v32, %v818_v29  ;;  %v910_v35 = vpop.f32.mrb[19].mxu0  ;;  %v953_v47 = vmax.f32 %v945_v33, 0.0  ;;  %v982_v32 = vpop.permute.xlu0 %981 }
 0x52d   :  { %v911_v38 = vadd.f32 %v910_v35, %v819_v30  ;;  %v954_v51 = vmax.f32 %v946_v37, 0.0  ;;  %v987_v35 = vpop.permute.xlu1 %986 }
 0x52e   :  { %v947_v40 = vadd.f32 %v933_v36, %v909_v34 }
 0x52f   :  { %v948_v44 = vadd.f32 %v933_v36, %v911_v38  ;;  %v914_v46 = vpop.f32.mrb[20].mxu0 }
 0x530   :  { %v955_v48 = vmax.f32 %v947_v40, 0.0  ;;  %v915_v49 = vadd.f32 %v914_v46, %v820_v39  ;;  %v916_v50 = vpop.f32.mrb[21].mxu0 }
 0x531   :  { %v956_v52 = vmax.f32 %v948_v44, 0.0  ;;  %v917_v53 = vadd.f32 %v916_v50, %v821_v43  ;;  %v1494_v50 = vld [vmem:[%s2106_s13 + $0x20] sm:$0xff] }
 0x532   :  { %v1605_v55 = vpack.c.bf16 %v955_v48, %v953_v47  ;;  %v949_v60 = vadd.f32 %v938_v57, %v915_v49 }
 0x533   :  { %v920_v58 = vpop.f32.mrb[22].mxu0  ;;  %v1603_v59 = vpack.c.bf16 %v956_v52, %v954_v51  ;;  %v950_v0 = vadd.f32 %v938_v57, %v917_v53  ;;  %v1495_v51 = vld [vmem:[%s2106_s13 + $0x28] sm:$0xff]  ;;  %v1496_v52 = vld [vmem:[%s2106_s13 + $0x30] sm:$0xff]  ;;  %v1497_v53 = vld [vmem:[%s2106_s13 + $0x38] sm:$0xff] }
 0x534   :  { %v921_v61 = vadd.f32 %v920_v58, %v822_v54  ;;  %v922_v62 = vpop.f32.mrb[23].mxu0  ;;  %v957_v4 = vmax.f32 %v949_v60, 0.0  ;;  %v1116_v58 = vpop.permute.xlu1 %1115 }
 0x535   :  { %v923_v1 = vadd.f32 %v922_v62, %v823_v56  ;;  %1604 = vmatprep.subr.bf16.mxu0 %v1603_v59  ;;  %v958_v6 = vmax.f32 %v950_v0, 0.0  ;;  %v1111_v56 = vpop.permute.xlu0 %1110 }
 0x536   :  { %v951_v2 = vadd.f32 %v943_v63, %v921_v61  ;;  %1606 = vmatpush1.bf16.msra.mxu0 %v1605_v55 }
 0x537   :  { %v952_v3 = vadd.f32 %v943_v63, %v923_v1 }
 0x538   :  { %v959_v5 = vmax.f32 %v951_v2, 0.0 }
 0x539   :  { %v960_v7 = vmax.f32 %v952_v3, 0.0 }
 0x53a   :  { %v1609_v8 = vpack.c.bf16 %v959_v5, %v957_v4 }
 0x53b   :  { %v1607_v9 = vpack.c.bf16 %v960_v7, %v958_v6  ;;  %v1121_v7 = vpop.permute.xlu0 %1120 }
 0x53d   :  { %1608 = vmatprep.subr.bf16.mxu0 %v1607_v9  ;;  %v1126_v9 = vpop.permute.xlu1 %1125 }
 0x53e   :  { %1610 = vmatpush1.bf16.msra.mxu0 %v1609_v8 }
 0x541   :  { %1490 = vmatmul.mubr.msk.f32.vlgmr.msra.gmra.mrb[24].mxu0 %vm306_vm0, %v961_v11 }
 0x542   :  { %1071 = vmatprep.mubr.f32.mxu0 %v1710_v10 }
 0x545   :  { %1491 = vmatmul.mubr.msk.f32.gmra.mrb[26].mxu0 %vm306_vm0, %v962_v12 }
 0x546   :  { %1077 = vmatprep.mubr.f32.mxu0 %v1710_v10 }
 0x549   :  { %1492 = vmatmul.mubr.msk.f32.gmra.mrb[28].mxu0 %vm306_vm0, %v963_v13 }
 0x54a   :  { %1083 = vmatprep.mubr.f32.mxu0 %v1710_v10 }
 0x54d   :  { %1493 = vmatmul.mubr.msk.f32.gmra.mrb[30].mxu0 %vm306_vm0, %v964_v14 }
 0x54e   :  { %1204 = vmatprep.mubr.f32.mxu0 %v1710_v10 }
 0x614   :  { %v1067_v15 = vpop.f32.mrb[24].mxu0 }
 0x615   :  { %v1069_v16 = vpop.f32.mrb[25].mxu0  ;;  %v1068_v18 = vadd.f32 %v1067_v15, %v972_v17 }
 0x616   :  { %v1070_v20 = vadd.f32 %v1069_v16, %v972_v17 }
 0x617   :  { %v1090_v25 = vmax.f32 %v1068_v18, 0.0 }
 0x618   :  { %v1073_v21 = vpop.f32.mrb[26].mxu0  ;;  %v1091_v27 = vmax.f32 %v1070_v20, 0.0 }
 0x619   :  { %v1074_v22 = vadd.f32 %v1073_v21, %v977_v19  ;;  %v1075_v23 = vpop.f32.mrb[27].mxu0 }
 0x61a   :  { %v1076_v24 = vadd.f32 %v1075_v23, %v977_v19  ;;  %v1242_v23 = vpop.permute.xlu0 %1241 }
 0x61b   :  { %v1092_v26 = vmax.f32 %v1074_v22, 0.0  ;;  %v1237_v22 = vld [vmem:[%s2108_s15] sm:$0x3] }
 0x61c   :  { %v1093_v28 = vmax.f32 %v1076_v24, 0.0  ;;  %v1079_v29 = vpop.f32.mrb[28].mxu0 }
 0x61d   :  { %v1613_v30 = vpack.c.bf16 %v1092_v26, %v1090_v25  ;;  %v1081_v31 = vpop.f32.mrb[29].mxu0  ;;  %v1080_v34 = vadd.f32 %v1079_v29, %v982_v32 }
 0x61e   :  { %v1611_v33 = vpack.c.bf16 %v1093_v28, %v1091_v27  ;;  %v1082_v36 = vadd.f32 %v1081_v31, %v982_v32 }
 0x61f   :  { %v1094_v43 = vmax.f32 %v1080_v34, 0.0 }
 0x620   :  { %v1085_v37 = vpop.f32.mrb[30].mxu0  ;;  %1612 = vmatprep.subr.bf16.mxu0 %v1611_v33  ;;  %v1095_v46 = vmax.f32 %v1082_v36, 0.0 }
 0x621   :  { %v1086_v38 = vadd.f32 %v1085_v37, %v987_v35  ;;  %v1087_v39 = vpop.f32.mrb[31].mxu0  ;;  %1614 = vmatpush1.bf16.msra.mxu0 %v1613_v30 }
 0x622   :  { %v1088_v40 = vadd.f32 %v1087_v39, %v987_v35 }
 0x623   :  { %v1096_v44 = vmax.f32 %v1086_v38, 0.0 }
 0x624   :  { %v1097_v47 = vmax.f32 %v1088_v40, 0.0 }
 0x625   :  { %v1617_v48 = vpack.c.bf16 %v1096_v44, %v1094_v43 }
 0x626   :  { %v1615_v49 = vpack.c.bf16 %v1097_v47, %v1095_v46 }
 0x628   :  { %1616 = vmatprep.subr.bf16.mxu0 %v1615_v49 }
 0x629   :  { %1618 = vmatpush1.bf16.msra.mxu0 %v1617_v48 }
 0x62c   :  { %1502 = vmatmul.mubr.msk.f32.vlgmr.msra.gmra.mrb[32].mxu0 %vm306_vm0, %v1494_v50 }
 0x62d   :  { %1210 = vmatprep.mubr.f32.mxu0 %v1710_v10 }
 0x630   :  { %1503 = vmatmul.mubr.msk.f32.gmra.mrb[34].mxu0 %vm306_vm0, %v1495_v51 }
 0x631   :  { %1216 = vmatprep.mubr.f32.mxu0 %v1710_v10 }
 0x634   :  { %1504 = vmatmul.mubr.msk.f32.gmra.mrb[36].mxu0 %vm306_vm0, %v1496_v52 }
 0x635   :  { %1222 = vmatprep.mubr.f32.mxu0 %v1710_v10 }
 0x638   :  { %1505 = vmatmul.mubr.msk.f32.gmra.mrb[38].mxu0 %vm306_vm0, %v1497_v53 }
 0x639   :  { %1311 = vmatprep.mubr.f32.mxu0 %v1710_v10 }
 0x6ff   :  { %v1206_v54 = vpop.f32.mrb[32].mxu0 }
 0x700   :  { %v1208_v55 = vpop.f32.mrb[33].mxu0  ;;  %v1207_v57 = vadd.f32 %v1206_v54, %v1111_v56 }
 0x701   :  { %v1209_v59 = vadd.f32 %v1208_v55, %v1111_v56 }
 0x702   :  { %v1229_v0 = vmax.f32 %v1207_v57, 0.0  ;;  %v1711_v57 = vmov 1966171168  }
 0x703   :  { %v1212_v60 = vpop.f32.mrb[34].mxu0  ;;  %v1230_v2 = vmax.f32 %v1209_v59, 0.0 }
 0x704   :  { %v1213_v61 = vadd.f32 %v1212_v60, %v1116_v58  ;;  %v1214_v62 = vpop.f32.mrb[35].mxu0 }
 0x705   :  { %v1215_v63 = vadd.f32 %v1214_v62, %v1116_v58  ;;  %v1363_v58 = vunpack.c.l.s4 %v1711_v57 }
 0x706   :  { %v1231_v1 = vmax.f32 %v1213_v61, 0.0 }
 0x707   :  { %v1232_v3 = vmax.f32 %v1215_v63, 0.0  ;;  %v1218_v4 = vpop.f32.mrb[36].mxu0 }
 0x708   :  { %v1621_v5 = vpack.c.bf16 %v1231_v1, %v1229_v0  ;;  %v1220_v6 = vpop.f32.mrb[37].mxu0  ;;  %v1219_v10 = vadd.f32 %v1218_v4, %v1121_v7  ;;  %v1364_v1 = vunpack.c.0.s8 %v1363_v58 }
 0x709   :  { %v1619_v8 = vpack.c.bf16 %v1232_v3, %v1230_v2  ;;  %v1221_v11 = vadd.f32 %v1220_v6, %v1121_v7 }
 0x70a   :  { %v1233_v16 = vmax.f32 %v1219_v10, 0.0  ;;  %v1367_v6 = vsub.s32 %v1364_v1, %v1928_v41 }
 0x70b   :  { %v1224_v12 = vpop.f32.mrb[38].mxu0  ;;  %1620 = vmatprep.subr.bf16.mxu0 %v1619_v8  ;;  %v1234_v18 = vmax.f32 %v1221_v11, 0.0 }
 0x70c   :  { %v1225_v13 = vadd.f32 %v1224_v12, %v1126_v9  ;;  %v1226_v14 = vpop.f32.mrb[39].mxu0  ;;  %1622 = vmatpush1.bf16.msra.mxu0 %v1621_v5 }
 0x70d   :  { %v1227_v15 = vadd.f32 %v1226_v14, %v1126_v9 }
 0x70e   :  { %v1235_v17 = vmax.f32 %v1225_v13, 0.0 }
 0x70f   :  { %v1236_v19 = vmax.f32 %v1227_v15, 0.0 }
 0x710   :  { %v1625_v20 = vpack.c.bf16 %v1235_v17, %v1233_v16 }
 0x711   :  { %v1623_v21 = vpack.c.bf16 %v1236_v19, %v1234_v18 }
 0x713   :  { %1624 = vmatprep.subr.bf16.mxu0 %v1623_v21 }
 0x714   :  { %1626 = vmatpush1.bf16.msra.mxu0 %v1625_v20  ;;  %v1358_v20 = vld [vmem:[%s2095_s2] sm:$0x3]  ;;  %s1679_s2 = scalar_lea.vmem %s1458_s16, 128 }
 0x715   :  { %p1680_p8 = scmp.ne.s32.totalorder %s1458_s16, %s1679_s2  ;;  %p1685_p10 = scmp.lt.s32.totalorder %s1679_s2, %s1679_s2 }
 0x717   :  { %1506 = vmatmul.mubr.msk.f32.vlgmr.msra.gmra.mrb[40].mxu0 %vm306_vm0, %v1237_v22  ;;  %p1686_p11 = por %p1685_p10, %p1684_p9 }
 0x719   :  { %p1687_p12 = pnand %p1686_p11, %p1680_p8 }
 0x7ea   :  { %v1313_v24 = vpop.f32.mrb[40].mxu0 }
 0x7eb   :  { %v1314_v25 = vadd.f32 %v1313_v24, %v1242_v23  ;;  %v1315_v26 = vpop.f32.mrb[41].mxu0 }
 0x7ec   :  { %v1316_v27 = vadd.f32 %v1315_v26, %v1242_v23 }
 0x7ed   :  { %v1324_v28 = vand.u32 2147483647, %v1314_v25  ;;  %v1318_v52 = vmax.f32 %v1314_v25, 0.0  ;;  %vm1320_vm3 = vcmp.ne.f32.partialorder %v1314_v25, %v1314_v25 }
 0x7ee   :  { %v1325_v29 = vand.u32 2147483647, %v1316_v27  ;;  %v1361_v30 = vcombine.low %v1314_v25, %v1316_v27  ;;  %v1319_v55 = vmax.f32 %v1316_v27, 0.0  ;;  %vm1321_vm4 = vcmp.ne.f32.partialorder %v1316_v27, %v1316_v27 }
 0x7ef   :  { %v1326_v31 = vsub.f32 0.0, %v1324_v28 }
 0x7f0   :  { %v1327_v32 = vsub.f32 0.0, %v1325_v29  ;;  %v1368_v13 = vrot.slane %v1361_v30, %v1367_v6 }
 0x7f1   :  { %v1328_v33 = vmul.f32 1.442695, %v1326_v31 }
 0x7f2   :  { %v1330_v34 = vmul.f32 1.442695, %v1327_v32  ;;  %v1375_v18 = vrot.slane %v1368_v13, %v1367_v6 }
 0x7f3   :  { %1643 = vpow2.f32 %v1328_v33 }
 0x7f4   :  { %1645 = vpow2.f32 %v1330_v34  ;;  %v1377_v21 = vsub.f32 %v1358_v20, %v1375_v18 }
 0x7fd   :  { %v1644_v35 = vpop.eup %1643 }
 0x7fe   :  { %v1646_v36 = vpop.eup %1645  ;;  %v1332_v37 = vadd.f32 1.0, %v1644_v35  ;;  %v1335_v39 = vmul.f32 -0.5, %v1644_v35  ;;  %v1338_v44 = vand.u32 2147483647, %v1644_v35 }
 0x7ff   :  { %v1341_v38 = vadd.f32 1.0, %v1646_v36  ;;  %v1344_v40 = vmul.f32 -0.5, %v1646_v36  ;;  %v1347_v47 = vand.u32 2147483647, %v1646_v36 }
 0x800   :  { %1647 = vlog2.f32 %v1332_v37  ;;  %v1336_v43 = vadd.f32 1.0, %v1335_v39  ;;  %vm1339_vm1 = vcmp.lt.f32.partialorder %v1338_v44, 0.0004427343 }
 0x801   :  { %1649 = vlog2.f32 %v1341_v38  ;;  %v1345_v46 = vadd.f32 1.0, %v1344_v40  ;;  %vm1348_vm2 = vcmp.lt.f32.partialorder %v1347_v47, 0.0004427343 }
 0x802   :  { %v1337_v51 = vmul.f32 %v1644_v35, %v1336_v43 }
 0x803   :  { %v1346_v54 = vmul.f32 %v1646_v36, %v1345_v46 }
 0x80a   :  { %v1648_v48 = vpop.eup %1647 }
 0x80b   :  { %v1650_v49 = vpop.eup %1649  ;;  %v1334_v50 = vmul.f32 0.6931472, %v1648_v48 }
 0x80c   :  { %v1343_v53 = vmul.f32 0.6931472, %v1650_v49 }
 0x80d   :  { %v1340_v56 = vsel %vm1339_vm1, %v1337_v51, %v1334_v50 }
 0x80e   :  { %v1349_v59 = vsel %vm1348_vm2, %v1346_v54, %v1343_v53  ;;  %v1350_v60 = vadd.f32 %v1340_v56, %v1318_v52 }
 0x80f   :  { %v1351_v61 = vadd.f32 %v1349_v59, %v1319_v55 }
 0x810   :  { %v1352_v62 = vsel %vm1320_vm3, %v1314_v25, %v1350_v60 }
 0x811   :  { %v1353_v63 = vsel %vm1321_vm4, %v1316_v27, %v1351_v61  ;;  %v1354_v0 = vmul.f32 0.9, %v1352_v62 }
 0x812   :  { %v1355_v2 = vmul.f32 0.9, %v1353_v63 }
 0x813   :  { %v1356_v3 = vadd.f32 0.1, %v1354_v0 }
 0x814   :  { %v1357_v4 = vadd.f32 0.1, %v1355_v2 }
 0x815   :  { %1651 = vlog2.f32 %v1356_v3  ;;  %v1441_v5 = vsel %vm1440_vm5, %v1314_v25, %v1356_v3 }
 0x816   :  { %v1380_v7 = vcombine.low %v1356_v3, %v1357_v4  ;;  %1653 = vlog2.f32 %v1357_v4  ;;  %v1442_v8 = vsel %vm1440_vm5, %v1316_v27, %v1357_v4 }
 0x818   :  { %v1387_v10 = vrot.slane %v1380_v7, %v1367_v6 }
 0x81a   :  { %v1388_v9 = vcombine.high %v1387_v10, %v1387_v10 }
 0x81c   :  { %v1395_v11 = vrot.slane %v1388_v9, %v1367_v6 }
 0x81e   :  { %1655 = vrcp.f32 %v1395_v11 }
 0x81f   :  { %v1652_v12 = vpop.eup %1651 }
 0x820   :  { %v1654_v14 = vpop.eup %1653  ;;  %v1401_v15 = vmul.f32 0.6931472, %v1652_v12 }
 0x821   :  { %v1403_v16 = vmul.f32 0.6931472, %v1654_v14 }
 0x822   :  { %v1404_v17 = vmul.f32 2.0, %v1401_v15 }
 0x823   :  { %v1405_v19 = vmul.f32 2.0, %v1403_v16 }
 0x825   :  { %v1408_v41 = vcombine.low %v1404_v17, %v1405_v19 }
 0x827   :  { %v1415_v22 = vrot.slane %v1408_v41, %v1367_v6 }
 0x828   :  { %v1656_v23 = vpop.eup %1655 }
 0x829   :  { %v1398_v24 = vmul.f32 %v1656_v23, %v1377_v21  ;;  %v1416_v25 = vcombine.high %v1415_v22, %v1415_v22 }
 0x82b   :  { %v1399_v26 = vmul.f32 %v1398_v24, %v1398_v24  ;;  %v1423_v27 = vrot.slane %v1416_v25, %v1367_v6 }
 0x82d   :  { %v1425_v28 = vadd.f32 %v1423_v27, %v1399_v26 }
 0x82f   :  { %v1426_v29 = vadd.f32 1.837877, %v1425_v28 }
 0x831   :  { %v1428_v30 = vmul.f32 -0.5, %v1426_v29 }
 0x833   :  { %v1433_v31 = vrot.slane %v1428_v30, %v1931_v42  ;;  %v1437_v32 = vrot.slane %v1428_v30, %v1938_v45 }
 0x835   :  { %v1444_v33 = vsel %vm1443_vm6, %v1441_v5, %v1433_v31  ;;  %v1445_v34 = vsel %vm1443_vm6, %v1442_v8, %v1437_v32 }
 0x836   :  { %v1448_v35 = vcombine.low %v1444_v33, %v1445_v34 }
 0x838   :  { %1450 = vst [vmem:[#allocation5] sm:$0x77] %v1448_v35 }
 0x839   :  { %1690 = shalt.err (!%p1687_p12)
}
 0x83a   :  { %s1691_s26 = scalar_lea.hbm %s2110_s17, 128 }
 0x83b   :  { %p1692_p13 = scmp.ne.s32.totalorder %s2110_s17, %s1691_s26  ;;  %p1695_p0 = scmp.lt.u32.totalorder %s1691_s26, %s2110_s17 }
 0x83d   :  { %p1697_p1 = pnand %p1695_p0, %p1692_p13 }
 0x83f   :  { %1700 = shalt.err (!%p1697_p1)
}
 0x840   :  { %1460 = dma.vmem_to_hbm [thread:$0]  %s1458_s16, 128, %s2110_s17, [#allocation4]  }
 0x841   :  { %1703 = dma.done.wait [#allocation4], 128  }
 0x842   :  { %1704 = vsyncadd [#allocation4], 4294967168 }
 0x843   :  { %1464 = vsyncpa [#allocation3], 1 }
 0x844   :  { %1465 = vsyncpa [#allocation4], 1 }

</bundles_post_ra>
